<compile_context>
chip_gen: v7x
topology: tpu7x:2x2x1
jax: 0.10.0
libtpu: 0.0.40
codegen_flags: <defaults>
</compile_context>

<pallas_src>
import functools

import jax
import jax.numpy as jnp
from jax.experimental import pallas as pl
from jax.experimental.pallas import tpu as pltpu


# Abramowitz & Stegun 4.4.46 minimax polynomial:  acos(x) ~= sqrt(1-x) * poly(x)
# for 0 <= x <= 1, |error| <= 2e-8.  x < 0 handled by acos(-x) = pi - acos(x).
_ACOS_COEFFS = (
    1.5707963050,
    -0.2145988016,
    0.0889789874,
    -0.0501743046,
    0.0308918810,
    -0.0170881256,
    0.0066700901,
    -0.0012624911,
)


def _acos_poly(x):
    """acos(x), x clamped to [-1, 1]; VPU mul/add + one EUP sqrt per element."""
    x = jnp.clip(x, -1.0, 1.0)
    ax = jnp.abs(x)
    p = jnp.float32(_ACOS_COEFFS[-1])
    for c in _ACOS_COEFFS[-2::-1]:          # Horner
        p = p * ax + jnp.float32(c)
    r = jnp.sqrt(jnp.maximum(1.0 - ax, 0.0)) * p
    return jnp.where(x < 0.0, jnp.float32(jnp.pi) - r, r)


def _row_normalize_kernel(x_ref, o_ref):
    # x / max(||x||, 1e-12)  ==  x * rsqrt(max(||x||^2, 1e-24))   (F.normalize, dim=1)
    x = x_ref[...].astype(jnp.float32)
    sq = jnp.sum(x * x, axis=-1, keepdims=True)          # XLU lane reduce
    o_ref[...] = x * jax.lax.rsqrt(jnp.maximum(sq, 1e-24))


def _rkd_angle_tile_kernel(s_ref, t_ref, o_ref, s_n_ref):
    # s_ref  : (tm, Dp) raw student rows for row-block i (resident across j)
    # t_ref  : (tn, Dp) pre-normalized teacher rows for column-block j (f32)
    # o_ref  : (tm, 1)  per-row partial sums of acos(cos)^2, accumulated over j
    # s_n_ref: (tm, Dp) VMEM scratch holding the normalized student block
    j = pl.program_id(1)

    @pl.when(j == 0)
    def _():
        s = s_ref[...].astype(jnp.float32)
        sq = jnp.sum(s * s, axis=-1, keepdims=True)
        s_n_ref[...] = s * jax.lax.rsqrt(jnp.maximum(sq, 1e-24))
        o_ref[...] = jnp.zeros_like(o_ref)

    # (tm, Dp) x (tn, Dp)^T -> (tm, tn) cosine tile on the MXU, f32 accumulate.
    cos = jax.lax.dot_general(
        s_n_ref[...], t_ref[...],
        (((1,), (1,)), ((), ())),
        preferred_element_type=jnp.float32)

    ac = _acos_poly(cos)                                   # clamp + polynomial acos
    o_ref[...] += jnp.sum(ac * ac, axis=-1, keepdims=True)  # fused reduction tail


def _pick_tile(n, target, align):
    """Largest multiple of `align` that divides `n` and is <= `target`; else full dim."""
    if n <= target:
        return n
    t = (min(target, n) // align) * align
    while t >= align:
        if n % t == 0:
            return t
        t -= align
    return n  # fall back to the full (un-tiled) dimension


@functools.partial(jax.jit, static_argnames=("tm", "tn"))
def rkd_angle_loss(student, teacher, *, tm=256, tn=256):
    """RKD angle loss.  student, teacher: [B, D] embeddings."""
    assert student.shape == teacher.shape and student.ndim == 2
    B, D = student.shape

    # Zero-pad the feature dim to a lane-dense multiple of 128 (does not change
    # row norms or dot products).
    Dp = -(-D // 128) * 128
    if Dp != D:
        pad = ((0, 0), (0, Dp - D))
        student = jnp.pad(student, pad)
        teacher = jnp.pad(teacher, pad)

    in_bytes = student.dtype.itemsize
    sublane = {1: 32, 2: 16, 4: 8}.get(in_bytes, 8)   # dtype-aware sublane packing
    tm = _pick_tile(B, tm, sublane)
    tn = _pick_tile(B, tn, 128)                       # lane-aligned column tile
    grid_i, grid_j = B // tm, B // tn

    # Pre-normalize the teacher once (mem-bound O(B*D) pass) so it is never
    # re-normalized per output tile; keep it f32 for MXU accuracy parity.
    tr = _pick_tile(B, 256, sublane)
    teacher_n = pl.pallas_call(
        _row_normalize_kernel,
        out_shape=jax.ShapeDtypeStruct((B, Dp), jnp.float32),
        grid=(B // tr,),
        in_specs=[pl.BlockSpec((tr, Dp), lambda i: (i, 0))],
        out_specs=pl.BlockSpec((tr, Dp), lambda i: (i, 0)),
        compiler_params=pltpu.CompilerParams(dimension_semantics=("parallel",)),
    )(teacher)

    # VMEM budget derived from the actual tile bytes (double-buffered inputs,
    # resident normalized-student scratch, elementwise temporaries) so the same
    # code fits v7x's 64 MiB as well as v5e/v6e's 128 MiB.
    vmem_bytes = (2 * tm * Dp * in_bytes      # student blocks (double-buffered)
                  + 2 * tn * Dp * 4           # normalized-teacher blocks
                  + tm * Dp * 4               # resident normalized-student scratch
                  + 8 * tm * tn * 4           # cos / acos elementwise temporaries
                  + (2 << 20))                # headroom
    vmem_bytes = int(min(max(vmem_bytes, 16 << 20), 56 << 20))

    cost = pl.CostEstimate(
        flops=2 * B * B * Dp + 20 * B * B,
        transcendentals=B * B + 2 * B,
        bytes_accessed=B * Dp * in_bytes + B * Dp * 4 + B * 4)

    row_sums = pl.pallas_call(
        _rkd_angle_tile_kernel,
        out_shape=jax.ShapeDtypeStruct((B, 1), jnp.float32),
        grid=(grid_i, grid_j),
        in_specs=[
            pl.BlockSpec((tm, Dp), lambda i, j: (i, 0)),   # student rows (resident over j)
            pl.BlockSpec((tn, Dp), lambda i, j: (j, 0)),   # normalized teacher rows
        ],
        out_specs=pl.BlockSpec((tm, 1), lambda i, j: (i, 0)),  # per-row partial sums
        scratch_shapes=[pltpu.VMEM((tm, Dp), jnp.float32)],
        compiler_params=pltpu.CompilerParams(
            dimension_semantics=("parallel", "arbitrary"),  # row blocks parallel, j = reduction
            vmem_limit_bytes=vmem_bytes),
        cost_estimate=cost,
    )(student, teacher_n)

    # Tiny O(B) tail: mean over all B*B pairs.
    return jnp.sum(row_sums) / (B * B)


def _reference(student, teacher):
    s = student / jnp.maximum(jnp.linalg.norm(student, axis=1, keepdims=True), 1e-12)
    t = teacher / jnp.maximum(jnp.linalg.norm(teacher, axis=1, keepdims=True), 1e-12)
    dot = jnp.clip(s @ t.T, -1.0, 1.0)
    return jnp.mean(jnp.arccos(dot) ** 2)


if __name__ == "__main__":
    # Small embedding batch; with tm=tn=256 this gives a (2, 2) grid so the
    # j-accumulation, student-normalization caching, and teacher pre-pass all run.
    B, D = 512, 64

    key = jax.random.PRNGKey(0)
    k1, k2 = jax.random.split(key)
    student = jax.random.normal(k1, (B, D), dtype=jnp.float32)
    teacher = jax.random.normal(k2, (B, D), dtype=jnp.float32)

    out = jax.block_until_ready(rkd_angle_loss(student, teacher))

    ref = _reference(student, teacher)
    assert jnp.allclose(out, ref, rtol=1e-4, atol=1e-4), (out, ref)

    print("KERNEL_OK")
</pallas_src>

<mosaic_0001>
module attributes {stable_mosaic.version = 11 : i64} {
  func.func @_row_normalize_kernel(%arg0: i32, %arg1: memref<256x128xf32, #tpu.memory_space<vmem>>, %arg2: memref<256x128xf32, #tpu.memory_space<vmem>>) attributes {dimension_semantics = [#tpu.dimension_semantics<parallel>], iteration_bounds = array<i64: 2>, scalar_prefetch = 0 : i64, scratch_operands = 0 : i64, tpu.core_type = #tpu.core_type<tc>, window_params = [{transform_indices = @transform_0, window_bounds = array<i64: 256, 128>}, {transform_indices = @transform_1, window_bounds = array<i64: 256, 128>}]} {
    %c0 = arith.constant 0 : index
    %c0_0 = arith.constant 0 : index
    %0 = vector.load %arg1[%c0, %c0_0] : memref<256x128xf32, #tpu.memory_space<vmem>>, vector<256x128xf32>
    %1 = arith.mulf %0, %0 : vector<256x128xf32>
    %cst = arith.constant dense<0.000000e+00> : vector<256xf32>
    %2 = vector.multi_reduction <add>, %1, %cst [1] : vector<256x128xf32> to vector<256xf32>
    %3 = vector.shape_cast %2 : vector<256xf32> to vector<256x1xf32>
    %cst_1 = arith.constant 1.000000e-24 : f32
    %4 = vector.broadcast %cst_1 : f32 to vector<256x1xf32>
    %5 = arith.maximumf %3, %4 : vector<256x1xf32>
    %6 = math.rsqrt %5 : vector<256x1xf32>
    %7 = vector.broadcast %6 : vector<256x1xf32> to vector<256x128xf32>
    %8 = arith.mulf %0, %7 : vector<256x128xf32>
    %c0_2 = arith.constant 0 : index
    %c0_3 = arith.constant 0 : index
    %9 = vector.load %arg2[%c0_2, %c0_3] : memref<256x128xf32, #tpu.memory_space<vmem>>, vector<256x128xf32>
    tpu.vector_store %arg2[%c0_2, %c0_3], %8 {strides = array<i32>} : memref<256x128xf32, #tpu.memory_space<vmem>>, vector<256x128xf32>,
    return
  }
  func.func @transform_0(%arg0: i32) -> (i32, i32) {
    %c0_i32 = arith.constant 0 : i32
    %c0_i32_0 = arith.constant 0 : i32
    return %arg0, %c0_i32 : i32, i32
  }
  func.func @transform_1(%arg0: i32) -> (i32, i32) {
    %c0_i32 = arith.constant 0 : i32
    %c0_i32_0 = arith.constant 0 : i32
    return %arg0, %c0_i32 : i32, i32
  }
}

module attributes {stable_mosaic.version = 11 : i64} {
  func.func @_rkd_angle_tile_kernel(%arg0: i32, %arg1: i32, %arg2: memref<256x128xf32, #tpu.memory_space<vmem>>, %arg3: memref<256x128xf32, #tpu.memory_space<vmem>>, %arg4: memref<256x1xf32, #tpu.memory_space<vmem>>, %arg5: memref<256x128xf32, #tpu.memory_space<vmem>>) attributes {dimension_semantics = [#tpu.dimension_semantics<parallel>, #tpu.dimension_semantics<arbitrary>], iteration_bounds = array<i64: 2, 2>, scalar_prefetch = 0 : i64, scratch_operands = 1 : i64, tpu.core_type = #tpu.core_type<tc>, window_params = [{transform_indices = @transform_0, window_bounds = array<i64: 256, 128>}, {transform_indices = @transform_1, window_bounds = array<i64: 256, 128>}, {transform_indices = @transform_2, window_bounds = array<i64: 256, 1>}]} {
    %c0_i32 = arith.constant 0 : i32
    %0 = arith.cmpi eq, %arg1, %c0_i32 : i32
    %1 = arith.extui %0 : i1 to i32
    %c0_i32_0 = arith.constant 0 : i32
    %2 = arith.cmpi ne, %1, %c0_i32_0 : i32
    scf.if %2 {
      %c0_23 = arith.constant 0 : index
      %c0_24 = arith.constant 0 : index
      %50 = vector.load %arg2[%c0_23, %c0_24] : memref<256x128xf32, #tpu.memory_space<vmem>>, vector<256x128xf32>
      %51 = arith.mulf %50, %50 : vector<256x128xf32>
      %cst_25 = arith.constant dense<0.000000e+00> : vector<256xf32>
      %52 = vector.multi_reduction <add>, %51, %cst_25 [1] : vector<256x128xf32> to vector<256xf32>
      %53 = vector.shape_cast %52 : vector<256xf32> to vector<256x1xf32>
      %cst_26 = arith.constant 1.000000e-24 : f32
      %54 = vector.broadcast %cst_26 : f32 to vector<256x1xf32>
      %55 = arith.maximumf %53, %54 : vector<256x1xf32>
      %56 = math.rsqrt %55 : vector<256x1xf32>
      %57 = vector.broadcast %56 : vector<256x1xf32> to vector<256x128xf32>
      %58 = arith.mulf %50, %57 : vector<256x128xf32>
      %c0_27 = arith.constant 0 : index
      %c0_28 = arith.constant 0 : index
      %59 = vector.load %arg5[%c0_27, %c0_28] : memref<256x128xf32, #tpu.memory_space<vmem>>, vector<256x128xf32>
      tpu.vector_store %arg5[%c0_27, %c0_28], %58 {strides = array<i32>} : memref<256x128xf32, #tpu.memory_space<vmem>>, vector<256x128xf32>,
      %cst_29 = arith.constant 0.000000e+00 : f32
      %60 = vector.broadcast %cst_29 : f32 to vector<256x1xf32>
      %c0_30 = arith.constant 0 : index
      %c0_31 = arith.constant 0 : index
      %61 = vector.load %arg4[%c0_30, %c0_31] : memref<256x1xf32, #tpu.memory_space<vmem>>, vector<256x1xf32>
      tpu.vector_store %arg4[%c0_30, %c0_31], %60 {strides = array<i32>} : memref<256x1xf32, #tpu.memory_space<vmem>>, vector<256x1xf32>,
    } else {
    }
    %c0 = arith.constant 0 : index
    %c0_1 = arith.constant 0 : index
    %3 = vector.load %arg5[%c0, %c0_1] : memref<256x128xf32, #tpu.memory_space<vmem>>, vector<256x128xf32>
    %c0_2 = arith.constant 0 : index
    %c0_3 = arith.constant 0 : index
    %4 = vector.load %arg3[%c0_2, %c0_3] : memref<256x128xf32, #tpu.memory_space<vmem>>, vector<256x128xf32>
    %cst = arith.constant dense<0.000000e+00> : vector<256x256xf32>
    %5 = tpu.matmul %3, %4, %cst {dimension_numbers = #tpu.dot_dimension_numbers<[1], [1], [0], [0], [0, 0, 1, 0], [], []>} : vector<256x128xf32>, vector<256x128xf32>, vector<256x256xf32> -> vector<256x256xf32>
    %cst_4 = arith.constant -1.000000e+00 : f32
    %cst_5 = arith.constant 1.000000e+00 : f32
    %6 = vector.broadcast %cst_4 : f32 to vector<256x256xf32>
    %7 = arith.maximumf %6, %5 : vector<256x256xf32>
    %8 = vector.broadcast %cst_5 : f32 to vector<256x256xf32>
    %9 = arith.minimumf %8, %7 : vector<256x256xf32>
    %10 = math.absf %9 : vector<256x256xf32>
    %cst_6 = arith.constant -0.0012624911 : f32
    %11 = vector.broadcast %cst_6 : f32 to vector<256x256xf32>
    %12 = arith.mulf %11, %10 : vector<256x256xf32>
    %cst_7 = arith.constant 6.670090e-03 : f32
    %13 = vector.broadcast %cst_7 : f32 to vector<256x256xf32>
    %14 = arith.addf %12, %13 : vector<256x256xf32>
    %15 = arith.mulf %14, %10 : vector<256x256xf32>
    %cst_8 = arith.constant -0.0170881264 : f32
    %16 = vector.broadcast %cst_8 : f32 to vector<256x256xf32>
    %17 = arith.addf %15, %16 : vector<256x256xf32>
    %18 = arith.mulf %17, %10 : vector<256x256xf32>
    %cst_9 = arith.constant 0.0308918804 : f32
    %19 = vector.broadcast %cst_9 : f32 to vector<256x256xf32>
    %20 = arith.addf %18, %19 : vector<256x256xf32>
    %21 = arith.mulf %20, %10 : vector<256x256xf32>
    %cst_10 = arith.constant -0.0501743034 : f32
    %22 = vector.broadcast %cst_10 : f32 to vector<256x256xf32>
    %23 = arith.addf %21, %22 : vector<256x256xf32>
    %24 = arith.mulf %23, %10 : vector<256x256xf32>
    %cst_11 = arith.constant 0.0889789909 : f32
    %25 = vector.broadcast %cst_11 : f32 to vector<256x256xf32>
    %26 = arith.addf %24, %25 : vector<256x256xf32>
    %27 = arith.mulf %26, %10 : vector<256x256xf32>
    %cst_12 = arith.constant -0.214598805 : f32
    %28 = vector.broadcast %cst_12 : f32 to vector<256x256xf32>
    %29 = arith.addf %27, %28 : vector<256x256xf32>
    %30 = arith.mulf %29, %10 : vector<256x256xf32>
    %cst_13 = arith.constant 1.57079625 : f32
    %31 = vector.broadcast %cst_13 : f32 to vector<256x256xf32>
    %32 = arith.addf %30, %31 : vector<256x256xf32>
    %cst_14 = arith.constant 1.000000e+00 : f32
    %33 = vector.broadcast %cst_14 : f32 to vector<256x256xf32>
    %34 = arith.subf %33, %10 : vector<256x256xf32>
    %cst_15 = arith.constant 0.000000e+00 : f32
    %35 = vector.broadcast %cst_15 : f32 to vector<256x256xf32>
    %36 = arith.maximumf %34, %35 : vector<256x256xf32>
    %37 = math.sqrt %36 : vector<256x256xf32>
    %38 = arith.mulf %37, %32 : vector<256x256xf32>
    %cst_16 = arith.constant 0.000000e+00 : f32
    %39 = vector.broadcast %cst_16 : f32 to vector<256x256xf32>
    %40 = arith.cmpf olt, %9, %39 : vector<256x256xf32>
    %cst_17 = arith.constant 3.14159274 : f32
    %41 = vector.broadcast %cst_17 : f32 to vector<256x256xf32>
    %42 = arith.subf %41, %38 : vector<256x256xf32>
    %43 = arith.select %40, %42, %38 : vector<256x256xi1>, vector<256x256xf32>
    %c0_18 = arith.constant 0 : index
    %c0_19 = arith.constant 0 : index
    %44 = vector.load %arg4[%c0_18, %c0_19] : memref<256x1xf32, #tpu.memory_space<vmem>>, vector<256x1xf32>
    %45 = arith.mulf %43, %43 : vector<256x256xf32>
    %cst_20 = arith.constant dense<0.000000e+00> : vector<256xf32>
    %46 = vector.multi_reduction <add>, %45, %cst_20 [1] : vector<256x256xf32> to vector<256xf32>
    %47 = vector.shape_cast %46 : vector<256xf32> to vector<256x1xf32>
    %48 = arith.addf %44, %47 : vector<256x1xf32>
    %c0_21 = arith.constant 0 : index
    %c0_22 = arith.constant 0 : index
    %49 = vector.load %arg4[%c0_21, %c0_22] : memref<256x1xf32, #tpu.memory_space<vmem>>, vector<256x1xf32>
    tpu.vector_store %arg4[%c0_21, %c0_22], %48 {strides = array<i32>} : memref<256x1xf32, #tpu.memory_space<vmem>>, vector<256x1xf32>,
    return
  }
  func.func @transform_0(%arg0: i32, %arg1: i32) -> (i32, i32) {
    %c0_i32 = arith.constant 0 : i32
    %c0_i32_0 = arith.constant 0 : i32
    return %arg0, %c0_i32 : i32, i32
  }
  func.func @transform_1(%arg0: i32, %arg1: i32) -> (i32, i32) {
    %c0_i32 = arith.constant 0 : i32
    %c0_i32_0 = arith.constant 0 : i32
    return %arg1, %c0_i32 : i32, i32
  }
  func.func @transform_2(%arg0: i32, %arg1: i32) -> (i32, i32) {
    %c0_i32 = arith.constant 0 : i32
    %c0_i32_0 = arith.constant 0 : i32
    return %arg0, %c0_i32 : i32, i32
  }
}

</mosaic_0001>

<bundles_post_ra>
// kernel: rkd_angle_loss.2
= control target key start
LH: loop header
LB: loop body
LE: loop exit
PB: predicated region body
PF: predicated region fallthrough
CT: control target
= control target key end

     0   :  { %s533_s6 = smov 0   ;;  %s785_s0 = inlined_call_operand.vmem [shape: f32[512,128], index: 0, kind: input, shape index: {}]   ;;  %s786_s1 = inlined_call_operand.vmem [shape: f32[512,128], index: 1, kind: output, shape index: {}]  }
   0x1 LB: > { %s432_s7 = sadd.s32 4294967295, %s521_s6   ;;  %p436_p0 = scmp.ge.s32.totalorder %s521_s6, 1  ;;  %s521_s6 = sphi %s533_s6, %s11_s6  }
   0x2   : > { %p88_p1 = scmp.lt.s32.totalorder %s521_s6, 3 }
   0x4   : > { %p89_p2 = pnand %p436_p0, %p88_p1 }
   0x5   : > { %s437_s8 = sshll.u32 (!%p89_p2), %s432_s7, 5 }
   0x6   : > { %92 = sbr.rel (%p89_p2) target bundleno = 238 (0xee), region = 24  ;;  %p109_p3 = scmp.lt.s32.totalorder (!%p89_p2), %s437_s8, 63 }
   0xd   : > { %s788_s8 = smov (!%p109_p3, %s437_s8), 63 }
   0xe   : > { %s438_s9 = sshll.u32 %s788_s8, 3 }
   0xf   : > { %s549_s12 = scalar_lea.vmem %s785_s0, %s438_s9  ;;  %s716_s15 = scalar_lea.vmem %s786_s1, %s438_s9 }
  0x10   : > { %v552_v0 = vld [vmem:[%s549_s12 + $0x10] sm:$0xff]  ;;  %v555_v1 = vld [vmem:[%s549_s12] sm:$0xff]  ;;  %v558_v2 = vld [vmem:[%s549_s12 + $0x18] sm:$0xff] }
  0x11   : > { %v154_v3 = vmul.f32 %v552_v0, %v552_v0  ;;  %v152_v4 = vmul.f32 %v555_v1, %v555_v1  ;;  %v565_v5 = vld [vmem:[%s549_s12 + $0x8] sm:$0xff]  ;;  %v155_v6 = vmul.f32 %v558_v2, %v558_v2  ;;  %v575_v9 = vld [vmem:[%s549_s12 + $0x20] sm:$0xff]  ;;  %v582_v12 = vld [vmem:[%s549_s12 + $0x38] sm:$0xff] }
  0x12   : > { %v153_v7 = vmul.f32 %v565_v5, %v565_v5  ;;  %v572_v8 = vld [vmem:[%s549_s12 + $0x28] sm:$0xff]  ;;  %v156_v11 = vmul.f32 %v575_v9, %v575_v9  ;;  %v585_v13 = vld [vmem:[%s549_s12 + $0x30] sm:$0xff]  ;;  %v159_v14 = vmul.f32 %v582_v12, %v582_v12  ;;  %v595_v17 = vld [vmem:[%s549_s12 + $0x40] sm:$0xff] }
  0x13   : > { %188 = vadd.xlane.f32.xlu1 %v154_v3  ;;  %184 = vadd.xlane.f32.xlu0 %v152_v4  ;;  %v157_v10 = vmul.f32 %v572_v8, %v572_v8  ;;  %v158_v15 = vmul.f32 %v585_v13, %v585_v13  ;;  %v592_v16 = vld [vmem:[%s549_s12 + $0x48] sm:$0xff]  ;;  %v160_v19 = vmul.f32 %v595_v17, %v595_v17  ;;  %v602_v20 = vld [vmem:[%s549_s12 + $0x58] sm:$0xff]  ;;  %v605_v21 = vld [vmem:[%s549_s12 + $0x50] sm:$0xff] }
  0x14   : > { %v161_v18 = vmul.f32 %v592_v16, %v592_v16  ;;  %v163_v22 = vmul.f32 %v602_v20, %v602_v20  ;;  %v162_v23 = vmul.f32 %v605_v21, %v605_v21  ;;  %v612_v24 = vld [vmem:[%s549_s12 + $0x68] sm:$0xff]  ;;  %v615_v25 = vld [vmem:[%s549_s12 + $0x60] sm:$0xff]  ;;  %v622_v28 = vld [vmem:[%s549_s12 + $0x78] sm:$0xff] }
  0x15   : > { %v165_v26 = vmul.f32 %v612_v24, %v612_v24  ;;  %v164_v27 = vmul.f32 %v615_v25, %v615_v25  ;;  %v625_v29 = vld [vmem:[%s549_s12 + $0x70] sm:$0xff]  ;;  %v167_v30 = vmul.f32 %v622_v28, %v622_v28  ;;  %v632_v32 = vld [vmem:[%s549_s12 + $0x88] sm:$0xff]  ;;  %v635_v33 = vld [vmem:[%s549_s12 + $0x80] sm:$0xff] }
  0x16   : > { %v166_v31 = vmul.f32 %v625_v29, %v625_v29  ;;  %v169_v34 = vmul.f32 %v632_v32, %v632_v32  ;;  %v168_v35 = vmul.f32 %v635_v33, %v635_v33  ;;  %v642_v36 = vld [vmem:[%s549_s12 + $0x98] sm:$0xff]  ;;  %v645_v37 = vld [vmem:[%s549_s12 + $0x90] sm:$0xff]  ;;  %v652_v40 = vld [vmem:[%s549_s12 + $0xa8] sm:$0xff] }
  0x17   : > { %190 = vadd.xlane.f32.xlu1 %v155_v6  ;;  %186 = vadd.xlane.f32.xlu0 %v153_v7  ;;  %v171_v38 = vmul.f32 %v642_v36, %v642_v36  ;;  %v170_v39 = vmul.f32 %v645_v37, %v645_v37  ;;  %v655_v41 = vld [vmem:[%s549_s12 + $0xa0] sm:$0xff]  ;;  %v173_v42 = vmul.f32 %v652_v40, %v652_v40  ;;  %v662_v44 = vld [vmem:[%s549_s12 + $0xb8] sm:$0xff]  ;;  %v665_v45 = vld [vmem:[%s549_s12 + $0xb0] sm:$0xff] }
  0x18   : > { %v172_v43 = vmul.f32 %v655_v41, %v655_v41  ;;  %v175_v46 = vmul.f32 %v662_v44, %v662_v44  ;;  %v174_v47 = vmul.f32 %v665_v45, %v665_v45  ;;  %v672_v48 = vld [vmem:[%s549_s12 + $0xc8] sm:$0xff]  ;;  %v675_v49 = vld [vmem:[%s549_s12 + $0xc0] sm:$0xff]  ;;  %v682_v52 = vld [vmem:[%s549_s12 + $0xd8] sm:$0xff] }
  0x19   : > { %v177_v50 = vmul.f32 %v672_v48, %v672_v48  ;;  %v176_v51 = vmul.f32 %v675_v49, %v675_v49  ;;  %v685_v53 = vld [vmem:[%s549_s12 + $0xd0] sm:$0xff]  ;;  %v179_v54 = vmul.f32 %v682_v52, %v682_v52  ;;  %v692_v56 = vld [vmem:[%s549_s12 + $0xe8] sm:$0xff]  ;;  %v695_v57 = vld [vmem:[%s549_s12 + $0xe0] sm:$0xff] }
  0x1a   : > { %v178_v55 = vmul.f32 %v685_v53, %v685_v53  ;;  %v181_v58 = vmul.f32 %v692_v56, %v692_v56  ;;  %v180_v59 = vmul.f32 %v695_v57, %v695_v57  ;;  %v702_v60 = vld [vmem:[%s549_s12 + $0xf8] sm:$0xff]  ;;  %v705_v61 = vld [vmem:[%s549_s12 + $0xf0] sm:$0xff] }
  0x1b   : > { %194 = vadd.xlane.f32.xlu1 %v157_v10  ;;  %192 = vadd.xlane.f32.xlu0 %v156_v11  ;;  %v183_v62 = vmul.f32 %v702_v60, %v702_v60  ;;  %v182_v63 = vmul.f32 %v705_v61, %v705_v61 }
  0x1f   : > { %198 = vadd.xlane.f32.xlu1 %v159_v14  ;;  %196 = vadd.xlane.f32.xlu0 %v158_v15 }
  0x23   : > { %202 = vadd.xlane.f32.xlu1 %v161_v18  ;;  %200 = vadd.xlane.f32.xlu0 %v160_v19 }
  0x27   : > { %206 = vadd.xlane.f32.xlu1 %v163_v22  ;;  %204 = vadd.xlane.f32.xlu0 %v162_v23 }
  0x2b   : > { %210 = vadd.xlane.f32.xlu1 %v165_v26  ;;  %208 = vadd.xlane.f32.xlu0 %v164_v27 }
  0x2f   : > { %214 = vadd.xlane.f32.xlu1 %v167_v30  ;;  %212 = vadd.xlane.f32.xlu0 %v166_v31 }
  0x33   : > { %218 = vadd.xlane.f32.xlu1 %v169_v34  ;;  %216 = vadd.xlane.f32.xlu0 %v168_v35 }
  0x37   : > { %222 = vadd.xlane.f32.xlu1 %v171_v38  ;;  %220 = vadd.xlane.f32.xlu0 %v170_v39 }
  0x3b   : > { %226 = vadd.xlane.f32.xlu1 %v173_v42  ;;  %224 = vadd.xlane.f32.xlu0 %v172_v43 }
  0x3f   : > { %230 = vadd.xlane.f32.xlu1 %v175_v46  ;;  %228 = vadd.xlane.f32.xlu0 %v174_v47 }
  0x43   : > { %234 = vadd.xlane.f32.xlu1 %v177_v50  ;;  %232 = vadd.xlane.f32.xlu0 %v176_v51 }
  0x47   : > { %238 = vadd.xlane.f32.xlu1 %v179_v54  ;;  %236 = vadd.xlane.f32.xlu0 %v178_v55 }
  0x4b   : > { %242 = vadd.xlane.f32.xlu1 %v181_v58  ;;  %240 = vadd.xlane.f32.xlu0 %v180_v59 }
  0x4f   : > { %246 = vadd.xlane.f32.xlu1 %v183_v62  ;;  %244 = vadd.xlane.f32.xlu0 %v182_v63 }
  0xa0   : > { %v189_v3 = vpop.xlane.xlu1 %188  ;;  %v185_v4 = vpop.xlane.xlu0 %184 }
  0xa1   : > { %v250_v6 = vmax.f32 %v189_v3, 1e-24  ;;  %v248_v7 = vmax.f32 %v185_v4, 1e-24 }
  0xa3   : > { %451 = vrsqrt.f32 %v250_v6 }
  0xa4   : > { %453 = vrsqrt.f32 %v248_v7  ;;  %v191_v10 = vpop.xlane.xlu1 %190  ;;  %v187_v11 = vpop.xlane.xlu0 %186 }
  0xa5   : > { %v251_v14 = vmax.f32 %v191_v10, 1e-24  ;;  %v249_v15 = vmax.f32 %v187_v11, 1e-24 }
  0xa7   : > { %455 = vrsqrt.f32 %v251_v14 }
  0xa8   : > { %457 = vrsqrt.f32 %v249_v15  ;;  %v195_v18 = vpop.xlane.xlu1 %194  ;;  %v193_v19 = vpop.xlane.xlu0 %192 }
  0xa9   : > { %v253_v22 = vmax.f32 %v195_v18, 1e-24  ;;  %v252_v23 = vmax.f32 %v193_v19, 1e-24 }
  0xab   : > { %459 = vrsqrt.f32 %v253_v22 }
  0xac   : > { %461 = vrsqrt.f32 %v252_v23  ;;  %v199_v26 = vpop.xlane.xlu1 %198  ;;  %v197_v27 = vpop.xlane.xlu0 %196 }
  0xad   : > { %v452_v30 = vpop.eup %451  ;;  %v255_v31 = vmax.f32 %v199_v26, 1e-24  ;;  %v254_v34 = vmax.f32 %v197_v27, 1e-24 }
  0xae   : > { %v454_v35 = vpop.eup %453  ;;  %v314_v38 = vmul.f32 %v452_v30, %v552_v0 }
  0xaf   : > { %v312_v39 = vmul.f32 %v454_v35, %v555_v1  ;;  %463 = vrsqrt.f32 %v255_v31 }
  0xb0   : > { %346 = vst [vmem:[%s716_s15 + $0x10] sm:$0xff] %v314_v38  ;;  %465 = vrsqrt.f32 %v254_v34  ;;  %v203_v42 = vpop.xlane.xlu1 %202  ;;  %v201_v43 = vpop.xlane.xlu0 %200 }
  0xb1   : > { %v456_v46 = vpop.eup %455  ;;  %344 = vst [vmem:[%s716_s15] sm:$0xff] %v312_v39  ;;  %v257_v47 = vmax.f32 %v203_v42, 1e-24  ;;  %v256_v50 = vmax.f32 %v201_v43, 1e-24 }
  0xb2   : > { %v458_v51 = vpop.eup %457  ;;  %v315_v54 = vmul.f32 %v456_v46, %v558_v2 }
  0xb3   : > { %v313_v55 = vmul.f32 %v458_v51, %v565_v5  ;;  %467 = vrsqrt.f32 %v257_v47 }
  0xb4   : > { %347 = vst [vmem:[%s716_s15 + $0x18] sm:$0xff] %v315_v54  ;;  %469 = vrsqrt.f32 %v256_v50  ;;  %v207_v0 = vpop.xlane.xlu1 %206  ;;  %v205_v1 = vpop.xlane.xlu0 %204 }
  0xb5   : > { %v460_v58 = vpop.eup %459  ;;  %345 = vst [vmem:[%s716_s15 + $0x8] sm:$0xff] %v313_v55  ;;  %v259_v59 = vmax.f32 %v207_v0, 1e-24  ;;  %v258_v62 = vmax.f32 %v205_v1, 1e-24 }
  0xb6   : > { %v462_v63 = vpop.eup %461  ;;  %v317_v3 = vmul.f32 %v460_v58, %v572_v8 }
  0xb7   : > { %v316_v4 = vmul.f32 %v462_v63, %v575_v9  ;;  %471 = vrsqrt.f32 %v259_v59 }
  0xb8   : > { %349 = vst [vmem:[%s716_s15 + $0x28] sm:$0xff] %v317_v3  ;;  %473 = vrsqrt.f32 %v258_v62  ;;  %v211_v2 = vpop.xlane.xlu1 %210  ;;  %v209_v5 = vpop.xlane.xlu0 %208 }
  0xb9   : > { %v464_v6 = vpop.eup %463  ;;  %348 = vst [vmem:[%s716_s15 + $0x20] sm:$0xff] %v316_v4  ;;  %v261_v7 = vmax.f32 %v211_v2, 1e-24  ;;  %v260_v10 = vmax.f32 %v209_v5, 1e-24 }
  0xba   : > { %v466_v11 = vpop.eup %465  ;;  %v319_v14 = vmul.f32 %v464_v6, %v582_v12 }
  0xbb   : > { %v318_v15 = vmul.f32 %v466_v11, %v585_v13  ;;  %475 = vrsqrt.f32 %v261_v7 }
  0xbc   : > { %351 = vst [vmem:[%s716_s15 + $0x38] sm:$0xff] %v319_v14  ;;  %477 = vrsqrt.f32 %v260_v10  ;;  %v215_v8 = vpop.xlane.xlu1 %214  ;;  %v213_v9 = vpop.xlane.xlu0 %212 }
  0xbd   : > { %v468_v18 = vpop.eup %467  ;;  %350 = vst [vmem:[%s716_s15 + $0x30] sm:$0xff] %v318_v15  ;;  %v263_v19 = vmax.f32 %v215_v8, 1e-24  ;;  %v262_v22 = vmax.f32 %v213_v9, 1e-24 }
  0xbe   : > { %v470_v23 = vpop.eup %469  ;;  %v321_v26 = vmul.f32 %v468_v18, %v592_v16 }
  0xbf   : > { %v320_v27 = vmul.f32 %v470_v23, %v595_v17  ;;  %479 = vrsqrt.f32 %v263_v19 }
  0xc0   : > { %353 = vst [vmem:[%s716_s15 + $0x48] sm:$0xff] %v321_v26  ;;  %481 = vrsqrt.f32 %v262_v22  ;;  %v219_v12 = vpop.xlane.xlu1 %218  ;;  %v217_v13 = vpop.xlane.xlu0 %216 }
  0xc1   : > { %v472_v30 = vpop.eup %471  ;;  %352 = vst [vmem:[%s716_s15 + $0x40] sm:$0xff] %v320_v27  ;;  %v265_v31 = vmax.f32 %v219_v12, 1e-24  ;;  %v264_v34 = vmax.f32 %v217_v13, 1e-24 }
  0xc2   : > { %v474_v35 = vpop.eup %473  ;;  %v323_v38 = vmul.f32 %v472_v30, %v602_v20 }
  0xc3   : > { %v322_v39 = vmul.f32 %v474_v35, %v605_v21  ;;  %483 = vrsqrt.f32 %v265_v31 }
  0xc4   : > { %355 = vst [vmem:[%s716_s15 + $0x58] sm:$0xff] %v323_v38  ;;  %485 = vrsqrt.f32 %v264_v34  ;;  %v223_v16 = vpop.xlane.xlu1 %222  ;;  %v221_v17 = vpop.xlane.xlu0 %220 }
  0xc5   : > { %v476_v42 = vpop.eup %475  ;;  %354 = vst [vmem:[%s716_s15 + $0x50] sm:$0xff] %v322_v39  ;;  %v267_v43 = vmax.f32 %v223_v16, 1e-24  ;;  %v266_v46 = vmax.f32 %v221_v17, 1e-24 }
  0xc6   : > { %v478_v47 = vpop.eup %477  ;;  %v325_v50 = vmul.f32 %v476_v42, %v612_v24 }
  0xc7   : > { %v324_v51 = vmul.f32 %v478_v47, %v615_v25  ;;  %487 = vrsqrt.f32 %v267_v43 }
  0xc8   : > { %357 = vst [vmem:[%s716_s15 + $0x68] sm:$0xff] %v325_v50  ;;  %489 = vrsqrt.f32 %v266_v46  ;;  %v227_v20 = vpop.xlane.xlu1 %226  ;;  %v225_v21 = vpop.xlane.xlu0 %224 }
  0xc9   : > { %v480_v54 = vpop.eup %479  ;;  %356 = vst [vmem:[%s716_s15 + $0x60] sm:$0xff] %v324_v51  ;;  %v269_v55 = vmax.f32 %v227_v20, 1e-24  ;;  %v268_v0 = vmax.f32 %v225_v21, 1e-24 }
  0xca   : > { %v482_v1 = vpop.eup %481  ;;  %v327_v58 = vmul.f32 %v480_v54, %v622_v28 }
  0xcb   : > { %v326_v59 = vmul.f32 %v482_v1, %v625_v29  ;;  %491 = vrsqrt.f32 %v269_v55 }
  0xcc   : > { %359 = vst [vmem:[%s716_s15 + $0x78] sm:$0xff] %v327_v58  ;;  %493 = vrsqrt.f32 %v268_v0  ;;  %v231_v24 = vpop.xlane.xlu1 %230  ;;  %v229_v25 = vpop.xlane.xlu0 %228 }
  0xcd   : > { %v484_v62 = vpop.eup %483  ;;  %358 = vst [vmem:[%s716_s15 + $0x70] sm:$0xff] %v326_v59  ;;  %v271_v63 = vmax.f32 %v231_v24, 1e-24  ;;  %v270_v3 = vmax.f32 %v229_v25, 1e-24 }
  0xce   : > { %v486_v4 = vpop.eup %485  ;;  %v329_v2 = vmul.f32 %v484_v62, %v632_v32 }
  0xcf   : > { %v328_v5 = vmul.f32 %v486_v4, %v635_v33  ;;  %495 = vrsqrt.f32 %v271_v63 }
  0xd0   : > { %361 = vst [vmem:[%s716_s15 + $0x88] sm:$0xff] %v329_v2  ;;  %497 = vrsqrt.f32 %v270_v3  ;;  %v235_v28 = vpop.xlane.xlu1 %234  ;;  %v233_v29 = vpop.xlane.xlu0 %232 }
  0xd1   : > { %v488_v6 = vpop.eup %487  ;;  %360 = vst [vmem:[%s716_s15 + $0x80] sm:$0xff] %v328_v5  ;;  %v273_v7 = vmax.f32 %v235_v28, 1e-24  ;;  %v272_v10 = vmax.f32 %v233_v29, 1e-24 }
  0xd2   : > { %v490_v11 = vpop.eup %489  ;;  %v331_v14 = vmul.f32 %v488_v6, %v642_v36 }
  0xd3   : > { %v330_v15 = vmul.f32 %v490_v11, %v645_v37  ;;  %499 = vrsqrt.f32 %v273_v7 }
  0xd4   : > { %363 = vst [vmem:[%s716_s15 + $0x98] sm:$0xff] %v331_v14  ;;  %501 = vrsqrt.f32 %v272_v10  ;;  %v239_v32 = vpop.xlane.xlu1 %238  ;;  %v237_v33 = vpop.xlane.xlu0 %236 }
  0xd5   : > { %v492_v8 = vpop.eup %491  ;;  %362 = vst [vmem:[%s716_s15 + $0x90] sm:$0xff] %v330_v15  ;;  %v275_v9 = vmax.f32 %v239_v32, 1e-24  ;;  %v274_v18 = vmax.f32 %v237_v33, 1e-24 }
  0xd6   : > { %v494_v19 = vpop.eup %493  ;;  %v333_v22 = vmul.f32 %v492_v8, %v652_v40 }
  0xd7   : > { %v332_v23 = vmul.f32 %v494_v19, %v655_v41  ;;  %503 = vrsqrt.f32 %v275_v9 }
  0xd8   : > { %365 = vst [vmem:[%s716_s15 + $0xa8] sm:$0xff] %v333_v22  ;;  %505 = vrsqrt.f32 %v274_v18  ;;  %v243_v36 = vpop.xlane.xlu1 %242  ;;  %v241_v37 = vpop.xlane.xlu0 %240 }
  0xd9   : > { %v496_v26 = vpop.eup %495  ;;  %364 = vst [vmem:[%s716_s15 + $0xa0] sm:$0xff] %v332_v23  ;;  %v277_v27 = vmax.f32 %v243_v36, 1e-24  ;;  %v276_v12 = vmax.f32 %v241_v37, 1e-24 }
  0xda   : > { %v498_v13 = vpop.eup %497  ;;  %v335_v30 = vmul.f32 %v496_v26, %v662_v44 }
  0xdb   : > { %v334_v31 = vmul.f32 %v498_v13, %v665_v45  ;;  %507 = vrsqrt.f32 %v277_v27 }
  0xdc   : > { %367 = vst [vmem:[%s716_s15 + $0xb8] sm:$0xff] %v335_v30  ;;  %509 = vrsqrt.f32 %v276_v12  ;;  %v247_v40 = vpop.xlane.xlu1 %246  ;;  %v245_v41 = vpop.xlane.xlu0 %244 }
  0xdd   : > { %v500_v34 = vpop.eup %499  ;;  %366 = vst [vmem:[%s716_s15 + $0xb0] sm:$0xff] %v334_v31  ;;  %v279_v35 = vmax.f32 %v247_v40, 1e-24  ;;  %v278_v38 = vmax.f32 %v245_v41, 1e-24 }
  0xde   : > { %v502_v39 = vpop.eup %501  ;;  %v337_v16 = vmul.f32 %v500_v34, %v672_v48 }
  0xdf   : > { %v336_v44 = vmul.f32 %v502_v39, %v675_v49  ;;  %511 = vrsqrt.f32 %v279_v35 }
  0xe0   : > { %369 = vst [vmem:[%s716_s15 + $0xc8] sm:$0xff] %v337_v16  ;;  %513 = vrsqrt.f32 %v278_v38 }
  0xe1   : > { %v504_v45 = vpop.eup %503  ;;  %368 = vst [vmem:[%s716_s15 + $0xc0] sm:$0xff] %v336_v44 }
  0xe2   : > { %v506_v17 = vpop.eup %505  ;;  %v339_v42 = vmul.f32 %v504_v45, %v682_v52 }
  0xe3   : > { %v338_v43 = vmul.f32 %v506_v17, %v685_v53 }
  0xe4   : > { %371 = vst [vmem:[%s716_s15 + $0xd8] sm:$0xff] %v339_v42 }
  0xe5   : > { %v508_v46 = vpop.eup %507  ;;  %370 = vst [vmem:[%s716_s15 + $0xd0] sm:$0xff] %v338_v43 }
  0xe6   : > { %v510_v48 = vpop.eup %509  ;;  %v341_v47 = vmul.f32 %v508_v46, %v692_v56 }
  0xe7   : > { %v340_v49 = vmul.f32 %v510_v48, %v695_v57 }
  0xe8   : > { %373 = vst [vmem:[%s716_s15 + $0xe8] sm:$0xff] %v341_v47 }
  0xe9   : > { %v512_v50 = vpop.eup %511  ;;  %372 = vst [vmem:[%s716_s15 + $0xe0] sm:$0xff] %v340_v49 }
  0xea   : > { %v514_v51 = vpop.eup %513  ;;  %v343_v20 = vmul.f32 %v512_v50, %v702_v60 }
  0xeb   : > { %v342_v21 = vmul.f32 %v514_v51, %v705_v61 }
  0xec   : > { %375 = vst [vmem:[%s716_s15 + $0xf8] sm:$0xff] %v343_v20 }
  0xed   : > { %374 = vst [vmem:[%s716_s15 + $0xf0] sm:$0xff] %v342_v21 }
  0xee PF: > { %s11_s6 = sadd.s32 1, %s521_s6  }
  0xef   : > { %p8_p4 = scmp.ge.s32.totalorder %s11_s6, 4  }
  0xf1   :  { %10 = sbr.rel (!%p8_p4) target bundleno = 1 (0x1), region = 54 }

// kernel: rkd_angle_loss.3
= control target key start
LH: loop header
LB: loop body
LE: loop exit
PB: predicated region body
PF: predicated region fallthrough
CT: control target
= control target key end

     0   :  { %s3563_s9 = smov 0   ;;  %s3565_s10 = smov 0   ;;  %s6164_s0 = inlined_call_operand.vmem [shape: f32[512,128], index: 0, kind: input, shape index: {}]   ;;  %s6165_s1 = inlined_call_operand.vmem [shape: f32[512,128], index: 1, kind: input, shape index: {}]   ;;  %s6166_s2 = inlined_call_operand.vmem [shape: f32[512,1], index: 2, kind: output, shape index: {}]  }
   0x1   :  { %s3567_s11 = smov 0   ;;  %s3569_s12 = smov 0  }
   0x2   :  { %s3571_s13 = smov 0  }
   0x3 LB: > { %s21_s14 = sadd.s32 1, %s3537_s11  ;;  %s24_s15 = sadd.s32 1, %s3541_s12  ;;  %s3545_s13 = sphi %s3571_s13, %s12_s13   ;;  %s3541_s12 = sphi %s3569_s12, %s6629_s12   ;;  %s3537_s11 = sphi %s3567_s11, %s6628_s11   ;;  %s3533_s10 = sphi %s3565_s10, %s6627_s10   ;;  %s3529_s9 = sphi %s3563_s9, %s6626_s9  }
   0x4   : > { %p22_p0 = scmp.ge.s32.totalorder %s21_s14, 2  ;;  %p3056_p1 = scmp.ge.s32.totalorder %s3545_s13, 1 }
   0x5   : > { %p136_p2 = scmp.lt.s32.totalorder %s3545_s13, 5 }
   0x6   : > { %s6631_s14 = smov (%p22_p0, %s21_s14), 0  ;;  %s6633_s15 = smov (!%p22_p0, %s24_s15), %s3541_s12 }
   0x7   : > { %p137_p3 = pnand %p3056_p1, %p136_p2  ;;  %p26_p4 = scmp.ge.s32.totalorder %s6633_s15, 2 }
   0x9   : > { %s6635_s15 = smov (%p26_p4, %s6633_s15), 0  ;;  %140 = sbr.rel (%p137_p3) target bundleno = 1204 (0x4b4), region = 28 }
  0x10   : > { %s3057_s16 = sshll.u32 %s3533_s10, 5  ;;  %s3059_s17 = sshll.u32 %s3529_s9, 5 }
  0x11   : > { %p164_p5 = scmp.lt.s32.totalorder %s3057_s16, 63  ;;  %p170_p6 = scmp.lt.s32.totalorder %s3059_s17, 63 }
  0x12   : > { %p3063_p7 = scmp.ne.s32.totalorder %s3529_s9, 0 }
  0x13   : > { %s6637_s16 = smov (!%p164_p5, %s3057_s16), 63  ;;  %s6639_s17 = smov (!%p170_p6, %s3059_s17), 63 }
  0x14   : > { %s3058_s18 = sshll.u32 %s6637_s16, 3  ;;  %s3060_s22 = sshll.u32 %s6639_s17, 3  ;;  %vm441_vm0 = vcmask (!%p3063_p7), 7168  }
  0x15   : > { %s3596_s21 = scalar_lea.vmem %s6164_s0, %s3058_s18  ;;  %s3601_s25 = scalar_lea.vmem %s6165_s1, %s3060_s22 }
  0x16   : > { %s3606_s28 = scalar_lea.vmem %s6166_s2, %s3058_s18  ;;  %184 = sbr.rel (%p3063_p7) target bundleno = 244 (0xf4), region = 32  ;;  %v3609_v0 = vld [vmem:[%s3596_s21 + $0x10] sm:$0xff] (!%p3063_p7)  ;;  %v3612_v1 = vld [vmem:[%s3596_s21] sm:$0xff] (!%p3063_p7)  ;;  %v3615_v2 = vld [vmem:[%s3596_s21 + $0x18] sm:$0xff] (!%p3063_p7) }
  0x17   : > { %v219_v3 = vmul.f32 (!%p3063_p7), %v3609_v0, %v3609_v0  ;;  %v217_v4 = vmul.f32 (!%p3063_p7), %v3612_v1, %v3612_v1  ;;  %v3622_v5 = vld [vmem:[%s3596_s21 + $0x8] sm:$0xff] (!%p3063_p7)  ;;  %v220_v6 = vmul.f32 (!%p3063_p7), %v3615_v2, %v3615_v2  ;;  %v3632_v9 = vld [vmem:[%s3596_s21 + $0x20] sm:$0xff] (!%p3063_p7)  ;;  %v3639_v12 = vld [vmem:[%s3596_s21 + $0x38] sm:$0xff] (!%p3063_p7) }
  0x18   : > { %v218_v7 = vmul.f32 (!%p3063_p7), %v3622_v5, %v3622_v5  ;;  %v3629_v8 = vld [vmem:[%s3596_s21 + $0x28] sm:$0xff] (!%p3063_p7)  ;;  %v221_v11 = vmul.f32 (!%p3063_p7), %v3632_v9, %v3632_v9  ;;  %v3642_v13 = vld [vmem:[%s3596_s21 + $0x30] sm:$0xff] (!%p3063_p7)  ;;  %v224_v14 = vmul.f32 (!%p3063_p7), %v3639_v12, %v3639_v12  ;;  %v3652_v17 = vld [vmem:[%s3596_s21 + $0x40] sm:$0xff] (!%p3063_p7) }
  0x19   : > { %253 = vadd.xlane.f32.xlu1 (!%p3063_p7), %v219_v3  ;;  %249 = vadd.xlane.f32.xlu0 (!%p3063_p7), %v217_v4  ;;  %v222_v10 = vmul.f32 (!%p3063_p7), %v3629_v8, %v3629_v8  ;;  %v223_v15 = vmul.f32 (!%p3063_p7), %v3642_v13, %v3642_v13  ;;  %v3649_v16 = vld [vmem:[%s3596_s21 + $0x48] sm:$0xff] (!%p3063_p7)  ;;  %v225_v19 = vmul.f32 (!%p3063_p7), %v3652_v17, %v3652_v17  ;;  %v3659_v20 = vld [vmem:[%s3596_s21 + $0x58] sm:$0xff] (!%p3063_p7)  ;;  %v3662_v21 = vld [vmem:[%s3596_s21 + $0x50] sm:$0xff] (!%p3063_p7)  ;;  %v3547_v3 = vmov (!%p3063_p7), 0.0  }
  0x1a   : > { %v226_v18 = vmul.f32 (!%p3063_p7), %v3649_v16, %v3649_v16  ;;  %v228_v22 = vmul.f32 (!%p3063_p7), %v3659_v20, %v3659_v20  ;;  %v227_v23 = vmul.f32 (!%p3063_p7), %v3662_v21, %v3662_v21  ;;  %v3669_v24 = vld [vmem:[%s3596_s21 + $0x68] sm:$0xff] (!%p3063_p7)  ;;  %v3672_v25 = vld [vmem:[%s3596_s21 + $0x60] sm:$0xff] (!%p3063_p7)  ;;  %v3679_v28 = vld [vmem:[%s3596_s21 + $0x78] sm:$0xff] (!%p3063_p7)  ;;  %442 = vst.msk [vmem:[%s3606_s28] sm:$0xff] (!%p3063_p7), %vm441_vm0, %v3547_v3 }
  0x1b   : > { %v230_v26 = vmul.f32 (!%p3063_p7), %v3669_v24, %v3669_v24  ;;  %v229_v27 = vmul.f32 (!%p3063_p7), %v3672_v25, %v3672_v25  ;;  %v3682_v29 = vld [vmem:[%s3596_s21 + $0x70] sm:$0xff] (!%p3063_p7)  ;;  %v232_v30 = vmul.f32 (!%p3063_p7), %v3679_v28, %v3679_v28  ;;  %v3689_v32 = vld [vmem:[%s3596_s21 + $0x88] sm:$0xff] (!%p3063_p7)  ;;  %v3692_v33 = vld [vmem:[%s3596_s21 + $0x80] sm:$0xff] (!%p3063_p7)  ;;  %443 = vst.msk [vmem:[%s3606_s28 + $0x8] sm:$0xff] (!%p3063_p7), %vm441_vm0, %v3547_v3 }
  0x1c   : > { %v231_v31 = vmul.f32 (!%p3063_p7), %v3682_v29, %v3682_v29  ;;  %v234_v34 = vmul.f32 (!%p3063_p7), %v3689_v32, %v3689_v32  ;;  %v233_v35 = vmul.f32 (!%p3063_p7), %v3692_v33, %v3692_v33  ;;  %v3699_v36 = vld [vmem:[%s3596_s21 + $0x98] sm:$0xff] (!%p3063_p7)  ;;  %v3702_v37 = vld [vmem:[%s3596_s21 + $0x90] sm:$0xff] (!%p3063_p7)  ;;  %v3709_v40 = vld [vmem:[%s3596_s21 + $0xa8] sm:$0xff] (!%p3063_p7)  ;;  %444 = vst.msk [vmem:[%s3606_s28 + $0x10] sm:$0xff] (!%p3063_p7), %vm441_vm0, %v3547_v3 }
  0x1d   : > { %255 = vadd.xlane.f32.xlu1 %v220_v6  ;;  %251 = vadd.xlane.f32.xlu0 %v218_v7  ;;  %v236_v38 = vmul.f32 %v3699_v36, %v3699_v36  ;;  %v235_v39 = vmul.f32 %v3702_v37, %v3702_v37  ;;  %v3712_v41 = vld [vmem:[%s3596_s21 + $0xa0] sm:$0xff]  ;;  %v238_v42 = vmul.f32 %v3709_v40, %v3709_v40  ;;  %v3719_v44 = vld [vmem:[%s3596_s21 + $0xb8] sm:$0xff]  ;;  %v3722_v45 = vld [vmem:[%s3596_s21 + $0xb0] sm:$0xff] }
  0x1e   : > { %v237_v43 = vmul.f32 %v3712_v41, %v3712_v41  ;;  %v240_v46 = vmul.f32 %v3719_v44, %v3719_v44  ;;  %v239_v47 = vmul.f32 %v3722_v45, %v3722_v45  ;;  %v3729_v48 = vld [vmem:[%s3596_s21 + $0xc8] sm:$0xff]  ;;  %v3732_v49 = vld [vmem:[%s3596_s21 + $0xc0] sm:$0xff]  ;;  %v3739_v52 = vld [vmem:[%s3596_s21 + $0xd8] sm:$0xff]  ;;  %445 = vst.msk [vmem:[%s3606_s28 + $0x18] sm:$0xff] %vm441_vm0, %v3547_v3 }
  0x1f   : > { %v242_v50 = vmul.f32 %v3729_v48, %v3729_v48  ;;  %v241_v51 = vmul.f32 %v3732_v49, %v3732_v49  ;;  %v3742_v53 = vld [vmem:[%s3596_s21 + $0xd0] sm:$0xff]  ;;  %v244_v54 = vmul.f32 %v3739_v52, %v3739_v52  ;;  %v3749_v56 = vld [vmem:[%s3596_s21 + $0xe8] sm:$0xff]  ;;  %v3752_v57 = vld [vmem:[%s3596_s21 + $0xe0] sm:$0xff]  ;;  %446 = vst.msk [vmem:[%s3606_s28 + $0x20] sm:$0xff] %vm441_vm0, %v3547_v3 }
  0x20   : > { %v243_v55 = vmul.f32 %v3742_v53, %v3742_v53  ;;  %v246_v58 = vmul.f32 %v3749_v56, %v3749_v56  ;;  %v245_v59 = vmul.f32 %v3752_v57, %v3752_v57  ;;  %v3759_v60 = vld [vmem:[%s3596_s21 + $0xf8] sm:$0xff]  ;;  %v3762_v61 = vld [vmem:[%s3596_s21 + $0xf0] sm:$0xff]  ;;  %447 = vst.msk [vmem:[%s3606_s28 + $0x28] sm:$0xff] %vm441_vm0, %v3547_v3  ;;  %448 = vst.msk [vmem:[%s3606_s28 + $0x30] sm:$0xff] %vm441_vm0, %v3547_v3 }
  0x21   : > { %259 = vadd.xlane.f32.xlu1 %v222_v10  ;;  %257 = vadd.xlane.f32.xlu0 %v221_v11  ;;  %v248_v62 = vmul.f32 %v3759_v60, %v3759_v60  ;;  %v247_v63 = vmul.f32 %v3762_v61, %v3762_v61  ;;  %449 = vst.msk [vmem:[%s3606_s28 + $0x38] sm:$0xff] %vm441_vm0, %v3547_v3  ;;  %450 = vst.msk [vmem:[%s3606_s28 + $0x40] sm:$0xff] %vm441_vm0, %v3547_v3 }
  0x22   : > { %451 = vst.msk [vmem:[%s3606_s28 + $0x48] sm:$0xff] %vm441_vm0, %v3547_v3  ;;  %452 = vst.msk [vmem:[%s3606_s28 + $0x50] sm:$0xff] %vm441_vm0, %v3547_v3 }
  0x23   : > { %453 = vst.msk [vmem:[%s3606_s28 + $0x58] sm:$0xff] %vm441_vm0, %v3547_v3  ;;  %454 = vst.msk [vmem:[%s3606_s28 + $0x60] sm:$0xff] %vm441_vm0, %v3547_v3 }
  0x24   : > { %455 = vst.msk [vmem:[%s3606_s28 + $0x68] sm:$0xff] %vm441_vm0, %v3547_v3  ;;  %456 = vst.msk [vmem:[%s3606_s28 + $0x70] sm:$0xff] %vm441_vm0, %v3547_v3 }
  0x25   : > { %263 = vadd.xlane.f32.xlu1 %v224_v14  ;;  %261 = vadd.xlane.f32.xlu0 %v223_v15  ;;  %457 = vst.msk [vmem:[%s3606_s28 + $0x78] sm:$0xff] %vm441_vm0, %v3547_v3  ;;  %458 = vst.msk [vmem:[%s3606_s28 + $0x80] sm:$0xff] %vm441_vm0, %v3547_v3 }
  0x26   : > { %459 = vst.msk [vmem:[%s3606_s28 + $0x88] sm:$0xff] %vm441_vm0, %v3547_v3  ;;  %460 = vst.msk [vmem:[%s3606_s28 + $0x90] sm:$0xff] %vm441_vm0, %v3547_v3 }
  0x27   : > { %461 = vst.msk [vmem:[%s3606_s28 + $0x98] sm:$0xff] %vm441_vm0, %v3547_v3  ;;  %462 = vst.msk [vmem:[%s3606_s28 + $0xa0] sm:$0xff] %vm441_vm0, %v3547_v3 }
  0x28   : > { %463 = vst.msk [vmem:[%s3606_s28 + $0xa8] sm:$0xff] %vm441_vm0, %v3547_v3  ;;  %464 = vst.msk [vmem:[%s3606_s28 + $0xb0] sm:$0xff] %vm441_vm0, %v3547_v3 }
  0x29   : > { %267 = vadd.xlane.f32.xlu1 %v226_v18  ;;  %265 = vadd.xlane.f32.xlu0 %v225_v19  ;;  %465 = vst.msk [vmem:[%s3606_s28 + $0xb8] sm:$0xff] %vm441_vm0, %v3547_v3  ;;  %466 = vst.msk [vmem:[%s3606_s28 + $0xc0] sm:$0xff] %vm441_vm0, %v3547_v3 }
  0x2a   : > { %467 = vst.msk [vmem:[%s3606_s28 + $0xc8] sm:$0xff] %vm441_vm0, %v3547_v3  ;;  %468 = vst.msk [vmem:[%s3606_s28 + $0xd0] sm:$0xff] %vm441_vm0, %v3547_v3 }
  0x2b   : > { %469 = vst.msk [vmem:[%s3606_s28 + $0xd8] sm:$0xff] %vm441_vm0, %v3547_v3  ;;  %470 = vst.msk [vmem:[%s3606_s28 + $0xe0] sm:$0xff] %vm441_vm0, %v3547_v3 }
  0x2c   : > { %471 = vst.msk [vmem:[%s3606_s28 + $0xe8] sm:$0xff] %vm441_vm0, %v3547_v3  ;;  %472 = vst.msk [vmem:[%s3606_s28 + $0xf0] sm:$0xff] %vm441_vm0, %v3547_v3 }
  0x2d   : > { %271 = vadd.xlane.f32.xlu1 %v228_v22  ;;  %269 = vadd.xlane.f32.xlu0 %v227_v23  ;;  %473 = vst.msk [vmem:[%s3606_s28 + $0xf8] sm:$0xff] %vm441_vm0, %v3547_v3 }
  0x31   : > { %275 = vadd.xlane.f32.xlu1 %v230_v26  ;;  %273 = vadd.xlane.f32.xlu0 %v229_v27 }
  0x35   : > { %279 = vadd.xlane.f32.xlu1 %v232_v30  ;;  %277 = vadd.xlane.f32.xlu0 %v231_v31 }
  0x39   : > { %283 = vadd.xlane.f32.xlu1 %v234_v34  ;;  %281 = vadd.xlane.f32.xlu0 %v233_v35 }
  0x3d   : > { %287 = vadd.xlane.f32.xlu1 %v236_v38  ;;  %285 = vadd.xlane.f32.xlu0 %v235_v39 }
  0x41   : > { %291 = vadd.xlane.f32.xlu1 %v238_v42  ;;  %289 = vadd.xlane.f32.xlu0 %v237_v43 }
  0x45   : > { %295 = vadd.xlane.f32.xlu1 %v240_v46  ;;  %293 = vadd.xlane.f32.xlu0 %v239_v47 }
  0x49   : > { %299 = vadd.xlane.f32.xlu1 %v242_v50  ;;  %297 = vadd.xlane.f32.xlu0 %v241_v51 }
  0x4d   : > { %303 = vadd.xlane.f32.xlu1 %v244_v54  ;;  %301 = vadd.xlane.f32.xlu0 %v243_v55 }
  0x51   : > { %307 = vadd.xlane.f32.xlu1 %v246_v58  ;;  %305 = vadd.xlane.f32.xlu0 %v245_v59 }
  0x55   : > { %311 = vadd.xlane.f32.xlu1 %v248_v62  ;;  %309 = vadd.xlane.f32.xlu0 %v247_v63 }
  0xa6   : > { %v254_v4 = vpop.xlane.xlu1 %253  ;;  %v250_v6 = vpop.xlane.xlu0 %249 }
  0xa7   : > { %v315_v7 = vmax.f32 %v254_v4, 1e-24  ;;  %v313_v10 = vmax.f32 %v250_v6, 1e-24 }
  0xa9   : > { %3315 = vrsqrt.f32 %v315_v7 }
  0xaa   : > { %3317 = vrsqrt.f32 %v313_v10  ;;  %v256_v11 = vpop.xlane.xlu1 %255  ;;  %v252_v14 = vpop.xlane.xlu0 %251 }
  0xab   : > { %v316_v15 = vmax.f32 %v256_v11, 1e-24  ;;  %v314_v18 = vmax.f32 %v252_v14, 1e-24 }
  0xad   : > { %3319 = vrsqrt.f32 %v316_v15 }
  0xae   : > { %3321 = vrsqrt.f32 %v314_v18  ;;  %v260_v19 = vpop.xlane.xlu1 %259  ;;  %v258_v22 = vpop.xlane.xlu0 %257 }
  0xaf   : > { %v318_v23 = vmax.f32 %v260_v19, 1e-24  ;;  %v317_v26 = vmax.f32 %v258_v22, 1e-24 }
  0xb1   : > { %3323 = vrsqrt.f32 %v318_v23 }
  0xb2   : > { %3325 = vrsqrt.f32 %v317_v26  ;;  %v264_v27 = vpop.xlane.xlu1 %263  ;;  %v262_v30 = vpop.xlane.xlu0 %261 }
  0xb3   : > { %v3316_v31 = vpop.eup %3315  ;;  %v320_v34 = vmax.f32 %v264_v27, 1e-24  ;;  %v319_v35 = vmax.f32 %v262_v30, 1e-24 }
  0xb4   : > { %v3318_v38 = vpop.eup %3317  ;;  %v379_v39 = vmul.f32 %v3316_v31, %v3609_v0 }
  0xb5   : > { %v377_v42 = vmul.f32 %v3318_v38, %v3612_v1  ;;  %3327 = vrsqrt.f32 %v320_v34 }
  0xb6   : > { %411 = vst [vmem:[#allocation2 + $0x10] sm:$0xff] %v379_v39  ;;  %3329 = vrsqrt.f32 %v319_v35  ;;  %v268_v43 = vpop.xlane.xlu1 %267  ;;  %v266_v46 = vpop.xlane.xlu0 %265 }
  0xb7   : > { %v3320_v47 = vpop.eup %3319  ;;  %409 = vst [vmem:[#allocation2] sm:$0xff] %v377_v42  ;;  %v322_v50 = vmax.f32 %v268_v43, 1e-24  ;;  %v321_v51 = vmax.f32 %v266_v46, 1e-24 }
  0xb8   : > { %v3322_v54 = vpop.eup %3321  ;;  %v380_v55 = vmul.f32 %v3320_v47, %v3615_v2 }
  0xb9   : > { %v378_v58 = vmul.f32 %v3322_v54, %v3622_v5  ;;  %3331 = vrsqrt.f32 %v322_v50 }
  0xba   : > { %412 = vst [vmem:[#allocation2 + $0x18] sm:$0xff] %v380_v55  ;;  %3333 = vrsqrt.f32 %v321_v51  ;;  %v272_v0 = vpop.xlane.xlu1 %271  ;;  %v270_v59 = vpop.xlane.xlu0 %269 }
  0xbb   : > { %v3324_v1 = vpop.eup %3323  ;;  %410 = vst [vmem:[#allocation2 + $0x8] sm:$0xff] %v378_v58  ;;  %v324_v62 = vmax.f32 %v272_v0, 1e-24  ;;  %v323_v63 = vmax.f32 %v270_v59, 1e-24 }
  0xbc   : > { %v3326_v3 = vpop.eup %3325  ;;  %v382_v4 = vmul.f32 %v3324_v1, %v3629_v8 }
  0xbd   : > { %v381_v6 = vmul.f32 %v3326_v3, %v3632_v9  ;;  %3335 = vrsqrt.f32 %v324_v62 }
  0xbe   : > { %414 = vst [vmem:[#allocation2 + $0x28] sm:$0xff] %v382_v4  ;;  %3337 = vrsqrt.f32 %v323_v63  ;;  %v276_v2 = vpop.xlane.xlu1 %275  ;;  %v274_v7 = vpop.xlane.xlu0 %273 }
  0xbf   : > { %v3328_v5 = vpop.eup %3327  ;;  %413 = vst [vmem:[#allocation2 + $0x20] sm:$0xff] %v381_v6  ;;  %v326_v10 = vmax.f32 %v276_v2, 1e-24  ;;  %v325_v11 = vmax.f32 %v274_v7, 1e-24 }
  0xc0   : > { %v3330_v14 = vpop.eup %3329  ;;  %v384_v15 = vmul.f32 %v3328_v5, %v3639_v12 }
  0xc1   : > { %v383_v18 = vmul.f32 %v3330_v14, %v3642_v13  ;;  %3339 = vrsqrt.f32 %v326_v10 }
  0xc2   : > { %416 = vst [vmem:[#allocation2 + $0x38] sm:$0xff] %v384_v15  ;;  %3341 = vrsqrt.f32 %v325_v11  ;;  %v280_v8 = vpop.xlane.xlu1 %279  ;;  %v278_v19 = vpop.xlane.xlu0 %277 }
  0xc3   : > { %v3332_v9 = vpop.eup %3331  ;;  %415 = vst [vmem:[#allocation2 + $0x30] sm:$0xff] %v383_v18  ;;  %v328_v22 = vmax.f32 %v280_v8, 1e-24  ;;  %v327_v23 = vmax.f32 %v278_v19, 1e-24 }
  0xc4   : > { %v3334_v26 = vpop.eup %3333  ;;  %v386_v27 = vmul.f32 %v3332_v9, %v3649_v16 }
  0xc5   : > { %v385_v30 = vmul.f32 %v3334_v26, %v3652_v17  ;;  %3343 = vrsqrt.f32 %v328_v22 }
  0xc6   : > { %418 = vst [vmem:[#allocation2 + $0x48] sm:$0xff] %v386_v27  ;;  %3345 = vrsqrt.f32 %v327_v23  ;;  %v284_v12 = vpop.xlane.xlu1 %283  ;;  %v282_v31 = vpop.xlane.xlu0 %281 }
  0xc7   : > { %v3336_v13 = vpop.eup %3335  ;;  %417 = vst [vmem:[#allocation2 + $0x40] sm:$0xff] %v385_v30  ;;  %v330_v34 = vmax.f32 %v284_v12, 1e-24  ;;  %v329_v35 = vmax.f32 %v282_v31, 1e-24 }
  0xc8   : > { %v3338_v38 = vpop.eup %3337  ;;  %v388_v39 = vmul.f32 %v3336_v13, %v3659_v20 }
  0xc9   : > { %v387_v42 = vmul.f32 %v3338_v38, %v3662_v21  ;;  %3347 = vrsqrt.f32 %v330_v34 }
  0xca   : > { %420 = vst [vmem:[#allocation2 + $0x58] sm:$0xff] %v388_v39  ;;  %3349 = vrsqrt.f32 %v329_v35  ;;  %v288_v16 = vpop.xlane.xlu1 %287  ;;  %v286_v43 = vpop.xlane.xlu0 %285 }
  0xcb   : > { %v3340_v17 = vpop.eup %3339  ;;  %419 = vst [vmem:[#allocation2 + $0x50] sm:$0xff] %v387_v42  ;;  %v332_v46 = vmax.f32 %v288_v16, 1e-24  ;;  %v331_v47 = vmax.f32 %v286_v43, 1e-24 }
  0xcc   : > { %v3342_v50 = vpop.eup %3341  ;;  %v390_v51 = vmul.f32 %v3340_v17, %v3669_v24 }
  0xcd   : > { %v389_v54 = vmul.f32 %v3342_v50, %v3672_v25  ;;  %3351 = vrsqrt.f32 %v332_v46 }
  0xce   : > { %422 = vst [vmem:[#allocation2 + $0x68] sm:$0xff] %v390_v51  ;;  %3353 = vrsqrt.f32 %v331_v47  ;;  %v292_v20 = vpop.xlane.xlu1 %291  ;;  %v290_v55 = vpop.xlane.xlu0 %289 }
  0xcf   : > { %v3344_v21 = vpop.eup %3343  ;;  %421 = vst [vmem:[#allocation2 + $0x60] sm:$0xff] %v389_v54  ;;  %v334_v58 = vmax.f32 %v292_v20, 1e-24  ;;  %v333_v0 = vmax.f32 %v290_v55, 1e-24 }
  0xd0   : > { %v3346_v59 = vpop.eup %3345  ;;  %v392_v1 = vmul.f32 %v3344_v21, %v3679_v28 }
  0xd1   : > { %v391_v62 = vmul.f32 %v3346_v59, %v3682_v29  ;;  %3355 = vrsqrt.f32 %v334_v58 }
  0xd2   : > { %424 = vst [vmem:[#allocation2 + $0x78] sm:$0xff] %v392_v1  ;;  %3357 = vrsqrt.f32 %v333_v0  ;;  %v296_v24 = vpop.xlane.xlu1 %295  ;;  %v294_v63 = vpop.xlane.xlu0 %293 }
  0xd3   : > { %v3348_v25 = vpop.eup %3347  ;;  %423 = vst [vmem:[#allocation2 + $0x70] sm:$0xff] %v391_v62  ;;  %v336_v3 = vmax.f32 %v296_v24, 1e-24  ;;  %v335_v4 = vmax.f32 %v294_v63, 1e-24 }
  0xd4   : > { %v3350_v6 = vpop.eup %3349  ;;  %v394_v2 = vmul.f32 %v3348_v25, %v3689_v32 }
  0xd5   : > { %v393_v7 = vmul.f32 %v3350_v6, %v3692_v33  ;;  %3359 = vrsqrt.f32 %v336_v3 }
  0xd6   : > { %426 = vst [vmem:[#allocation2 + $0x88] sm:$0xff] %v394_v2  ;;  %3361 = vrsqrt.f32 %v335_v4  ;;  %v300_v28 = vpop.xlane.xlu1 %299  ;;  %v298_v5 = vpop.xlane.xlu0 %297 }
  0xd7   : > { %v3352_v29 = vpop.eup %3351  ;;  %425 = vst [vmem:[#allocation2 + $0x80] sm:$0xff] %v393_v7  ;;  %v338_v10 = vmax.f32 %v300_v28, 1e-24  ;;  %v337_v11 = vmax.f32 %v298_v5, 1e-24 }
  0xd8   : > { %v3354_v14 = vpop.eup %3353  ;;  %v396_v15 = vmul.f32 %v3352_v29, %v3699_v36 }
  0xd9   : > { %v395_v18 = vmul.f32 %v3354_v14, %v3702_v37  ;;  %3363 = vrsqrt.f32 %v338_v10 }
  0xda   : > { %428 = vst [vmem:[#allocation2 + $0x98] sm:$0xff] %v396_v15  ;;  %3365 = vrsqrt.f32 %v337_v11  ;;  %v304_v32 = vpop.xlane.xlu1 %303  ;;  %v302_v8 = vpop.xlane.xlu0 %301 }
  0xdb   : > { %v3356_v33 = vpop.eup %3355  ;;  %427 = vst [vmem:[#allocation2 + $0x90] sm:$0xff] %v395_v18  ;;  %v340_v19 = vmax.f32 %v304_v32, 1e-24  ;;  %v339_v9 = vmax.f32 %v302_v8, 1e-24 }
  0xdc   : > { %v3358_v22 = vpop.eup %3357  ;;  %v398_v23 = vmul.f32 %v3356_v33, %v3709_v40 }
  0xdd   : > { %v397_v26 = vmul.f32 %v3358_v22, %v3712_v41  ;;  %3367 = vrsqrt.f32 %v340_v19 }
  0xde   : > { %430 = vst [vmem:[#allocation2 + $0xa8] sm:$0xff] %v398_v23  ;;  %3369 = vrsqrt.f32 %v339_v9  ;;  %v308_v36 = vpop.xlane.xlu1 %307  ;;  %v306_v27 = vpop.xlane.xlu0 %305 }
  0xdf   : > { %v3360_v37 = vpop.eup %3359  ;;  %429 = vst [vmem:[#allocation2 + $0xa0] sm:$0xff] %v397_v26  ;;  %v342_v30 = vmax.f32 %v308_v36, 1e-24  ;;  %v341_v12 = vmax.f32 %v306_v27, 1e-24 }
  0xe0   : > { %v3362_v31 = vpop.eup %3361  ;;  %v400_v13 = vmul.f32 %v3360_v37, %v3719_v44 }
  0xe1   : > { %v399_v34 = vmul.f32 %v3362_v31, %v3722_v45  ;;  %3371 = vrsqrt.f32 %v342_v30 }
  0xe2   : > { %432 = vst [vmem:[#allocation2 + $0xb8] sm:$0xff] %v400_v13  ;;  %3373 = vrsqrt.f32 %v341_v12  ;;  %v312_v40 = vpop.xlane.xlu1 %311  ;;  %v310_v35 = vpop.xlane.xlu0 %309 }
  0xe3   : > { %v3364_v41 = vpop.eup %3363  ;;  %431 = vst [vmem:[#allocation2 + $0xb0] sm:$0xff] %v399_v34  ;;  %v344_v38 = vmax.f32 %v312_v40, 1e-24  ;;  %v343_v39 = vmax.f32 %v310_v35, 1e-24 }
  0xe4   : > { %v3366_v42 = vpop.eup %3365  ;;  %v402_v16 = vmul.f32 %v3364_v41, %v3729_v48 }
  0xe5   : > { %v401_v43 = vmul.f32 %v3366_v42, %v3732_v49  ;;  %3375 = vrsqrt.f32 %v344_v38 }
  0xe6   : > { %434 = vst [vmem:[#allocation2 + $0xc8] sm:$0xff] %v402_v16  ;;  %3377 = vrsqrt.f32 %v343_v39 }
  0xe7   : > { %v3368_v44 = vpop.eup %3367  ;;  %433 = vst [vmem:[#allocation2 + $0xc0] sm:$0xff] %v401_v43 }
  0xe8   : > { %v3370_v45 = vpop.eup %3369  ;;  %v404_v17 = vmul.f32 %v3368_v44, %v3739_v52 }
  0xe9   : > { %v403_v46 = vmul.f32 %v3370_v45, %v3742_v53 }
  0xea   : > { %436 = vst [vmem:[#allocation2 + $0xd8] sm:$0xff] %v404_v17 }
  0xeb   : > { %v3372_v47 = vpop.eup %3371  ;;  %435 = vst [vmem:[#allocation2 + $0xd0] sm:$0xff] %v403_v46 }
  0xec   : > { %v3374_v50 = vpop.eup %3373  ;;  %v406_v51 = vmul.f32 %v3372_v47, %v3749_v56 }
  0xed   : > { %v405_v48 = vmul.f32 %v3374_v50, %v3752_v57 }
  0xee   : > { %438 = vst [vmem:[#allocation2 + $0xe8] sm:$0xff] %v406_v51 }
  0xef   : > { %v3376_v49 = vpop.eup %3375  ;;  %437 = vst [vmem:[#allocation2 + $0xe0] sm:$0xff] %v405_v48 }
  0xf0   : > { %v3378_v54 = vpop.eup %3377  ;;  %v408_v20 = vmul.f32 %v3376_v49, %v3759_v60 }
  0xf1   : > { %v407_v55 = vmul.f32 %v3378_v54, %v3762_v61 }
  0xf2   : > { %440 = vst [vmem:[#allocation2 + $0xf8] sm:$0xff] %v408_v20 }
  0xf3   : > { %439 = vst [vmem:[#allocation2 + $0xf0] sm:$0xff] %v407_v55 }
  0xf4 PF: > { %v522_v52 = vld [vmem:[%s3601_s25 + $0x80] sm:$0xff]  ;;  %v523_v53 = vld [vmem:[%s3601_s25 + $0x88] sm:$0xff]  ;;  %v524_v21 = vld [vmem:[%s3601_s25 + $0x90] sm:$0xff] }
  0xf5   : > { %v506_v56 = vld [vmem:[%s3601_s25] sm:$0xff]  ;;  %v3226_v57 = vpack.c.bf16 %v523_v53, %v522_v52  ;;  %v507_v60 = vld [vmem:[%s3601_s25 + $0x8] sm:$0xff]  ;;  %v525_v61 = vld [vmem:[%s3601_s25 + $0x98] sm:$0xff] }
  0xf6   : > { %v3228_v58 = vpack.c.bf16 %v507_v60, %v506_v56  ;;  %v3230_v0 = vpack.c.bf16 %v525_v61, %v524_v21  ;;  %v508_v59 = vld [vmem:[%s3601_s25 + $0x10] sm:$0xff]  ;;  %v509_v1 = vld [vmem:[%s3601_s25 + $0x18] sm:$0xff]  ;;  %v526_v62 = vld [vmem:[%s3601_s25 + $0xa0] sm:$0xff] }
  0xf7   : > { %3227 = vmatprep.subr.bf16.mxu0 %v3226_v57  ;;  %3258 = vmatprep.subr.bf16.mxu1 %v3226_v57  ;;  %v527_v24 = vld [vmem:[%s3601_s25 + $0xa8] sm:$0xff]  ;;  %v3232_v63 = vpack.c.bf16 %v509_v1, %v508_v59  ;;  %v3874_v3 = vld [vmem:[#allocation2] sm:$0xff]  ;;  %v528_v7 = vld [vmem:[%s3601_s25 + $0xb0] sm:$0xff] }
  0xf8   : > { %3229 = vmatpush3.bf16.xpose.msra.mxu0 %v3228_v58  ;;  %3266 = vmatpush3.bf16.xpose.msra.mxu1 %v3228_v58  ;;  %v3234_v25 = vpack.c.bf16 %v527_v24, %v526_v62  ;;  %v3877_v4 = vld [vmem:[#allocation2 + $0x80] sm:$0xff]  ;;  %v511_v2 = vld [vmem:[%s3601_s25 + $0x28] sm:$0xff]  ;;  %v529_v28 = vld [vmem:[%s3601_s25 + $0xb8] sm:$0xff] }
  0xf9   : > { %3231 = vmatprep.subr.bf16.mxu0 %v3230_v0  ;;  %3259 = vmatprep.subr.bf16.mxu1 %v3230_v0  ;;  %v510_v6 = vld [vmem:[%s3601_s25 + $0x20] sm:$0xff]  ;;  %v3238_v29 = vpack.c.bf16 %v529_v28, %v528_v7  ;;  %v512_v10 = vld [vmem:[%s3601_s25 + $0x30] sm:$0xff]  ;;  %v513_v11 = vld [vmem:[%s3601_s25 + $0x38] sm:$0xff] }
  0xfa   : > { %3162 = vmatprep.mubr.f32.mxu0 %v3874_v3  ;;  %3194 = vmatprep.mubr.f32.mxu1 %v3877_v4  ;;  %v3236_v5 = vpack.c.bf16 %v511_v2, %v510_v6  ;;  %v530_v14 = vld [vmem:[%s3601_s25 + $0xc0] sm:$0xff]  ;;  %v531_v15 = vld [vmem:[%s3601_s25 + $0xc8] sm:$0xff]  ;;  %v3240_v18 = vpack.c.bf16 %v513_v11, %v512_v10  ;;  %v532_v19 = vld [vmem:[%s3601_s25 + $0xd0] sm:$0xff] }
  0xfb   : > { %v3242_v32 = vpack.c.bf16 %v531_v15, %v530_v14  ;;  %v514_v8 = vld [vmem:[%s3601_s25 + $0x40] sm:$0xff]  ;;  %v515_v33 = vld [vmem:[%s3601_s25 + $0x48] sm:$0xff]  ;;  %v533_v9 = vld [vmem:[%s3601_s25 + $0xd8] sm:$0xff] }
  0xfc   : > { %v3244_v22 = vpack.c.bf16 %v515_v33, %v514_v8  ;;  %v3246_v23 = vpack.c.bf16 %v533_v9, %v532_v19  ;;  %v516_v26 = vld [vmem:[%s3601_s25 + $0x50] sm:$0xff]  ;;  %v517_v36 = vld [vmem:[%s3601_s25 + $0x58] sm:$0xff]  ;;  %v534_v27 = vld [vmem:[%s3601_s25 + $0xe0] sm:$0xff] }
  0xfd   : > { %v535_v37 = vld [vmem:[%s3601_s25 + $0xe8] sm:$0xff]  ;;  %v3248_v30 = vpack.c.bf16 %v517_v36, %v516_v26  ;;  %v518_v31 = vld [vmem:[%s3601_s25 + $0x60] sm:$0xff]  ;;  %v536_v34 = vld [vmem:[%s3601_s25 + $0xf0] sm:$0xff] }
  0xfe   : > { %v3250_v12 = vpack.c.bf16 %v535_v37, %v534_v27  ;;  %v519_v13 = vld [vmem:[%s3601_s25 + $0x68] sm:$0xff]  ;;  %v537_v40 = vld [vmem:[%s3601_s25 + $0xf8] sm:$0xff]  ;;  %v520_v38 = vld [vmem:[%s3601_s25 + $0x70] sm:$0xff] }
  0xff   : > { %v3252_v35 = vpack.c.bf16 %v519_v13, %v518_v31  ;;  %v3254_v41 = vpack.c.bf16 %v537_v40, %v536_v34  ;;  %v521_v39 = vld [vmem:[%s3601_s25 + $0x78] sm:$0xff]  ;;  %v475_v16 = vld [vmem:[#allocation2 + $0x8] sm:$0xff]  ;;  %v476_v44 = vld [vmem:[#allocation2 + $0x10] sm:$0xff] }
 0x100   : > { %3233 = vmatpush3.bf16.xpose.msra.mxu0 %v3232_v63  ;;  %3267 = vmatpush3.bf16.xpose.msra.mxu1 %v3232_v63  ;;  %v3256_v42 = vpack.c.bf16 %v521_v39, %v520_v38  ;;  %v491_v43 = vld [vmem:[#allocation2 + $0x88] sm:$0xff]  ;;  %v492_v45 = vld [vmem:[#allocation2 + $0x90] sm:$0xff]  ;;  %v477_v17 = vld [vmem:[#allocation2 + $0x18] sm:$0xff] }
 0x101   : > { %3235 = vmatprep.subr.bf16.mxu0 %v3234_v25  ;;  %3260 = vmatprep.subr.bf16.mxu1 %v3234_v25  ;;  %v493_v46 = vld [vmem:[#allocation2 + $0x98] sm:$0xff]  ;;  %v478_v47 = vld [vmem:[#allocation2 + $0x20] sm:$0xff]  ;;  %v479_v51 = vld [vmem:[#allocation2 + $0x28] sm:$0xff] }
 0x102   : > { %v494_v50 = vld [vmem:[#allocation2 + $0xa0] sm:$0xff]  ;;  %v495_v48 = vld [vmem:[#allocation2 + $0xa8] sm:$0xff]  ;;  %v480_v49 = vld [vmem:[#allocation2 + $0x30] sm:$0xff] }
 0x103   : > { %v496_v54 = vld [vmem:[#allocation2 + $0xb0] sm:$0xff]  ;;  %v481_v20 = vld [vmem:[#allocation2 + $0x38] sm:$0xff]  ;;  %v482_v52 = vld [vmem:[#allocation2 + $0x40] sm:$0xff] }
 0x104   : > { %v497_v55 = vld [vmem:[#allocation2 + $0xb8] sm:$0xff]  ;;  %v498_v53 = vld [vmem:[#allocation2 + $0xc0] sm:$0xff]  ;;  %v483_v56 = vld [vmem:[#allocation2 + $0x48] sm:$0xff] }
 0x105   : > { %v499_v57 = vld [vmem:[#allocation2 + $0xc8] sm:$0xff]  ;;  %v484_v60 = vld [vmem:[#allocation2 + $0x50] sm:$0xff]  ;;  %v485_v61 = vld [vmem:[#allocation2 + $0x58] sm:$0xff] }
 0x106   : > { %v500_v21 = vld [vmem:[#allocation2 + $0xd0] sm:$0xff]  ;;  %v501_v58 = vld [vmem:[#allocation2 + $0xd8] sm:$0xff]  ;;  %v486_v0 = vld [vmem:[#allocation2 + $0x60] sm:$0xff] }
 0x107   : > { %v502_v59 = vld [vmem:[#allocation2 + $0xe0] sm:$0xff]  ;;  %v487_v1 = vld [vmem:[#allocation2 + $0x68] sm:$0xff]  ;;  %v488_v24 = vld [vmem:[#allocation2 + $0x70] sm:$0xff] }
 0x108   : > { %3237 = vmatpush3.bf16.xpose.msra.mxu0 %v3236_v5  ;;  %3268 = vmatpush3.bf16.xpose.msra.mxu1 %v3236_v5  ;;  %v503_v62 = vld [vmem:[#allocation2 + $0xe8] sm:$0xff]  ;;  %v504_v63 = vld [vmem:[#allocation2 + $0xf0] sm:$0xff]  ;;  %v489_v25 = vld [vmem:[#allocation2 + $0x78] sm:$0xff] }
 0x109   : > { %3239 = vmatprep.subr.bf16.mxu0 %v3238_v29  ;;  %3261 = vmatprep.subr.bf16.mxu1 %v3238_v29 }
 0x110   : > { %3241 = vmatpush3.bf16.xpose.msra.mxu0 %v3240_v18  ;;  %3269 = vmatpush3.bf16.xpose.msra.mxu1 %v3240_v18 }
 0x111   : > { %3243 = vmatprep.subr.bf16.mxu0 %v3242_v32  ;;  %3262 = vmatprep.subr.bf16.mxu1 %v3242_v32 }
 0x118   : > { %3245 = vmatpush3.bf16.xpose.msra.mxu0 %v3244_v22  ;;  %3270 = vmatpush3.bf16.xpose.msra.mxu1 %v3244_v22 }
 0x119   : > { %3247 = vmatprep.subr.bf16.mxu0 %v3246_v23  ;;  %3263 = vmatprep.subr.bf16.mxu1 %v3246_v23 }
 0x120   : > { %3249 = vmatpush3.bf16.xpose.msra.mxu0 %v3248_v30  ;;  %3271 = vmatpush3.bf16.xpose.msra.mxu1 %v3248_v30 }
 0x121   : > { %3251 = vmatprep.subr.bf16.mxu0 %v3250_v12  ;;  %3264 = vmatprep.subr.bf16.mxu1 %v3250_v12 }
 0x128   : > { %3253 = vmatpush3.bf16.xpose.msra.mxu0 %v3252_v35  ;;  %3272 = vmatpush3.bf16.xpose.msra.mxu1 %v3252_v35 }
 0x129   : > { %3255 = vmatprep.subr.bf16.mxu0 %v3254_v41  ;;  %3265 = vmatprep.subr.bf16.mxu1 %v3254_v41 }
 0x130   : > { %3257 = vmatpush3.bf16.xpose.msra.mxu0 %v3256_v42  ;;  %3273 = vmatpush3.bf16.xpose.msra.mxu1 %v3256_v42 }
 0x137   : > { %3163 = vmatmul.mubr.f32.vlgmr.msra.gmra.mrb[0].mxu0 %v3874_v3  ;;  %3195 = vmatmul.mubr.f32.vlgmr.msra.gmra.mrb[0].mxu1 %v3877_v4  ;;  %v505_v3 = vld [vmem:[#allocation2 + $0xf8] sm:$0xff] }
 0x138   : > { %3164 = vmatprep.mubr.f32.mxu0 %v475_v16  ;;  %3196 = vmatprep.mubr.f32.mxu1 %v491_v43 }
 0x13b   : > { %3165 = vmatmul.mubr.f32.gmra.mrb[2].mxu0 %v475_v16  ;;  %3197 = vmatmul.mubr.f32.gmra.mrb[2].mxu1 %v491_v43 }
 0x13c   : > { %3166 = vmatprep.mubr.f32.mxu0 %v476_v44  ;;  %3198 = vmatprep.mubr.f32.mxu1 %v492_v45 }
 0x13f   : > { %3167 = vmatmul.mubr.f32.gmra.mrb[4].mxu0 %v476_v44  ;;  %3199 = vmatmul.mubr.f32.gmra.mrb[4].mxu1 %v492_v45 }
 0x140   : > { %3168 = vmatprep.mubr.f32.mxu0 %v477_v17  ;;  %3200 = vmatprep.mubr.f32.mxu1 %v493_v46 }
 0x143   : > { %3169 = vmatmul.mubr.f32.gmra.mrb[6].mxu0 %v477_v17  ;;  %3201 = vmatmul.mubr.f32.gmra.mrb[6].mxu1 %v493_v46 }
 0x144   : > { %3170 = vmatprep.mubr.f32.mxu0 %v478_v47  ;;  %3202 = vmatprep.mubr.f32.mxu1 %v494_v50 }
 0x147   : > { %3171 = vmatmul.mubr.f32.gmra.mrb[8].mxu0 %v478_v47  ;;  %3203 = vmatmul.mubr.f32.gmra.mrb[8].mxu1 %v494_v50 }
 0x148   : > { %3172 = vmatprep.mubr.f32.mxu0 %v479_v51  ;;  %3204 = vmatprep.mubr.f32.mxu1 %v495_v48 }
 0x14b   : > { %3173 = vmatmul.mubr.f32.gmra.mrb[10].mxu0 %v479_v51  ;;  %3205 = vmatmul.mubr.f32.gmra.mrb[10].mxu1 %v495_v48 }
 0x14c   : > { %3174 = vmatprep.mubr.f32.mxu0 %v480_v49  ;;  %3206 = vmatprep.mubr.f32.mxu1 %v496_v54 }
 0x14f   : > { %3175 = vmatmul.mubr.f32.gmra.mrb[12].mxu0 %v480_v49  ;;  %3207 = vmatmul.mubr.f32.gmra.mrb[12].mxu1 %v496_v54 }
 0x150   : > { %3176 = vmatprep.mubr.f32.mxu0 %v481_v20  ;;  %3208 = vmatprep.mubr.f32.mxu1 %v497_v55 }
 0x153   : > { %3177 = vmatmul.mubr.f32.gmra.mrb[14].mxu0 %v481_v20  ;;  %3209 = vmatmul.mubr.f32.gmra.mrb[14].mxu1 %v497_v55 }
 0x154   : > { %3178 = vmatprep.mubr.f32.mxu0 %v482_v52  ;;  %3210 = vmatprep.mubr.f32.mxu1 %v498_v53 }
 0x157   : > { %3179 = vmatmul.mubr.f32.gmra.mrb[16].mxu0 %v482_v52  ;;  %3211 = vmatmul.mubr.f32.gmra.mrb[16].mxu1 %v498_v53 }
 0x158   : > { %3180 = vmatprep.mubr.f32.mxu0 %v483_v56  ;;  %3212 = vmatprep.mubr.f32.mxu1 %v499_v57 }
 0x15b   : > { %3181 = vmatmul.mubr.f32.gmra.mrb[18].mxu0 %v483_v56  ;;  %3213 = vmatmul.mubr.f32.gmra.mrb[18].mxu1 %v499_v57 }
 0x15c   : > { %3182 = vmatprep.mubr.f32.mxu0 %v484_v60  ;;  %3214 = vmatprep.mubr.f32.mxu1 %v500_v21 }
 0x15f   : > { %3183 = vmatmul.mubr.f32.gmra.mrb[20].mxu0 %v484_v60  ;;  %3215 = vmatmul.mubr.f32.gmra.mrb[20].mxu1 %v500_v21 }
 0x160   : > { %3184 = vmatprep.mubr.f32.mxu0 %v485_v61  ;;  %3216 = vmatprep.mubr.f32.mxu1 %v501_v58 }
 0x163   : > { %3185 = vmatmul.mubr.f32.gmra.mrb[22].mxu0 %v485_v61  ;;  %3217 = vmatmul.mubr.f32.gmra.mrb[22].mxu1 %v501_v58 }
 0x164   : > { %3186 = vmatprep.mubr.f32.mxu0 %v486_v0  ;;  %3218 = vmatprep.mubr.f32.mxu1 %v502_v59 }
 0x167   : > { %3187 = vmatmul.mubr.f32.gmra.mrb[24].mxu0 %v486_v0  ;;  %3219 = vmatmul.mubr.f32.gmra.mrb[24].mxu1 %v502_v59 }
 0x168   : > { %3188 = vmatprep.mubr.f32.mxu0 %v487_v1  ;;  %3220 = vmatprep.mubr.f32.mxu1 %v503_v62 }
 0x16b   : > { %3189 = vmatmul.mubr.f32.gmra.mrb[26].mxu0 %v487_v1  ;;  %3221 = vmatmul.mubr.f32.gmra.mrb[26].mxu1 %v503_v62 }
 0x16c   : > { %3190 = vmatprep.mubr.f32.mxu0 %v488_v24  ;;  %3222 = vmatprep.mubr.f32.mxu1 %v504_v63 }
 0x16f   : > { %3191 = vmatmul.mubr.f32.gmra.mrb[28].mxu0 %v488_v24  ;;  %3223 = vmatmul.mubr.f32.gmra.mrb[28].mxu1 %v504_v63 }
 0x170   : > { %3192 = vmatprep.mubr.f32.mxu0 %v489_v25  ;;  %3224 = vmatprep.mubr.f32.mxu1 %v505_v3 }
 0x173   : > { %3193 = vmatmul.mubr.f32.gmra.mrb[30].mxu0 %v489_v25  ;;  %3225 = vmatmul.mubr.f32.gmra.mrb[30].mxu1 %v505_v3 }
 0x20a   : > { %v3904_v4 = vpop.f32.mrb[0].mxu0  ;;  %v3906_v6 = vpop.f32.mrb[0].mxu1 }
 0x20b   : > { %v6177_v2 = vclamps-f32 %v3904_v4, 1.0  ;;  %v3909_v7 = vpop.f32.mrb[1].mxu0  ;;  %v3911_v28 = vpop.f32.mrb[1].mxu1  ;;  %v6171_v45 = vclamps-f32 %v3906_v6, 1.0 }
 0x20c   : > { %v6176_v5 = vclamps-f32 %v3909_v7, 1.0  ;;  %v6170_v54 = vclamps-f32 %v3911_v28, 1.0 }
 0x20d   : > { %v3916_v29 = vand.u32 2147483647, %v6177_v2  ;;  %v3982_v56 = vand.u32 2147483647, %v6171_v45 }
 0x20e   : > { %v3920_v10 = vand.u32 2147483647, %v6176_v5  ;;  %v3922_v11 = vpop.f32.mrb[2].mxu0  ;;  %v3924_v14 = vpop.f32.mrb[2].mxu1  ;;  %v4000_v62 = vand.u32 2147483647, %v6170_v54 }
 0x20f   : > { %v987_v15 = vmul.f32 -0.0012624911, %v3916_v29  ;;  %v3927_v18 = vpop.f32.mrb[3].mxu0  ;;  %v3929_v32 = vpop.f32.mrb[3].mxu1  ;;  %v6175_v17 = vclamps-f32 %v3924_v14, 1.0  ;;  %v1883_v46 = vsub.f32 1.0, %v3916_v29 }
 0x210   : > { %v988_v8 = vmul.f32 -0.0012624911, %v3920_v10  ;;  %v1884_v49 = vsub.f32 1.0, %v3920_v10  ;;  %v6168_v52 = vclamps-f32 %v3922_v11, 1.0  ;;  %v6167_v53 = vclamps-f32 %v3927_v18, 1.0 }
 0x211   : > { %v1051_v33 = vadd.f32 0.00667009, %v987_v15  ;;  %v3986_v57 = vand.u32 2147483647, %v6175_v17  ;;  %v6173_v60 = vclamps-f32 %v3929_v32, 1.0  ;;  %v3989_v21 = vmax.f32 %v1883_v46, 0.0 }
 0x212   : > { %v3932_v19 = vpop.f32.mrb[4].mxu0  ;;  %v3934_v9 = vpop.f32.mrb[4].mxu1  ;;  %v1052_v22 = vadd.f32 0.00667009, %v988_v8  ;;  %v3996_v1 = vmax.f32 %v1884_v49, 0.0 }
 0x213   : > { %6262 = vst [vmem:[#allocation3_spill] sm:$0xff] %v3934_v9  ;;  %v1115_v23 = vmul.f32 %v1051_v33, %v3916_v29  ;;  %v3937_v26 = vpop.f32.mrb[5].mxu0  ;;  %v3939_v36 = vpop.f32.mrb[5].mxu1  ;;  %v6169_v24 = vclamps-f32 %v3932_v19, 1.0  ;;  %v4009_v3 = vand.u32 2147483647, %v6168_v52  ;;  %3379 = vrsqrt.f32 %v3989_v21 }
 0x214   : > { %6263 = vst [vmem:[#allocation4_spill] sm:$0xff] %v3939_v36  ;;  %v1116_v30 = vmul.f32 %v1052_v22, %v3920_v10  ;;  %v4013_v15 = vand.u32 2147483647, %v6167_v53  ;;  %v6172_v8 = vclamps-f32 %v3934_v9, 1.0  ;;  %v6174_v33 = vclamps-f32 %v3937_v26, 1.0 }
 0x215   : > { %v1179_v12 = vadd.f32 -0.017088126, %v1115_v23  ;;  %v4019_v22 = vand.u32 2147483647, %v6173_v60  ;;  %v6178_v23 = vclamps-f32 %v3939_v36, 1.0  ;;  %3381 = vrsqrt.f32 %v3996_v1 }
 0x216   : > { %v3941_v27 = vpop.f32.mrb[6].mxu0  ;;  %v3943_v37 = vpop.f32.mrb[6].mxu1  ;;  %v1180_v34 = vadd.f32 -0.017088126, %v1116_v30  ;;  %v4033_v46 = vand.u32 2147483647, %v6169_v24 }
 0x217   : > { %6264 = vst [vmem:[#allocation5_spill] sm:$0xff] %v3941_v27  ;;  %6265 = vst [vmem:[#allocation6_spill] sm:$0xff] %v3943_v37  ;;  %v3946_v31 = vpop.f32.mrb[7].mxu0  ;;  %v3948_v13 = vpop.f32.mrb[7].mxu1  ;;  %v1243_v40 = vmul.f32 %v1179_v12, %v3916_v29  ;;  %v6179_v30 = vclamps-f32 %v3941_v27, 1.0  ;;  %vm2013_vm1 = vcmp.eq.f32.partialorder %v3989_v21, inf }
 0x218   : > { %6266 = vst [vmem:[#allocation7_spill] sm:$0xff] %v3946_v31  ;;  %6267 = vst [vmem:[#allocation8_spill] sm:$0xff] %v3948_v13  ;;  %v1244_v42 = vmul.f32 %v1180_v34, %v3920_v10  ;;  %v4042_v53 = vand.u32 2147483647, %v6172_v8  ;;  %v4052_v24 = vand.u32 2147483647, %v6178_v23 }
 0x219   : > { %v1307_v16 = vadd.f32 0.03089188, %v1243_v40  ;;  %v4056_v54 = vand.u32 2147483647, %v6179_v30  ;;  %v6289_v27 = vclamps-f32 %v3948_v13, 1.0  ;;  %vm2015_vm2 = vcmp.eq.f32.partialorder %v3989_v21, 0.0 }
 0x21a   : > { %v3951_v35 = vpop.f32.mrb[8].mxu0  ;;  %v3953_v41 = vpop.f32.mrb[8].mxu1  ;;  %v1308_v51 = vadd.f32 0.03089188, %v1244_v42  ;;  %vm2020_vm3 = vcmp.eq.f32.partialorder %v3996_v1, inf  ;;  %vm2022_vm4 = vcmp.eq.f32.partialorder %v3996_v1, 0.0 }
 0x21b   : > { %6268 = vst [vmem:[#allocation9_spill] sm:$0xff] %v3951_v35  ;;  %6269 = vst [vmem:[#allocation10_spill] sm:$0xff] %v3953_v41  ;;  %v3955_v38 = vpop.f32.mrb[9].mxu0  ;;  %v3957_v39 = vpop.f32.mrb[9].mxu1  ;;  %v1371_v48 = vmul.f32 %v1307_v16, %v3916_v29  ;;  %v1021_v16 = vmul.f32 -0.0012624911, %v3986_v57 }
 0x21c   : > { %6270 = vst [vmem:[#allocation11_spill] sm:$0xff] %v3955_v38  ;;  %6271 = vst [vmem:[#allocation12_spill] sm:$0xff] %v3957_v39  ;;  %v1372_v0 = vmul.f32 %v1308_v51, %v3920_v10  ;;  %v6181_v51 = vclamps-f32 %v3943_v37, 1.0  ;;  %v6295_v30 = vclamps-f32 %v3955_v38, 1.0  ;;  %v6297_v23 = vclamps-f32 %v3957_v39, 1.0 }
 0x21d   : > { %v1435_v59 = vadd.f32 -0.050174303, %v1371_v48 }
 0x21e   : > { %v3960_v43 = vpop.f32.mrb[10].mxu0  ;;  %v3962_v44 = vpop.f32.mrb[10].mxu1  ;;  %v1436_v40 = vadd.f32 -0.050174303, %v1372_v0  ;;  %v4046_v0 = vand.u32 2147483647, %v6174_v33 }
 0x21f   : > { %6272 = vst [vmem:[#allocation13_spill] sm:$0xff] %v3960_v43  ;;  %6273 = vst [vmem:[#allocation14_spill] sm:$0xff] %v3962_v44  ;;  %v3967_v47 = vpop.f32.mrb[11].mxu0  ;;  %v3969_v50 = vpop.f32.mrb[11].mxu1  ;;  %v1499_v42 = vmul.f32 %v1435_v59, %v3916_v29  ;;  %v6184_v59 = vclamps-f32 %v3946_v31, 1.0 }
 0x220   : > { %6274 = vst [vmem:[#allocation15_spill] sm:$0xff] %v3967_v47  ;;  %6275 = vst [vmem:[#allocation16_spill] sm:$0xff] %v3969_v50  ;;  %v1500_v17 = vmul.f32 %v1436_v40, %v3920_v10  ;;  %v4067_v2 = vand.u32 2147483647, %v6181_v51  ;;  %v4081_v40 = vand.u32 2147483647, %v6289_v27 }
 0x221   : > { %v1563_v5 = vadd.f32 0.08897899, %v1499_v42  ;;  %v4077_v8 = vand.u32 2147483647, %v6184_v59  ;;  %v6291_v51 = vclamps-f32 %v3951_v35, 1.0  ;;  %v6293_v59 = vclamps-f32 %v3953_v41, 1.0  ;;  %v3380_v35 = vpop.eup %3379 }
 0x222   : > { %v3974_v20 = vpop.f32.mrb[12].mxu0  ;;  %v3976_v55 = vpop.f32.mrb[12].mxu1  ;;  %6288 = vst [vmem:[#allocation29_spill] sm:$0xff] %v4067_v2  ;;  %6290 = vst [vmem:[#allocation30_spill] sm:$0xff] %v4081_v40  ;;  %v1564_v42 = vadd.f32 0.08897899, %v1500_v17 }
 0x223   : > { %6276 = vst [vmem:[#allocation17_spill] sm:$0xff] %v3974_v20  ;;  %6277 = vst [vmem:[#allocation18_spill] sm:$0xff] %v3976_v55  ;;  %v3991_v61 = vpop.f32.mrb[13].mxu0  ;;  %v3993_v58 = vpop.f32.mrb[13].mxu1  ;;  %v4086_v37 = vand.u32 2147483647, %v6291_v51  ;;  %v1627_v51 = vmul.f32 %v1563_v5, %v3916_v29 }
 0x224   : > { %6278 = vst [vmem:[#allocation19_spill] sm:$0xff] %v3991_v61  ;;  %6279 = vst [vmem:[#allocation20_spill] sm:$0xff] %v3993_v58  ;;  %v4094_v2 = vand.u32 2147483647, %v6293_v59  ;;  %v4107_v40 = vand.u32 2147483647, %v6297_v23  ;;  %v3382_v41 = vpop.eup %3381 }
 0x225   : > { %6292 = vst [vmem:[#allocation31_spill] sm:$0xff] %v4086_v37  ;;  %v4103_v37 = vand.u32 2147483647, %v6295_v30  ;;  %v6301_v23 = vclamps-f32 %v3962_v44, 1.0  ;;  %v6303_v39 = vclamps-f32 %v3967_v47, 1.0  ;;  %v2019_v44 = vmul.f32 %v3382_v41, %v3996_v1 }
 0x226   : > { %v4003_v63 = vpop.f32.mrb[14].mxu0  ;;  %v4005_v25 = vpop.f32.mrb[14].mxu1  ;;  %6294 = vst [vmem:[#allocation32_spill] sm:$0xff] %v4094_v2  ;;  %6298 = vst [vmem:[#allocation34_spill] sm:$0xff] %v4107_v40  ;;  %v6299_v2 = vclamps-f32 %v3960_v43, 1.0  ;;  %v1628_v40 = vmul.f32 %v1564_v42, %v3920_v10  ;;  %v6305_v5 = vclamps-f32 %v3969_v50, 1.0 }
 0x227   : > { %6280 = vst [vmem:[#allocation21_spill] sm:$0xff] %v4003_v63  ;;  %6281 = vst [vmem:[#allocation22_spill] sm:$0xff] %v4005_v25  ;;  %v4024_v12 = vpop.f32.mrb[15].mxu0  ;;  %v4026_v34 = vpop.f32.mrb[15].mxu1  ;;  %v4123_v30 = vand.u32 2147483647, %v6301_v23  ;;  %v2012_v23 = vmul.f32 %v3380_v35, %v3989_v21 }
 0x228   : > { %6282 = vst [vmem:[#allocation23_spill] sm:$0xff] %v4024_v12  ;;  %6283 = vst [vmem:[#allocation24_spill] sm:$0xff] %v4026_v34  ;;  %v4115_v36 = vand.u32 2147483647, %v6299_v2  ;;  %v4127_v38 = vand.u32 2147483647, %v6303_v39 }
 0x229   : > { %6296 = vst [vmem:[#allocation33_spill] sm:$0xff] %v4103_v37  ;;  %6302 = vst [vmem:[#allocation36_spill] sm:$0xff] %v4123_v30  ;;  %v1691_v37 = vadd.f32 -0.2145988, %v1627_v51  ;;  %v1022_v43 = vmul.f32 -0.0012624911, %v4019_v22 }
 0x22a   : > { %v4036_v48 = vpop.f32.mrb[16].mxu0  ;;  %v4038_v49 = vpop.f32.mrb[16].mxu1  ;;  %6300 = vst [vmem:[#allocation35_spill] sm:$0xff] %v4115_v36  ;;  %6304 = vst [vmem:[#allocation37_spill] sm:$0xff] %v4127_v38  ;;  %v1085_v2 = vadd.f32 0.00667009, %v1021_v16 }
 0x22b   : > { %6284 = vst [vmem:[#allocation25_spill] sm:$0xff] %v4036_v48  ;;  %6285 = vst [vmem:[#allocation26_spill] sm:$0xff] %v4038_v49  ;;  %v4060_v60 = vpop.f32.mrb[17].mxu0  ;;  %v4062_v33 = vpop.f32.mrb[17].mxu1  ;;  %v4146_v30 = vand.u32 2147483647, %v6305_v5 }
 0x22c   : > { %6286 = vst [vmem:[#allocation27_spill] sm:$0xff] %v4060_v60  ;;  %6287 = vst [vmem:[#allocation28_spill] sm:$0xff] %v4062_v33  ;;  %v6307_v38 = vclamps-f32 %v3974_v20, 1.0  ;;  %v6309_v35 = vclamps-f32 %v3904_v4, 1.0  ;;  %v6312_v16 = vclamps-f32 %v3976_v55, 1.0  ;;  %v6314_v5 = vclamps-f32 %v3991_v61, 1.0 }
 0x22d   : > { %6306 = vst [vmem:[#allocation38_spill] sm:$0xff] %v4146_v30  ;;  %v6316_v20 = vclamps-f32 %v3993_v58, 1.0  ;;  %v1692_v4 = vadd.f32 -0.2145988, %v1628_v40  ;;  %v1149_v40 = vmul.f32 %v1085_v2, %v3986_v57  ;;  %v6324_v58 = vclamps-f32 %v4003_v63, 1.0 }
 0x22e   : > { %v4071_v52 = vpop.f32.mrb[18].mxu0  ;;  %v4073_v45 = vpop.f32.mrb[18].mxu1  ;;  %v4150_v9 = vand.u32 2147483647, %v6307_v38  ;;  %vm4156_vm5 = vcmp.lt.f32.partialorder %v6309_v35, 0.0  ;;  %v1755_v35 = vmul.f32 %v1691_v37, %v3916_v29  ;;  %v2021_v29 = vsel %vm2020_vm3, %v3996_v1, %v2019_v44 }
 0x22f   : > { %v4096_v27 = vpop.f32.mrb[19].mxu0  ;;  %v4098_v13 = vpop.f32.mrb[19].mxu1  ;;  %v4162_v51 = vand.u32 2147483647, %v6312_v16  ;;  %v4166_v50 = vand.u32 2147483647, %v6314_v5  ;;  %v2014_v16 = vsel %vm2013_vm1, %v3989_v21, %v2012_v23 }
 0x230   : > { %6308 = vst [vmem:[#allocation39_spill] sm:$0xff] %v4150_v9  ;;  %v4172_v9 = vand.u32 2147483647, %v6316_v20  ;;  %v6319_v5 = vclamps-f32 %v3909_v7, 1.0  ;;  %v1086_v37 = vadd.f32 0.00667009, %v1022_v43 }
 0x231   : > { %6313 = vst [vmem:[#allocation40_spill] sm:$0xff] %v4162_v51  ;;  %6315 = vst [vmem:[#allocation41_spill] sm:$0xff] %v4166_v50  ;;  %v4199_v7 = vand.u32 2147483647, %v6324_v58  ;;  %v2023_v20 = vand.u32 2147483648, %v3996_v1  ;;  %v6327_v44 = vclamps-f32 %v4005_v25, 1.0 }
 0x232   : > { %v4109_v31 = vpop.f32.mrb[20].mxu0  ;;  %v4111_v59 = vpop.f32.mrb[20].mxu1  ;;  %6317 = vst [vmem:[#allocation42_spill] sm:$0xff] %v4172_v9  ;;  %vm4184_vm6 = vcmp.lt.f32.partialorder %v6319_v5, 0.0  ;;  %v1756_v5 = vmul.f32 %v1692_v4, %v3920_v10  ;;  %v1819_v9 = vadd.f32 1.5707963, %v1755_v35 }
 0x233   : > { %v4132_v36 = vpop.f32.mrb[21].mxu0  ;;  %v4134_v17 = vpop.f32.mrb[21].mxu1  ;;  %6325 = vst [vmem:[#allocation46_spill] sm:$0xff] %v4199_v7  ;;  %v4207_v43 = vand.u32 2147483647, %v6327_v44  ;;  %v6329_v2 = vclamps-f32 %v4024_v12, 1.0  ;;  %v2024_v63 = vsel %vm2022_vm4, %v2023_v20, %v2021_v29  ;;  %v1150_v12 = vmul.f32 %v1086_v37, %v4019_v22 }
 0x234   : > { %v6331_v58 = vand.u32 2147483648, %v3989_v21  ;;  %v1820_v35 = vadd.f32 1.5707963, %v1756_v5  ;;  %v1918_v30 = vsub.f32 1.0, %v4019_v22  ;;  %v1019_v5 = vmul.f32 -0.0012624911, %v3982_v56 }
 0x235   : > { %6328 = vst [vmem:[#allocation48_spill] sm:$0xff] %v4207_v43  ;;  %v4211_v50 = vand.u32 2147483647, %v6329_v2  ;;  %v1213_v2 = vadd.f32 -0.017088126, %v1149_v40  ;;  %v1917_v43 = vsub.f32 1.0, %v3986_v57 }
 0x236   : > { %v4139_v47 = vpop.f32.mrb[22].mxu0  ;;  %v4141_v39 = vpop.f32.mrb[22].mxu1  ;;  %v2017_v10 = vsel %vm2015_vm2, %v6331_v58, %v2014_v16  ;;  %v2460_v16 = vmul.f32 %v2024_v63, %v1820_v35  ;;  %v1020_v1 = vmul.f32 -0.0012624911, %v4000_v62  ;;  %v4235_v37 = vmax.f32 %v1918_v30, 0.0 }
 0x237   : > { %v4178_v55 = vpop.f32.mrb[23].mxu0  ;;  %v4180_v61 = vpop.f32.mrb[23].mxu1  ;;  %6330 = vst [vmem:[#allocation49_spill] sm:$0xff] %v4211_v50  ;;  %v2459_v25 = vmul.f32 %v2017_v10, %v1819_v9  ;;  %v1214_v9 = vadd.f32 -0.017088126, %v1150_v12  ;;  %v1277_v20 = vmul.f32 %v1213_v2, %v3986_v57  ;;  %v4233_v29 = vmax.f32 %v1917_v43, 0.0 }
 0x238   : > { %6318 = vst [vmem:[#allocation43_spill] sm:$0xff] %v4180_v61  ;;  %v2588_v4 = vsub.f32 3.1415927, %v2460_v16  ;;  %v1083_v35 = vadd.f32 0.00667009, %v1019_v5  ;;  %v6338_v2 = vclamps-f32 %v4026_v34, 1.0 }
 0x239   : > { %v2587_v58 = vsub.f32 3.1415927, %v2459_v25  ;;  %v1084_v7 = vadd.f32 0.00667009, %v1020_v1  ;;  %v1341_v12 = vadd.f32 0.03089188, %v1277_v20  ;;  %3383 = vrsqrt.f32 %v4233_v29 }
 0x23a   : > { %v4193_v23 = vpop.f32.mrb[24].mxu0  ;;  %v4195_v42 = vpop.f32.mrb[24].mxu1  ;;  %v1915_v41 = vsub.f32 1.0, %v3982_v56  ;;  %3385 = vrsqrt.f32 %v4235_v37  ;;  %vm2251_vm7 = vcmp.eq.f32.partialorder %v4233_v29, inf  ;;  %vm2253_vm8 = vcmp.eq.f32.partialorder %v4233_v29, 0.0 }
 0x23b   : > { %6322 = vst [vmem:[#allocation44_spill] sm:$0xff] %v4193_v23  ;;  %6323 = vst [vmem:[#allocation45_spill] sm:$0xff] %v4195_v42  ;;  %v4203_v51 = vpop.f32.mrb[25].mxu0  ;;  %v4221_v44 = vpop.f32.mrb[25].mxu1  ;;  %v2651_v63 = vsel %vm4156_vm5, %v2587_v58, %v2459_v25  ;;  %v2652_v25 = vsel %vm4184_vm6, %v2588_v4, %v2460_v16  ;;  %v1405_v20 = vmul.f32 %v1341_v12, %v3986_v57  ;;  %vm2258_vm10 = vcmp.eq.f32.partialorder %v4235_v37, inf }
 0x23c   : > { %6326 = vst [vmem:[#allocation47_spill] sm:$0xff] %v4203_v51  ;;  %6332 = vst [vmem:[#allocation50_spill] sm:$0xff] %v4221_v44  ;;  %v2748_v1 = vmul.f32 %v2652_v25, %v2652_v25  ;;  %v1147_v16 = vmul.f32 %v1083_v35, %v3982_v56  ;;  %v1148_v12 = vmul.f32 %v1084_v7, %v4000_v62  ;;  %v6347_v7 = vclamps-f32 %v4060_v60, 1.0 }
 0x23d   : > { %vm2260_vm11 = vcmp.eq.f32.partialorder %v4235_v37, 0.0 }
 0x23e   : > { %v4226_v50 = vpop.f32.mrb[26].mxu0  ;;  %v4228_v21 = vpop.f32.mrb[26].mxu1  ;;  %v1212_v35 = vadd.f32 -0.017088126, %v1148_v12 }
 0x23f   : > { %6333 = vst [vmem:[#allocation51_spill] sm:$0xff] %v4226_v50  ;;  %6334 = vst [vmem:[#allocation52_spill] sm:$0xff] %v4228_v21  ;;  %v4237_v40 = vpop.f32.mrb[27].mxu0  ;;  %v4239_v10 = vpop.f32.mrb[27].mxu1  ;;  %v2747_v21 = vmul.f32 %v2651_v63, %v2651_v63  ;;  %v1278_v50 = vmul.f32 %v1214_v9, %v4019_v22  ;;  %v6341_v63 = vclamps-f32 %v4036_v48, 1.0  ;;  %v1916_v48 = vsub.f32 1.0, %v4000_v62 }
 0x240   : > { %6335 = vst [vmem:[#allocation53_spill] sm:$0xff] %v4237_v40  ;;  %6336 = vst [vmem:[#allocation54_spill] sm:$0xff] %v4239_v10  ;;  %v4251_v40 = vand.u32 2147483647, %v6338_v2  ;;  %v6342_v10 = vclamps-f32 %v4038_v49, 1.0  ;;  %v4280_v49 = vmax.f32 %v1915_v41, 0.0 }
 0x241   : > { %v1342_v9 = vadd.f32 0.03089188, %v1278_v50  ;;  %v4265_v2 = vand.u32 2147483647, %v6341_v63  ;;  %v2811_v34 = vadd.f32 %v2748_v1, %v2747_v21  ;;  %v1469_v50 = vadd.f32 -0.050174303, %v1405_v20 }
 0x242   : > { %v4245_v43 = vpop.f32.mrb[28].mxu0  ;;  %v4247_v30 = vpop.f32.mrb[28].mxu1  ;;  %6339 = vst [vmem:[#allocation56_spill] sm:$0xff] %v4251_v40  ;;  %v4269_v38 = vand.u32 2147483647, %v6342_v10  ;;  %3387 = vrsqrt.f32 %v4280_v49  ;;  %v6349_v41 = vclamps-f32 %v4062_v33, 1.0 }
 0x243   : > { %6337 = vst [vmem:[#allocation55_spill] sm:$0xff] %v4245_v43  ;;  %v4257_v58 = vpop.f32.mrb[29].mxu0  ;;  %v4259_v5 = vpop.f32.mrb[29].mxu1  ;;  %v1406_v25 = vmul.f32 %v1342_v9, %v4019_v22  ;;  %v1211_v63 = vadd.f32 -0.017088126, %v1147_v16  ;;  %2812 = vadd.xlane.f32.xlu0 %v2811_v34  ;;  %v1533_v21 = vmul.f32 %v1469_v50, %v3986_v57  ;;  %v4292_v16 = vmax.f32 %v1916_v48, 0.0 }
 0x244   : > { %6340 = vst [vmem:[#allocation57_spill] sm:$0xff] %v4259_v5  ;;  %6343 = vst [vmem:[#allocation58_spill] sm:$0xff] %v4269_v38  ;;  %v4289_v9 = vand.u32 2147483647, %v6347_v7  ;;  %v1276_v50 = vmul.f32 %v1212_v35, %v4000_v62  ;;  %v3384_v48 = vpop.eup %3383  ;;  %v2254_v7 = vand.u32 2147483648, %v4233_v29  ;;  %vm2237_vm13 = vcmp.eq.f32.partialorder %v4280_v49, inf }
 0x245   : > { %v1470_v4 = vadd.f32 -0.050174303, %v1406_v25  ;;  %v1275_v20 = vmul.f32 %v1211_v63, %v3982_v56  ;;  %v1597_v25 = vadd.f32 0.08897899, %v1533_v21  ;;  %3389 = vrsqrt.f32 %v4292_v16  ;;  %v3386_v21 = vpop.eup %3385 }
 0x246   : > { %v4275_v40 = vpop.f32.mrb[30].mxu0  ;;  %v4277_v5 = vpop.f32.mrb[30].mxu1  ;;  %6348 = vst [vmem:[#allocation62_spill] sm:$0xff] %v4289_v9  ;;  %v2250_v60 = vmul.f32 %v3384_v48, %v4233_v29  ;;  %vm2239_vm14 = vcmp.eq.f32.partialorder %v4280_v49, 0.0  ;;  %vm2244_vm15 = vcmp.eq.f32.partialorder %v4292_v16, inf  ;;  %vm2246_vm0 = vcmp.eq.f32.partialorder %v4292_v16, 0.0 }
 0x247   : > { %6344 = vst [vmem:[#allocation59_spill] sm:$0xff] %v4277_v5  ;;  %v4282_v10 = vpop.f32.mrb[31].mxu0  ;;  %v4285_v1 = vpop.f32.mrb[31].mxu1  ;;  %v1534_v34 = vmul.f32 %v1470_v4, %v4019_v22  ;;  %v1661_v33 = vmul.f32 %v1597_v25, %v3986_v57 }
 0x248   : > { %6345 = vst [vmem:[#allocation60_spill] sm:$0xff] %v4282_v10  ;;  %6346 = vst [vmem:[#allocation61_spill] sm:$0xff] %v4285_v1  ;;  %v4297_v10 = vand.u32 2147483647, %v6349_v41  ;;  %v1339_v1 = vadd.f32 0.03089188, %v1275_v20 }
 0x249   : > { %v1598_v5 = vadd.f32 0.08897899, %v1534_v34  ;;  %v1340_v41 = vadd.f32 0.03089188, %v1276_v50  ;;  %v1725_v20 = vadd.f32 -0.2145988, %v1661_v33  ;;  %v2257_v50 = vmul.f32 %v3386_v21, %v4235_v37 }
 0x24a   : > { %6350 = vst [vmem:[#allocation63_spill] sm:$0xff] %v4297_v10  ;;  %v1403_v4 = vmul.f32 %v1339_v1, %v3982_v56  ;;  %v6351_v34 = vclamps-f32 %v3924_v14, 1.0  ;;  %v1886_v14 = vsub.f32 1.0, %v4013_v15 }
 0x24b   : > { %v1662_v35 = vmul.f32 %v1598_v5, %v4019_v22  ;;  %v1404_v63 = vmul.f32 %v1340_v41, %v4000_v62  ;;  %v1789_v33 = vmul.f32 %v1725_v20, %v3986_v57  ;;  %v2252_v5 = vsel %vm2251_vm7, %v4233_v29, %v2250_v60 }
 0x24c   : > { %vm4315_vm9 = vcmp.lt.f32.partialorder %v6351_v34, 0.0  ;;  %v1467_v1 = vadd.f32 -0.050174303, %v1403_v4  ;;  %v6354_v41 = vclamps-f32 %v3929_v32, 1.0  ;;  %v2261_v34 = vand.u32 2147483648, %v4235_v37  ;;  %v3388_v32 = vpop.eup %3387 }
 0x24d   : > { %v1726_v48 = vadd.f32 -0.2145988, %v1662_v35  ;;  %v1468_v12 = vadd.f32 -0.050174303, %v1404_v63  ;;  %v1853_v57 = vadd.f32 1.5707963, %v1789_v33  ;;  %v2259_v60 = vsel %vm2258_vm10, %v4235_v37, %v2257_v50 }
 0x24e   : > { %vm4326_vm12 = vcmp.lt.f32.partialorder %v6354_v41, 0.0  ;;  %v1531_v21 = vmul.f32 %v1467_v1, %v3982_v56  ;;  %v2255_v35 = vsel %vm2253_vm8, %v2254_v7, %v2252_v5  ;;  %v2240_v41 = vand.u32 2147483648, %v4280_v49 }
 0x24f   : > { %v1790_v4 = vmul.f32 %v1726_v48, %v4019_v22  ;;  %v1532_v63 = vmul.f32 %v1468_v12, %v4000_v62  ;;  %v2493_v10 = vmul.f32 %v2255_v35, %v1853_v57  ;;  %v2236_v9 = vmul.f32 %v3388_v32, %v4280_v49  ;;  %v3390_v22 = vpop.eup %3389 }
 0x250   : > { %v1595_v20 = vadd.f32 0.08897899, %v1531_v21  ;;  %v2262_v50 = vsel %vm2260_vm11, %v2261_v34, %v2259_v60  ;;  %v989_v29 = vmul.f32 -0.0012624911, %v4009_v3  ;;  %v2247_v5 = vand.u32 2147483648, %v4292_v16 }
 0x251   : > { %v1854_v1 = vadd.f32 1.5707963, %v1790_v4  ;;  %v1596_v38 = vadd.f32 0.08897899, %v1532_v63  ;;  %v2621_v48 = vsub.f32 3.1415927, %v2493_v10  ;;  %v2238_v4 = vsel %vm2237_vm13, %v4280_v49, %v2236_v9 }
 0x252   : > { %v1659_v12 = vmul.f32 %v1595_v20, %v3982_v56  ;;  %v2243_v37 = vmul.f32 %v3390_v22, %v4292_v16  ;;  %v990_v34 = vmul.f32 -0.0012624911, %v4013_v15  ;;  %v6357_v57 = vclamps-f32 %v3906_v6, 1.0 }
 0x253   : > { %v2494_v7 = vmul.f32 %v2262_v50, %v1854_v1  ;;  %v1660_v33 = vmul.f32 %v1596_v38, %v4000_v62  ;;  %v2685_v38 = vsel %vm4315_vm9, %v2621_v48, %v2493_v10  ;;  %v1053_v35 = vadd.f32 0.00667009, %v989_v29 }
 0x254   : > { %v1723_v21 = vadd.f32 -0.2145988, %v1659_v12  ;;  %vm4356_vm1 = vcmp.lt.f32.partialorder %v6357_v57, 0.0  ;;  %v6360_v20 = vclamps-f32 %v3911_v28, 1.0  ;;  %v2781_v1 = vmul.f32 %v2685_v38, %v2685_v38 }
 0x255   : > { %v2622_v63 = vsub.f32 3.1415927, %v2494_v7  ;;  %v1724_v32 = vadd.f32 -0.2145988, %v1660_v33  ;;  %v2245_v6 = vsel %vm2244_vm15, %v4292_v16, %v2243_v37  ;;  %v1054_v50 = vadd.f32 0.00667009, %v990_v34 }
 0x256   : > { %vm4364_vm2 = vcmp.lt.f32.partialorder %v6360_v20, 0.0  ;;  %v1787_v22 = vmul.f32 %v1723_v21, %v3982_v56  ;;  %v2241_v28 = vsel %vm2239_vm14, %v2240_v41, %v2238_v4  ;;  %v1117_v12 = vmul.f32 %v1053_v35, %v4009_v3 }
 0x257   : > { %v2686_v25 = vsel %vm4326_vm12, %v2622_v63, %v2494_v7  ;;  %v1788_v10 = vmul.f32 %v1724_v32, %v4000_v62  ;;  %v1118_v33 = vmul.f32 %v1054_v50, %v4013_v15  ;;  %v1885_v56 = vsub.f32 1.0, %v4009_v3 }
 0x258   : > { %v2782_v29 = vmul.f32 %v2686_v25, %v2686_v25  ;;  %v1851_v48 = vadd.f32 1.5707963, %v1787_v22  ;;  %v2248_v37 = vsel %vm2246_vm0, %v2247_v5, %v2245_v6  ;;  %v1181_v34 = vadd.f32 -0.017088126, %v1117_v12 }
 0x259   : > { %v1852_v21 = vadd.f32 1.5707963, %v1788_v10  ;;  %v1182_v57 = vadd.f32 -0.017088126, %v1118_v33  ;;  %v4383_v49 = vmax.f32 %v1885_v56, 0.0  ;;  %v6241_v41 = vclamps-f32 %v4098_v13, 1.0 }
 0x25a   : > { %v2862_v7 = vadd.f32 %v2782_v29, %v2781_v1  ;;  %v2491_v62 = vmul.f32 %v2241_v28, %v1851_v48  ;;  %v1245_v63 = vmul.f32 %v1181_v34, %v4009_v3  ;;  %v4387_v38 = vmax.f32 %v1886_v14, 0.0 }
 0x25b   : > { %v2492_v4 = vmul.f32 %v2248_v37, %v1852_v21  ;;  %v1246_v16 = vmul.f32 %v1182_v57, %v4013_v15  ;;  %3391 = vrsqrt.f32 %v4383_v49  ;;  %v1887_v5 = vsub.f32 1.0, %v4033_v46 }
 0x25c   : > { %2863 = vadd.xlane.f32.xlu1 %v2862_v7  ;;  %v2619_v32 = vsub.f32 3.1415927, %v2491_v62  ;;  %v1309_v20 = vadd.f32 0.03089188, %v1245_v63  ;;  %v991_v1 = vmul.f32 -0.0012624911, %v4033_v46  ;;  %3393 = vrsqrt.f32 %v4387_v38 }
 0x25d   : > { %v2620_v35 = vsub.f32 3.1415927, %v2492_v4  ;;  %v6363_v22 = vclamps-f32 %v4071_v52, 1.0  ;;  %v1310_v25 = vadd.f32 0.03089188, %v1246_v16  ;;  %v6364_v10 = vclamps-f32 %v4073_v45, 1.0 }
 0x25e   : > { %v2683_v50 = vsel %vm4356_vm1, %v2619_v32, %v2491_v62  ;;  %v1373_v48 = vmul.f32 %v1309_v20, %v4009_v3  ;;  %v6365_v33 = vclamps-f32 %v4096_v27, 1.0  ;;  %v992_v37 = vmul.f32 -0.0012624911, %v4046_v0 }
 0x25f   : > { %v4395_v6 = vand.u32 2147483647, %v6363_v22  ;;  %v4402_v28 = vand.u32 2147483647, %v6364_v10  ;;  %v2684_v12 = vsel %vm4364_vm2, %v2620_v35, %v2492_v4  ;;  %v2779_v29 = vmul.f32 %v2683_v50, %v2683_v50 }
 0x260   : > { %v4409_v56 = vand.u32 2147483647, %v6365_v33  ;;  %v2780_v21 = vmul.f32 %v2684_v12, %v2684_v12  ;;  %v1374_v60 = vmul.f32 %v1310_v25, %v4013_v15  ;;  %v1437_v34 = vadd.f32 -0.050174303, %v1373_v48 }
 0x261   : > { %v1055_v14 = vadd.f32 0.00667009, %v991_v1  ;;  %v1888_v7 = vsub.f32 1.0, %v4046_v0  ;;  %v4414_v62 = vmax.f32 %v1887_v5, 0.0  ;;  %v6240_v9 = vclamps-f32 %v4109_v31, 1.0 }
 0x262   : > { %v2859_v57 = vadd.f32 %v2780_v21, %v2779_v29  ;;  %v1438_v4 = vadd.f32 -0.050174303, %v1374_v60  ;;  %v1056_v63 = vadd.f32 0.00667009, %v992_v37  ;;  %v6237_v32 = vclamps-f32 %v4111_v59, 1.0 }
 0x263   : > { %v1501_v16 = vmul.f32 %v1437_v34, %v4009_v3  ;;  %v1119_v35 = vmul.f32 %v1055_v14, %v4033_v46  ;;  %v4420_v20 = vmax.f32 %v1888_v7, 0.0  ;;  %v6239_v22 = vclamps-f32 %v4132_v36, 1.0 }
 0x264   : > { %v6238_v1 = vclamps-f32 %v4134_v17, 1.0  ;;  %2860 = vadd.xlane.f32.xlu0 %v2859_v57  ;;  %v1502_v5 = vmul.f32 %v1438_v4, %v4013_v15  ;;  %v1120_v50 = vmul.f32 %v1056_v63, %v4046_v0  ;;  %v4428_v25 = vand.u32 2147483647, %v6241_v41 }
 0x265   : > { %v1565_v10 = vadd.f32 0.08897899, %v1501_v16  ;;  %v1183_v12 = vadd.f32 -0.017088126, %v1119_v35  ;;  %3395 = vrsqrt.f32 %v4414_v62  ;;  %v3392_v29 = vpop.eup %3391  ;;  %v4433_v48 = vand.u32 2147483647, %v6240_v9 }
 0x266   : > { %v1566_v33 = vadd.f32 0.08897899, %v1502_v5  ;;  %v1184_v21 = vadd.f32 -0.017088126, %v1120_v50  ;;  %3397 = vrsqrt.f32 %v4420_v20  ;;  %v4438_v60 = vand.u32 2147483647, %v6237_v32  ;;  %v3394_v7 = vpop.eup %3393 }
 0x267   : > { %v1629_v37 = vmul.f32 %v1565_v10, %v4009_v3  ;;  %v2026_v34 = vmul.f32 %v3392_v29, %v4383_v49  ;;  %v1247_v14 = vmul.f32 %v1183_v12, %v4033_v46  ;;  %v4445_v57 = vand.u32 2147483647, %v6239_v22 }
 0x268   : > { %v4449_v4 = vand.u32 2147483647, %v6238_v1  ;;  %v1630_v63 = vmul.f32 %v1566_v33, %v4013_v15  ;;  %v1248_v16 = vmul.f32 %v1184_v21, %v4046_v0  ;;  %v2033_v50 = vmul.f32 %v3394_v7, %v4387_v38 }
 0x269   : > { %v1693_v5 = vadd.f32 -0.2145988, %v1629_v37  ;;  %v1311_v10 = vadd.f32 0.03089188, %v1247_v14  ;;  %v6366_v12 = vclamps-f32 %v3922_v11, 1.0  ;;  %vm2027_vm4 = vcmp.eq.f32.partialorder %v4383_v49, inf }
 0x26a   : > { %v1694_v1 = vadd.f32 -0.2145988, %v1630_v63  ;;  %v1312_v33 = vadd.f32 0.03089188, %v1248_v16  ;;  %v6369_v21 = vclamps-f32 %v3927_v18, 1.0  ;;  %v2028_v11 = vsel %vm2027_vm4, %v4383_v49, %v2026_v34 }
 0x26b   : > { %vm4457_vm3 = vcmp.lt.f32.partialorder %v6366_v12, 0.0  ;;  %v1757_v37 = vmul.f32 %v1693_v5, %v4009_v3  ;;  %vm2034_vm6 = vcmp.eq.f32.partialorder %v4387_v38, inf  ;;  %v1375_v14 = vmul.f32 %v1311_v10, %v4033_v46 }
 0x26c   : > { %vm4465_vm5 = vcmp.lt.f32.partialorder %v6369_v21, 0.0  ;;  %v1758_v7 = vmul.f32 %v1694_v1, %v4013_v15  ;;  %v2030_v63 = vand.u32 2147483648, %v4383_v49  ;;  %v2035_v16 = vsel %vm2034_vm6, %v4387_v38, %v2033_v50 }
 0x26d   : > { %v1376_v18 = vmul.f32 %v1312_v33, %v4046_v0  ;;  %v1821_v12 = vadd.f32 1.5707963, %v1757_v37  ;;  %vm2029_vm7 = vcmp.eq.f32.partialorder %v4383_v49, 0.0  ;;  %v2037_v21 = vand.u32 2147483648, %v4387_v38 }
 0x26e   : > { %v1439_v3 = vadd.f32 -0.050174303, %v1375_v14  ;;  %v1822_v5 = vadd.f32 1.5707963, %v1758_v7  ;;  %v2031_v34 = vsel %vm2029_vm7, %v2030_v63, %v2028_v11  ;;  %vm2036_vm8 = vcmp.eq.f32.partialorder %v4387_v38, 0.0 }
 0x26f   : > { %v1440_v9 = vadd.f32 -0.050174303, %v1376_v18  ;;  %v3396_v10 = vpop.eup %3395  ;;  %v2038_v1 = vsel %vm2036_vm8, %v2037_v21, %v2035_v16  ;;  %v2461_v41 = vmul.f32 %v2031_v34, %v1821_v12  ;;  %vm2041_vm9 = vcmp.eq.f32.partialorder %v4414_v62, inf }
 0x270   : > { %v1503_v50 = vmul.f32 %v1439_v3, %v4033_v46  ;;  %v3398_v32 = vpop.eup %3397  ;;  %v2462_v33 = vmul.f32 %v2038_v1, %v1822_v5  ;;  %v1023_v49 = vmul.f32 -0.0012624911, %v4042_v53  ;;  %vm2043_vm10 = vcmp.eq.f32.partialorder %v4414_v62, 0.0 }
 0x271   : > { %v1504_v37 = vmul.f32 %v1440_v9, %v4046_v0  ;;  %v2589_v14 = vsub.f32 3.1415927, %v2461_v41  ;;  %v2044_v38 = vand.u32 2147483648, %v4414_v62  ;;  %vm2048_vm11 = vcmp.eq.f32.partialorder %v4420_v20, inf }
 0x272   : > { %v1567_v11 = vadd.f32 0.08897899, %v1503_v50  ;;  %v2590_v7 = vsub.f32 3.1415927, %v2462_v33  ;;  %v2040_v16 = vmul.f32 %v3396_v10, %v4414_v62  ;;  %vm2050_vm12 = vcmp.eq.f32.partialorder %v4420_v20, 0.0 }
 0x273   : > { %v1568_v63 = vadd.f32 0.08897899, %v1504_v37  ;;  %v2051_v9 = vand.u32 2147483648, %v4420_v20  ;;  %v2653_v18 = vsel %vm4457_vm3, %v2589_v14, %v2461_v41  ;;  %v2047_v21 = vmul.f32 %v3398_v32, %v4420_v20 }
 0x274   : > { %v1631_v12 = vmul.f32 %v1567_v11, %v4033_v46  ;;  %v1024_v3 = vmul.f32 -0.0012624911, %v4052_v24  ;;  %v2654_v5 = vsel %vm4465_vm5, %v2590_v7, %v2462_v33  ;;  %v2749_v34 = vmul.f32 %v2653_v18, %v2653_v18 }
 0x275   : > { %v1632_v1 = vmul.f32 %v1568_v63, %v4046_v0  ;;  %v1087_v10 = vadd.f32 0.00667009, %v1023_v49  ;;  %v2750_v50 = vmul.f32 %v2654_v5, %v2654_v5  ;;  %v1919_v35 = vsub.f32 1.0, %v4042_v53 }
 0x276   : > { %v1695_v37 = vadd.f32 -0.2145988, %v1631_v12  ;;  %v1088_v15 = vadd.f32 0.00667009, %v1024_v3  ;;  %v6372_v41 = vclamps-f32 %v3932_v19, 1.0  ;;  %v2042_v22 = vsel %vm2041_vm9, %v4414_v62, %v2040_v16 }
 0x277   : > { %v1696_v32 = vadd.f32 -0.2145988, %v1632_v1  ;;  %v1151_v33 = vmul.f32 %v1087_v10, %v4042_v53  ;;  %v1920_v49 = vsub.f32 1.0, %v4052_v24  ;;  %v6375_v14 = vclamps-f32 %v3937_v26, 1.0 }
 0x278   : > { %vm4502_vm13 = vcmp.lt.f32.partialorder %v6372_v41, 0.0  ;;  %v2814_v19 = vadd.f32 %v2750_v50, %v2749_v34  ;;  %v1759_v7 = vmul.f32 %v1695_v37, %v4033_v46  ;;  %v1152_v63 = vmul.f32 %v1088_v15, %v4052_v24 }
 0x279   : > { %vm4513_vm14 = vcmp.lt.f32.partialorder %v6375_v14, 0.0  ;;  %v4519_v18 = vmax.f32 %v1919_v35, 0.0  ;;  %v1760_v12 = vmul.f32 %v1696_v32, %v4046_v0  ;;  %v2049_v16 = vsel %vm2048_vm11, %v4420_v20, %v2047_v21 }
 0x27a   : > { %v1215_v3 = vadd.f32 -0.017088126, %v1151_v33  ;;  %v4525_v5 = vmax.f32 %v1920_v49, 0.0  ;;  %2815 = vadd.xlane.f32.xlu0 %v2814_v19  ;;  %v1823_v26 = vadd.f32 1.5707963, %v1759_v7  ;;  %v2045_v35 = vsel %vm2043_vm10, %v2044_v38, %v2042_v22 }
 0x27b   : > { %v1216_v1 = vadd.f32 -0.017088126, %v1152_v63  ;;  %3399 = vrsqrt.f32 %v4519_v18  ;;  %v993_v46 = vmul.f32 -0.0012624911, %v4056_v54  ;;  %v1824_v34 = vadd.f32 1.5707963, %v1760_v12 }
 0x27c   : > { %v1279_v0 = vmul.f32 %v1215_v3, %v4042_v53  ;;  %v994_v15 = vmul.f32 -0.0012624911, %v4077_v8  ;;  %v2052_v21 = vsel %vm2050_vm12, %v2051_v9, %v2049_v16  ;;  %v2463_v10 = vmul.f32 %v2045_v35, %v1823_v26 }
 0x27d   : > { %v1280_v50 = vmul.f32 %v1216_v1, %v4052_v24  ;;  %3401 = vrsqrt.f32 %v4525_v5  ;;  %v6378_v37 = vclamps-f32 %v4139_v47, 1.0  ;;  %v6243_v32 = vclamps-f32 %v4180_v61, 1.0 }
 0x27e   : > { %v2464_v62 = vmul.f32 %v2052_v21, %v1824_v34  ;;  %v1343_v38 = vadd.f32 0.03089188, %v1279_v0  ;;  %v2591_v22 = vsub.f32 3.1415927, %v2463_v10  ;;  %v1057_v49 = vadd.f32 0.00667009, %v993_v46 }
 0x27f   : > { %v4539_v41 = vand.u32 2147483647, %v6378_v37  ;;  %v1344_v33 = vadd.f32 0.03089188, %v1280_v50  ;;  %v1058_v9 = vadd.f32 0.00667009, %v994_v15 }
 0x280   : > { %v2592_v14 = vsub.f32 3.1415927, %v2464_v62  ;;  %v1407_v20 = vmul.f32 %v1343_v38, %v4042_v53  ;;  %v1889_v19 = vsub.f32 1.0, %v4056_v54  ;;  %v2655_v7 = vsel %vm4502_vm13, %v2591_v22, %v2463_v10 }
 0x281   : > { %v1408_v63 = vmul.f32 %v1344_v33, %v4052_v24  ;;  %v1121_v12 = vmul.f32 %v1057_v49, %v4056_v54  ;;  %v1890_v16 = vsub.f32 1.0, %v4077_v8  ;;  %v2751_v26 = vmul.f32 %v2655_v7, %v2655_v7 }
 0x282   : > { %v2656_v3 = vsel %vm4513_vm14, %v2592_v14, %v2464_v62  ;;  %v1471_v1 = vadd.f32 -0.050174303, %v1407_v20  ;;  %v1122_v46 = vmul.f32 %v1058_v9, %v4077_v8  ;;  %v4552_v15 = vmax.f32 %v1889_v19, 0.0 }
 0x283   : > { %v2752_v34 = vmul.f32 %v2656_v3, %v2656_v3  ;;  %v1472_v35 = vadd.f32 -0.050174303, %v1408_v63  ;;  %v1185_v0 = vadd.f32 -0.017088126, %v1121_v12  ;;  %v6379_v29 = vclamps-f32 %v4141_v39, 1.0 }
 0x284   : > { %v1535_v10 = vmul.f32 %v1471_v1, %v4042_v53  ;;  %v1186_v50 = vadd.f32 -0.017088126, %v1122_v46  ;;  %v4559_v37 = vmax.f32 %v1890_v16, 0.0  ;;  %3403 = vrsqrt.f32 %v4552_v15 }
 0x285   : > { %v4556_v21 = vand.u32 2147483647, %v6379_v29  ;;  %v3400_v11 = vpop.eup %3399  ;;  %v2817_v62 = vadd.f32 %v2752_v34, %v2751_v26  ;;  %v1536_v38 = vmul.f32 %v1472_v35, %v4052_v24  ;;  %v1249_v22 = vmul.f32 %v1185_v0, %v4056_v54  ;;  %v6398_v29 = vld [vmem:[#allocation30_spill] sm:$0xff] }
 0x286   : > { %v6380_v33 = vclamps-f32 %v4178_v55, 1.0  ;;  %v6242_v14 = vclamps-f32 %v4193_v23, 1.0  ;;  %v1599_v20 = vadd.f32 0.08897899, %v1535_v10  ;;  %v1250_v9 = vmul.f32 %v1186_v50, %v4077_v8 }
 0x287   : > { %v3402_v19 = vpop.eup %3401  ;;  %v4572_v7 = vand.u32 2147483647, %v6243_v32  ;;  %2818 = vadd.xlane.f32.xlu1 %v2817_v62  ;;  %v1600_v63 = vadd.f32 0.08897899, %v1536_v38  ;;  %v1313_v12 = vadd.f32 0.03089188, %v1249_v22  ;;  %v2264_v26 = vmul.f32 %v3400_v11, %v4519_v18 }
 0x288   : > { %v4566_v49 = vand.u32 2147483647, %v6380_v33  ;;  %v1663_v3 = vmul.f32 %v1599_v20, %v4042_v53  ;;  %v1314_v1 = vadd.f32 0.03089188, %v1250_v9  ;;  %v2271_v34 = vmul.f32 %v3402_v19, %v4525_v5  ;;  %v6381_v62 = vld [vmem:[#allocation3_spill] sm:$0xff]  ;;  %v6385_v20 = vld [vmem:[#allocation4_spill] sm:$0xff] }
 0x289   : > { %v1664_v46 = vmul.f32 %v1600_v63, %v4052_v24  ;;  %v1377_v35 = vmul.f32 %v1313_v12, %v4056_v54  ;;  %3405 = vrsqrt.f32 %v4559_v37  ;;  %v4583_v0 = vand.u32 2147483647, %v6242_v14 }
 0x28a   : > { %v1727_v10 = vadd.f32 -0.2145988, %v1663_v3  ;;  %v1378_v50 = vmul.f32 %v1314_v1, %v4077_v8  ;;  %v6382_v11 = vclamps-f32 %v6381_v62, 1.0  ;;  %vm2265_vm0 = vcmp.eq.f32.partialorder %v4519_v18, inf }
 0x28b   : > { %v1728_v22 = vadd.f32 -0.2145988, %v1664_v46  ;;  %vm2267_vm1 = vcmp.eq.f32.partialorder %v4519_v18, 0.0  ;;  %v1441_v33 = vadd.f32 -0.050174303, %v1377_v35  ;;  %v6386_v9 = vclamps-f32 %v6385_v20, 1.0 }
 0x28c   : > { %vm4589_vm15 = vcmp.lt.f32.partialorder %v6382_v11, 0.0  ;;  %v1791_v63 = vmul.f32 %v1727_v10, %v4042_v53  ;;  %v2266_v12 = vsel %vm2265_vm0, %v4519_v18, %v2264_v26  ;;  %vm2272_vm3 = vcmp.eq.f32.partialorder %v4525_v5, inf }
 0x28d   : > { %vm4597_vm2 = vcmp.lt.f32.partialorder %v6386_v9, 0.0  ;;  %v1442_v3 = vadd.f32 -0.050174303, %v1378_v50  ;;  %v1792_v1 = vmul.f32 %v1728_v22, %v4052_v24  ;;  %v2268_v46 = vand.u32 2147483648, %v4519_v18 }
 0x28e   : > { %v2273_v62 = vsel %vm2272_vm3, %v4525_v5, %v2271_v34  ;;  %v1505_v35 = vmul.f32 %v1441_v33, %v4056_v54  ;;  %v1855_v11 = vadd.f32 1.5707963, %v1791_v63  ;;  %vm2274_vm4 = vcmp.eq.f32.partialorder %v4525_v5, 0.0  ;;  %v3404_v10 = vpop.eup %3403 }
 0x28f   : > { %v2275_v20 = vand.u32 2147483648, %v4525_v5  ;;  %v1506_v53 = vmul.f32 %v1442_v3, %v4077_v8  ;;  %v1856_v26 = vadd.f32 1.5707963, %v1792_v1  ;;  %v2269_v50 = vsel %vm2267_vm1, %v2268_v46, %v2266_v12 }
 0x290   : > { %v1569_v9 = vadd.f32 0.08897899, %v1505_v35  ;;  %vm2055_vm5 = vcmp.eq.f32.partialorder %v4552_v15, inf  ;;  %v2495_v22 = vmul.f32 %v2269_v50, %v1855_v11  ;;  %v2054_v33 = vmul.f32 %v3404_v10, %v4552_v15  ;;  %v6389_v11 = vld [vmem:[#allocation5_spill] sm:$0xff] }
 0x291   : > { %v2276_v24 = vsel %vm2274_vm4, %v2275_v20, %v2273_v62  ;;  %v1570_v34 = vadd.f32 0.08897899, %v1506_v53  ;;  %vm2057_vm6 = vcmp.eq.f32.partialorder %v4552_v15, 0.0  ;;  %v2058_v5 = vand.u32 2147483648, %v4552_v15 }
 0x292   : > { %v2496_v63 = vmul.f32 %v2276_v24, %v1856_v26  ;;  %v1633_v14 = vmul.f32 %v1569_v9, %v4056_v54  ;;  %v2623_v3 = vsub.f32 3.1415927, %v2495_v22  ;;  %vm2062_vm7 = vcmp.eq.f32.partialorder %v4559_v37, inf  ;;  %v6393_v9 = vld [vmem:[#allocation29_spill] sm:$0xff]  ;;  %v6394_v24 = vld [vmem:[#allocation7_spill] sm:$0xff] }
 0x293   : > { %v1634_v1 = vmul.f32 %v1570_v34, %v4077_v8  ;;  %vm2064_vm8 = vcmp.eq.f32.partialorder %v4559_v37, 0.0  ;;  %v3406_v18 = vpop.eup %3405  ;;  %v2056_v62 = vsel %vm2055_vm5, %v4552_v15, %v2054_v33  ;;  %v2065_v35 = vand.u32 2147483648, %v4559_v37 }
 0x294   : > { %v2624_v12 = vsub.f32 3.1415927, %v2496_v63  ;;  %v1697_v46 = vadd.f32 -0.2145988, %v1633_v14  ;;  %v6390_v20 = vclamps-f32 %v6389_v11, 1.0  ;;  %v2687_v10 = vsel %vm4589_vm15, %v2623_v3, %v2495_v22 }
 0x295   : > { %v1698_v26 = vadd.f32 -0.2145988, %v1634_v1  ;;  %v2061_v50 = vmul.f32 %v3406_v18, %v4559_v37  ;;  %v1025_v14 = vmul.f32 -0.0012624911, %v6393_v9  ;;  %v6395_v34 = vclamps-f32 %v6394_v24, 1.0 }
 0x296   : > { %vm4627_vm9 = vcmp.lt.f32.partialorder %v6390_v20, 0.0  ;;  %v2688_v11 = vsel %vm4597_vm2, %v2624_v12, %v2496_v63  ;;  %v2783_v20 = vmul.f32 %v2687_v10, %v2687_v10  ;;  %v1761_v32 = vmul.f32 %v1697_v46, %v4056_v54 }
 0x297   : > { %vm4637_vm10 = vcmp.lt.f32.partialorder %v6395_v34, 0.0  ;;  %v1026_v38 = vmul.f32 -0.0012624911, %v6398_v29  ;;  %v2784_v22 = vmul.f32 %v2688_v11, %v2688_v11  ;;  %v1762_v3 = vmul.f32 %v1698_v26, %v4077_v8 }
 0x298   : > { %v2063_v1 = vsel %vm2062_vm7, %v4559_v37, %v2061_v50  ;;  %v1089_v18 = vadd.f32 0.00667009, %v1025_v14  ;;  %v1825_v24 = vadd.f32 1.5707963, %v1761_v32  ;;  %v2059_v34 = vsel %vm2057_vm6, %v2058_v5, %v2056_v62  ;;  %v6401_v37 = vld [vmem:[#allocation31_spill] sm:$0xff] }
 0x299   : > { %v1090_v16 = vadd.f32 0.00667009, %v1026_v38  ;;  %v1921_v19 = vsub.f32 1.0, %v6393_v9  ;;  %v2865_v63 = vadd.f32 %v2784_v22, %v2783_v20  ;;  %v1826_v12 = vadd.f32 1.5707963, %v1762_v3 }
 0x29a   : > { %v1153_v54 = vmul.f32 %v1089_v18, %v6393_v9  ;;  %v1922_v46 = vsub.f32 1.0, %v6398_v29  ;;  %v2066_v8 = vsel %vm2064_vm8, %v2065_v35, %v2063_v1  ;;  %v2465_v10 = vmul.f32 %v2059_v34, %v1825_v24  ;;  %v6403_v1 = vld [vmem:[#allocation33_spill] sm:$0xff] }
 0x29b   : > { %v1154_v26 = vmul.f32 %v1090_v16, %v6398_v29  ;;  %v4657_v50 = vmax.f32 %v1921_v19, 0.0  ;;  %v6399_v32 = vclamps-f32 %v4195_v42, 1.0  ;;  %2866 = vadd.xlane.f32.xlu0 %v2865_v63  ;;  %v2466_v5 = vmul.f32 %v2066_v8, %v1826_v12  ;;  %v6404_v63 = vld [vmem:[#allocation51_spill] sm:$0xff] }
 0x29c   : > { %v1217_v62 = vadd.f32 -0.017088126, %v1153_v54  ;;  %v4663_v14 = vmax.f32 %v1922_v46, 0.0  ;;  %v2593_v11 = vsub.f32 3.1415927, %v2465_v10  ;;  %v6402_v38 = vclamps-f32 %v4203_v51, 1.0 }
 0x29d   : > { %v4661_v15 = vand.u32 2147483647, %v6399_v32  ;;  %v1218_v20 = vadd.f32 -0.017088126, %v1154_v26  ;;  %3407 = vrsqrt.f32 %v4657_v50  ;;  %v995_v35 = vmul.f32 -0.0012624911, %v6401_v37 }
 0x29e   : > { %v4669_v16 = vand.u32 2147483647, %v6402_v38  ;;  %v2594_v22 = vsub.f32 3.1415927, %v2466_v5  ;;  %v1281_v3 = vmul.f32 %v1217_v62, %v6393_v9  ;;  %v996_v18 = vmul.f32 -0.0012624911, %v6403_v1 }
 0x29f   : > { %6400 = vst [vmem:[#allocation3_spill] sm:$0xff] %v4661_v15  ;;  %v2657_v34 = vsel %vm4627_vm9, %v2593_v11, %v2465_v10  ;;  %v1282_v19 = vmul.f32 %v1218_v20, %v6398_v29  ;;  %3409 = vrsqrt.f32 %v4663_v14  ;;  %v6405_v26 = vld [vmem:[#allocation52_spill] sm:$0xff]  ;;  %v1059_v42 = vadd.f32 0.00667009, %v995_v35  ;;  %v6406_v20 = vld [vmem:[#allocation53_spill] sm:$0xff] }
 0x2a0   : > { %v2658_v54 = vsel %vm4637_vm10, %v2594_v22, %v2466_v5  ;;  %v2753_v46 = vmul.f32 %v2657_v34, %v2657_v34  ;;  %v1345_v8 = vadd.f32 0.03089188, %v1281_v3  ;;  %v1060_v53 = vadd.f32 0.00667009, %v996_v18 }
 0x2a1   : > { %v2754_v62 = vmul.f32 %v2658_v54, %v2658_v54  ;;  %v1346_v38 = vadd.f32 0.03089188, %v1282_v19  ;;  %v1891_v10 = vsub.f32 1.0, %v6401_v37  ;;  %v1892_v11 = vsub.f32 1.0, %v6403_v1  ;;  %v6407_v19 = vld [vmem:[#allocation54_spill] sm:$0xff] }
 0x2a2   : > { %v1409_v24 = vmul.f32 %v1345_v8, %v6393_v9  ;;  %v1123_v5 = vmul.f32 %v1059_v42, %v6401_v37  ;;  %v1124_v3 = vmul.f32 %v1060_v53, %v6403_v1  ;;  %v6250_v18 = vclamps-f32 %v6407_v19, 1.0 }
 0x2a3   : > { %v2820_v12 = vadd.f32 %v2754_v62, %v2753_v46  ;;  %v1410_v33 = vmul.f32 %v1346_v38, %v6398_v29  ;;  %v4689_v34 = vmax.f32 %v1891_v10, 0.0  ;;  %v4691_v35 = vmax.f32 %v1892_v11, 0.0 }
 0x2a4   : > { %v1473_v22 = vadd.f32 -0.050174303, %v1409_v24  ;;  %v1187_v8 = vadd.f32 -0.017088126, %v1123_v5  ;;  %v6408_v32 = vclamps-f32 %v4221_v44, 1.0  ;;  %v6410_v24 = vclamps-f32 %v6404_v63, 1.0 }
 0x2a5   : > { %2821 = vadd.xlane.f32.xlu1 %v2820_v12  ;;  %v1474_v54 = vadd.f32 -0.050174303, %v1410_v33  ;;  %v1188_v62 = vadd.f32 -0.017088126, %v1124_v3  ;;  %3411 = vrsqrt.f32 %v4689_v34  ;;  %v6412_v53 = vclamps-f32 %v6405_v26, 1.0 }
 0x2a6   : > { %v4696_v51 = vand.u32 2147483647, %v6408_v32  ;;  %v1537_v46 = vmul.f32 %v1473_v22, %v6393_v9  ;;  %v4702_v38 = vand.u32 2147483647, %v6410_v24  ;;  %v1251_v11 = vmul.f32 %v1187_v8, %v6401_v37 }
 0x2a7   : > { %v3408_v42 = vpop.eup %3407  ;;  %v4706_v10 = vand.u32 2147483647, %v6412_v53  ;;  %v1538_v12 = vmul.f32 %v1474_v54, %v6398_v29  ;;  %v6414_v32 = vclamps-f32 %v6406_v20, 1.0  ;;  %v1252_v22 = vmul.f32 %v1188_v62, %v6403_v1 }
 0x2a8   : > { %6409 = vst [vmem:[#allocation4_spill] sm:$0xff] %v4696_v51  ;;  %6411 = vst [vmem:[#allocation5_spill] sm:$0xff] %v4702_v38  ;;  %v1601_v5 = vadd.f32 0.08897899, %v1537_v46  ;;  %3413 = vrsqrt.f32 %v4691_v35  ;;  %v4718_v24 = vand.u32 2147483647, %v6250_v18  ;;  %v2278_v20 = vmul.f32 %v3408_v42, %v4657_v50 }
 0x2a9   : > { %6413 = vst [vmem:[#allocation29_spill] sm:$0xff] %v4706_v10  ;;  %v4712_v33 = vand.u32 2147483647, %v6414_v32  ;;  %v3410_v3 = vpop.eup %3409  ;;  %v1602_v53 = vadd.f32 0.08897899, %v1538_v12  ;;  %vm2279_vm11 = vcmp.eq.f32.partialorder %v4657_v50, inf }
 0x2aa   : > { %6416 = vst [vmem:[#allocation30_spill] sm:$0xff] %v4718_v24  ;;  %v1315_v26 = vadd.f32 0.03089188, %v1251_v11  ;;  %v1665_v8 = vmul.f32 %v1601_v5, %v6393_v9  ;;  %v1316_v32 = vadd.f32 0.03089188, %v1252_v22  ;;  %v2285_v62 = vmul.f32 %v3410_v3, %v4663_v14  ;;  %v6417_v18 = vld [vmem:[#allocation6_spill] sm:$0xff] }
 0x2ab   : > { %6415 = vst [vmem:[#allocation7_spill] sm:$0xff] %v4712_v33  ;;  %v1666_v46 = vmul.f32 %v1602_v53, %v6398_v29  ;;  %vm2281_vm12 = vcmp.eq.f32.partialorder %v4657_v50, 0.0  ;;  %v2282_v12 = vand.u32 2147483648, %v4657_v50  ;;  %v6418_v5 = vclamps-f32 %v6417_v18, 1.0 }
 0x2ac   : > { %v1379_v63 = vmul.f32 %v1315_v26, %v6401_v37  ;;  %v1729_v19 = vadd.f32 -0.2145988, %v1665_v8  ;;  %v1380_v11 = vmul.f32 %v1316_v32, %v6403_v1  ;;  %vm2286_vm14 = vcmp.eq.f32.partialorder %v4663_v14, inf  ;;  %v6421_v26 = vld [vmem:[#allocation8_spill] sm:$0xff] }
 0x2ad   : > { %vm4732_vm13 = vcmp.lt.f32.partialorder %v6418_v5, 0.0  ;;  %v1730_v22 = vadd.f32 -0.2145988, %v1666_v46  ;;  %vm2288_vm15 = vcmp.eq.f32.partialorder %v4663_v14, 0.0  ;;  %v6422_v53 = vclamps-f32 %v6421_v26, 1.0 }
 0x2ae   : > { %v1443_v3 = vadd.f32 -0.050174303, %v1379_v63  ;;  %v1793_v32 = vmul.f32 %v1729_v19, %v6393_v9  ;;  %v2280_v18 = vsel %vm2279_vm11, %v4657_v50, %v2278_v20  ;;  %v2289_v5 = vand.u32 2147483648, %v4663_v14 }
 0x2af   : > { %vm4740_vm0 = vcmp.lt.f32.partialorder %v6422_v53, 0.0  ;;  %v1444_v54 = vadd.f32 -0.050174303, %v1380_v11  ;;  %v1794_v46 = vmul.f32 %v1730_v22, %v6398_v29  ;;  %v2287_v24 = vsel %vm2286_vm14, %v4663_v14, %v2285_v62  ;;  %v3412_v63 = vpop.eup %3411 }
 0x2b0   : > { %v1507_v10 = vmul.f32 %v1443_v3, %v6401_v37  ;;  %vm2069_vm1 = vcmp.eq.f32.partialorder %v4689_v34, inf  ;;  %v1857_v26 = vadd.f32 1.5707963, %v1793_v32  ;;  %vm2071_vm2 = vcmp.eq.f32.partialorder %v4689_v34, 0.0 }
 0x2b1   : > { %v1508_v53 = vmul.f32 %v1444_v54, %v6403_v1  ;;  %v2072_v9 = vand.u32 2147483648, %v4689_v34  ;;  %vm2076_vm3 = vcmp.eq.f32.partialorder %v4691_v35, inf  ;;  %v1858_v20 = vadd.f32 1.5707963, %v1794_v46  ;;  %v6425_v54 = vld [vmem:[#allocation32_spill] sm:$0xff] }
 0x2b2   : > { %v2283_v29 = vsel %vm2281_vm12, %v2282_v12, %v2280_v18  ;;  %v1571_v19 = vadd.f32 0.08897899, %v1507_v10  ;;  %v2068_v62 = vmul.f32 %v3412_v63, %v4689_v34  ;;  %v3414_v11 = vpop.eup %3413  ;;  %v2290_v22 = vsel %vm2288_vm15, %v2289_v5, %v2287_v24  ;;  %v6426_v18 = vld [vmem:[#allocation34_spill] sm:$0xff] }
 0x2b3   : > { %v2497_v3 = vmul.f32 %v2283_v29, %v1857_v26  ;;  %v1572_v32 = vadd.f32 0.08897899, %v1508_v53  ;;  %v1027_v44 = vmul.f32 -0.0012624911, %v6425_v54  ;;  %v2498_v33 = vmul.f32 %v2290_v22, %v1858_v20  ;;  %v6427_v26 = vld [vmem:[#allocation9_spill] sm:$0xff]  ;;  %v6431_v22 = vld [vmem:[#allocation11_spill] sm:$0xff] }
 0x2b4   : > { %v1635_v38 = vmul.f32 %v1571_v19, %v6401_v37  ;;  %v2075_v23 = vmul.f32 %v3414_v11, %v4691_v35  ;;  %vm2078_vm4 = vcmp.eq.f32.partialorder %v4691_v35, 0.0  ;;  %v2079_v12 = vand.u32 2147483648, %v4691_v35 }
 0x2b5   : > { %v2625_v50 = vsub.f32 3.1415927, %v2497_v3  ;;  %v1636_v10 = vmul.f32 %v1572_v32, %v6403_v1  ;;  %v1028_v46 = vmul.f32 -0.0012624911, %v6426_v18  ;;  %v2626_v14 = vsub.f32 3.1415927, %v2498_v33 }
 0x2b6   : > { %v1699_v24 = vadd.f32 -0.2145988, %v1635_v38  ;;  %v2070_v5 = vsel %vm2069_vm1, %v4689_v34, %v2068_v62  ;;  %v1091_v63 = vadd.f32 0.00667009, %v1027_v44  ;;  %v6428_v53 = vclamps-f32 %v6427_v26, 1.0 }
 0x2b7   : > { %v2689_v29 = vsel %vm4732_vm13, %v2625_v50, %v2497_v3  ;;  %v1700_v19 = vadd.f32 -0.2145988, %v1636_v10  ;;  %v2077_v11 = vsel %vm2076_vm3, %v4691_v35, %v2075_v23  ;;  %v1092_v38 = vadd.f32 0.00667009, %v1028_v46 }
 0x2b8   : > { %vm4772_vm5 = vcmp.lt.f32.partialorder %v6428_v53, 0.0  ;;  %v6432_v32 = vclamps-f32 %v6431_v22, 1.0  ;;  %v2690_v44 = vsel %vm4740_vm0, %v2626_v14, %v2498_v33  ;;  %v2785_v26 = vmul.f32 %v2689_v29, %v2689_v29 }
 0x2b9   : > { %v1763_v53 = vmul.f32 %v1699_v24, %v6401_v37  ;;  %v1155_v42 = vmul.f32 %v1091_v63, %v6425_v54  ;;  %v2786_v3 = vmul.f32 %v2690_v44, %v2690_v44  ;;  %v1764_v50 = vmul.f32 %v1700_v19, %v6403_v1 }
 0x2ba   : > { %vm4783_vm6 = vcmp.lt.f32.partialorder %v6432_v32, 0.0  ;;  %v1156_v23 = vmul.f32 %v1092_v38, %v6426_v18  ;;  %v1923_v10 = vsub.f32 1.0, %v6425_v54  ;;  %v2073_v22 = vsel %vm2071_vm2, %v2072_v9, %v2070_v5 }
 0x2bb   : > { %v1827_v46 = vadd.f32 1.5707963, %v1763_v53  ;;  %v1219_v32 = vadd.f32 -0.017088126, %v1155_v42  ;;  %v1924_v8 = vsub.f32 1.0, %v6426_v18  ;;  %v2868_v33 = vadd.f32 %v2786_v3, %v2785_v26  ;;  %v6437_v53 = vld [vmem:[#allocation35_spill] sm:$0xff] }
 0x2bc   : > { %v1828_v14 = vadd.f32 1.5707963, %v1764_v50  ;;  %v1220_v29 = vadd.f32 -0.017088126, %v1156_v23  ;;  %v4797_v37 = vmax.f32 %v1923_v10, 0.0  ;;  %v2080_v24 = vsel %vm2078_vm4, %v2079_v12, %v2077_v11  ;;  %v6445_v3 = vld [vmem:[#allocation38_spill] sm:$0xff] }
 0x2bd   : > { %v2467_v1 = vmul.f32 %v2073_v22, %v1827_v46  ;;  %v1283_v63 = vmul.f32 %v1219_v32, %v6425_v54  ;;  %v4802_v19 = vmax.f32 %v1924_v8, 0.0  ;;  %v6435_v38 = vclamps-f32 %v4245_v43, 1.0  ;;  %2869 = vadd.xlane.f32.xlu1 %v2868_v33  ;;  %v6438_v8 = vld [vmem:[#allocation37_spill] sm:$0xff] }
 0x2be   : > { %v2468_v9 = vmul.f32 %v2080_v24, %v1828_v14  ;;  %v1284_v5 = vmul.f32 %v1220_v29, %v6426_v18  ;;  %3415 = vrsqrt.f32 %v4797_v37  ;;  %v997_v35 = vmul.f32 -0.0012624911, %v6437_v53 }
 0x2bf   : > { %v4806_v34 = vand.u32 2147483647, %v6435_v38  ;;  %v2595_v44 = vsub.f32 3.1415927, %v2467_v1  ;;  %v1347_v26 = vadd.f32 0.03089188, %v1283_v63  ;;  %3417 = vrsqrt.f32 %v4802_v19 }
 0x2c0   : > { %v2596_v12 = vsub.f32 3.1415927, %v2468_v9  ;;  %v1348_v11 = vadd.f32 0.03089188, %v1284_v5  ;;  %v1893_v42 = vsub.f32 1.0, %v6437_v53  ;;  %v1894_v63 = vsub.f32 1.0, %v6438_v8 }
 0x2c1   : > { %6436 = vst [vmem:[#allocation31_spill] sm:$0xff] %v4806_v34  ;;  %v2659_v23 = vsel %vm4772_vm5, %v2595_v44, %v2467_v1  ;;  %v1411_v10 = vmul.f32 %v1347_v26, %v6425_v54  ;;  %v998_v33 = vmul.f32 -0.0012624911, %v6438_v8  ;;  %v1061_v24 = vadd.f32 0.00667009, %v997_v35  ;;  %v6439_v38 = vld [vmem:[#allocation57_spill] sm:$0xff] }
 0x2c2   : > { %v2660_v46 = vsel %vm4783_vm6, %v2596_v12, %v2468_v9  ;;  %v2755_v22 = vmul.f32 %v2659_v23, %v2659_v23  ;;  %v1412_v32 = vmul.f32 %v1348_v11, %v6426_v18  ;;  %v4824_v1 = vmax.f32 %v1893_v42, 0.0 }
 0x2c3   : > { %v2756_v14 = vmul.f32 %v2660_v46, %v2660_v46  ;;  %v1475_v29 = vadd.f32 -0.050174303, %v1411_v10  ;;  %v1062_v20 = vadd.f32 0.00667009, %v998_v33  ;;  %v1125_v9 = vmul.f32 %v1061_v24, %v6437_v53 }
 0x2c4   : > { %v1476_v50 = vadd.f32 -0.050174303, %v1412_v32  ;;  %v4828_v26 = vmax.f32 %v1894_v63, 0.0  ;;  %vm2293_vm7 = vcmp.eq.f32.partialorder %v4797_v37, inf  ;;  %3419 = vrsqrt.f32 %v4824_v1 }
 0x2c5   : > { %v2823_v44 = vadd.f32 %v2756_v14, %v2755_v22  ;;  %v1539_v62 = vmul.f32 %v1475_v29, %v6425_v54  ;;  %v1126_v35 = vmul.f32 %v1062_v20, %v6438_v8  ;;  %vm2295_vm8 = vcmp.eq.f32.partialorder %v4797_v37, 0.0  ;;  %v6440_v20 = vld [vmem:[#allocation36_spill] sm:$0xff] }
 0x2c6   : > { %v1540_v12 = vmul.f32 %v1476_v50, %v6426_v18  ;;  %v2296_v42 = vand.u32 2147483648, %v4797_v37  ;;  %v1189_v23 = vadd.f32 -0.017088126, %v1125_v9  ;;  %vm2300_vm9 = vcmp.eq.f32.partialorder %v4802_v19, inf }
 0x2c7   : > { %2824 = vadd.xlane.f32.xlu0 %v2823_v44  ;;  %v1603_v11 = vadd.f32 0.08897899, %v1539_v62  ;;  %v1190_v22 = vadd.f32 -0.017088126, %v1126_v35  ;;  %3421 = vrsqrt.f32 %v4828_v26  ;;  %vm2302_vm10 = vcmp.eq.f32.partialorder %v4802_v19, 0.0 }
 0x2c8   : > { %v3416_v10 = vpop.eup %3415  ;;  %v1604_v46 = vadd.f32 0.08897899, %v1540_v12  ;;  %v1253_v33 = vmul.f32 %v1189_v23, %v6437_v53  ;;  %v2303_v24 = vand.u32 2147483648, %v4802_v19  ;;  %v1029_v44 = vmul.f32 -0.0012624911, %v6440_v20 }
 0x2c9   : > { %v1667_v50 = vmul.f32 %v1603_v11, %v6425_v54  ;;  %v2292_v32 = vmul.f32 %v3416_v10, %v4797_v37  ;;  %v3418_v14 = vpop.eup %3417  ;;  %v1254_v63 = vmul.f32 %v1190_v22, %v6438_v8  ;;  %v1925_v35 = vsub.f32 1.0, %v6440_v20  ;;  %v6441_v11 = vld [vmem:[#allocation10_spill] sm:$0xff] }
 0x2ca   : > { %v1668_v29 = vmul.f32 %v1604_v46, %v6426_v18  ;;  %v2299_v9 = vmul.f32 %v3418_v14, %v4802_v19  ;;  %v1317_v12 = vadd.f32 0.03089188, %v1253_v33  ;;  %v6442_v10 = vclamps-f32 %v6441_v11, 1.0 }
 0x2cb   : > { %v1731_v62 = vadd.f32 -0.2145988, %v1667_v50  ;;  %v2294_v46 = vsel %vm2293_vm7, %v4797_v37, %v2292_v32  ;;  %v1318_v22 = vadd.f32 0.03089188, %v1254_v63  ;;  %v1030_v43 = vmul.f32 -0.0012624911, %v6445_v3 }
 0x2cc   : > { %vm4850_vm11 = vcmp.lt.f32.partialorder %v6442_v10, 0.0  ;;  %v1732_v23 = vadd.f32 -0.2145988, %v1668_v29  ;;  %v6446_v50 = vld [vmem:[#allocation12_spill] sm:$0xff]  ;;  %v2301_v11 = vsel %vm2300_vm9, %v4802_v19, %v2299_v9  ;;  %v1381_v29 = vmul.f32 %v1317_v12, %v6437_v53 }
 0x2cd   : > { %v6447_v34 = vclamps-f32 %v6446_v50, 1.0  ;;  %v1795_v14 = vmul.f32 %v1731_v62, %v6425_v54  ;;  %vm2083_vm13 = vcmp.eq.f32.partialorder %v4824_v1, inf  ;;  %v1093_v32 = vadd.f32 0.00667009, %v1029_v44 }
 0x2ce   : > { %v1796_v63 = vmul.f32 %v1732_v23, %v6426_v18  ;;  %v1382_v10 = vmul.f32 %v1318_v22, %v6438_v8  ;;  %v1094_v50 = vadd.f32 0.00667009, %v1030_v43  ;;  %v2297_v54 = vsel %vm2295_vm8, %v2296_v42, %v2294_v46  ;;  %v3420_v9 = vpop.eup %3419 }
 0x2cf   : > { %vm4860_vm12 = vcmp.lt.f32.partialorder %v6447_v34, 0.0  ;;  %v2086_v34 = vand.u32 2147483648, %v4824_v1  ;;  %v1859_v51 = vadd.f32 1.5707963, %v1795_v14  ;;  %v1445_v62 = vadd.f32 -0.050174303, %v1381_v29 }
 0x2d0   : > { %v1157_v15 = vmul.f32 %v1093_v32, %v6440_v20  ;;  %v1860_v61 = vadd.f32 1.5707963, %v1796_v63  ;;  %v2304_v12 = vsel %vm2302_vm10, %v2303_v24, %v2301_v11  ;;  %v1446_v44 = vadd.f32 -0.050174303, %v1382_v10 }
 0x2d1   : > { %v1158_v18 = vmul.f32 %v1094_v50, %v6445_v3  ;;  %v2499_v23 = vmul.f32 %v2297_v54, %v1859_v51  ;;  %v1509_v22 = vmul.f32 %v1445_v62, %v6437_v53  ;;  %vm2085_vm14 = vcmp.eq.f32.partialorder %v4824_v1, 0.0  ;;  %v3422_v42 = vpop.eup %3421 }
 0x2d2   : > { %v1221_v43 = vadd.f32 -0.017088126, %v1157_v15  ;;  %v1926_v37 = vsub.f32 1.0, %v6445_v3  ;;  %v2500_v46 = vmul.f32 %v2304_v12, %v1860_v61  ;;  %v1510_v14 = vmul.f32 %v1446_v44, %v6438_v8 }
 0x2d3   : > { %v2082_v29 = vmul.f32 %v3420_v9, %v4824_v1  ;;  %v1222_v32 = vadd.f32 -0.017088126, %v1158_v18  ;;  %v2627_v19 = vsub.f32 3.1415927, %v2499_v23  ;;  %v1573_v24 = vadd.f32 0.08897899, %v1509_v22 }
 0x2d4   : > { %vm2090_vm15 = vcmp.eq.f32.partialorder %v4828_v26, inf  ;;  %v4885_v11 = vmax.f32 %v1925_v35, 0.0  ;;  %v2628_v51 = vsub.f32 3.1415927, %v2500_v46  ;;  %v1574_v63 = vadd.f32 0.08897899, %v1510_v14 }
 0x2d5   : > { %v2089_v10 = vmul.f32 %v3422_v42, %v4828_v26  ;;  %v1285_v15 = vmul.f32 %v1221_v43, %v6440_v20  ;;  %v2691_v61 = vsel %vm4850_vm11, %v2627_v19, %v2499_v23  ;;  %v1637_v50 = vmul.f32 %v1573_v24, %v6437_v53  ;;  %v6450_v43 = vld [vmem:[#allocation13_spill] sm:$0xff] }
 0x2d6   : > { %v1286_v54 = vmul.f32 %v1222_v32, %v6445_v3  ;;  %v4893_v62 = vmax.f32 %v1926_v37, 0.0  ;;  %v2692_v9 = vsel %vm4860_vm12, %v2628_v51, %v2500_v46  ;;  %v2787_v35 = vmul.f32 %v2691_v61, %v2691_v61 }
 0x2d7   : > { %v1638_v12 = vmul.f32 %v1574_v63, %v6438_v8  ;;  %v2084_v44 = vsel %vm2083_vm13, %v4824_v1, %v2082_v29  ;;  %v2788_v18 = vmul.f32 %v2692_v9, %v2692_v9  ;;  %v1701_v22 = vadd.f32 -0.2145988, %v1637_v50  ;;  %v6454_v29 = vld [vmem:[#allocation15_spill] sm:$0xff] }
 0x2d8   : > { %v1349_v5 = vadd.f32 0.03089188, %v1285_v15  ;;  %v1350_v23 = vadd.f32 0.03089188, %v1286_v54  ;;  %v6451_v42 = vclamps-f32 %v6450_v43, 1.0  ;;  %v2091_v33 = vsel %vm2090_vm15, %v4828_v26, %v2089_v10 }
 0x2d9   : > { %v1702_v37 = vadd.f32 -0.2145988, %v1638_v12  ;;  %v2093_v46 = vand.u32 2147483648, %v4828_v26  ;;  %3423 = vrsqrt.f32 %v4885_v11  ;;  %v6455_v32 = vclamps-f32 %v6454_v29, 1.0 }
 0x2da   : > { %vm4903_vm0 = vcmp.lt.f32.partialorder %v6451_v42, 0.0  ;;  %v2871_v24 = vadd.f32 %v2788_v18, %v2787_v35  ;;  %v1765_v51 = vmul.f32 %v1701_v22, %v6437_v53  ;;  %v1413_v63 = vmul.f32 %v1349_v5, %v6440_v20  ;;  %v6458_v18 = vld [vmem:[#allocation39_spill] sm:$0xff] }
 0x2db   : > { %vm4914_vm1 = vcmp.lt.f32.partialorder %v6455_v32, 0.0  ;;  %v1414_v15 = vmul.f32 %v1350_v23, %v6445_v3  ;;  %v1766_v61 = vmul.f32 %v1702_v37, %v6438_v8  ;;  %v2087_v10 = vsel %vm2085_vm14, %v2086_v34, %v2084_v44 }
 0x2dc   : > { %vm2092_vm2 = vcmp.eq.f32.partialorder %v4828_v26, 0.0  ;;  %3425 = vrsqrt.f32 %v4893_v62  ;;  %2872 = vadd.xlane.f32.xlu0 %v2871_v24  ;;  %v1829_v50 = vadd.f32 1.5707963, %v1765_v51  ;;  %v1477_v9 = vadd.f32 -0.050174303, %v1413_v63  ;;  %v6459_v26 = vld [vmem:[#allocation41_spill] sm:$0xff] }
 0x2dd   : > { %v2094_v54 = vsel %vm2092_vm2, %v2093_v46, %v2091_v33  ;;  %v1478_v35 = vadd.f32 -0.050174303, %v1414_v15  ;;  %v1830_v12 = vadd.f32 1.5707963, %v1766_v61  ;;  %vm2307_vm3 = vcmp.eq.f32.partialorder %v4885_v11, inf }
 0x2de   : > { %v2310_v53 = vand.u32 2147483648, %v4885_v11  ;;  %v999_v22 = vmul.f32 -0.0012624911, %v6458_v18  ;;  %v2469_v8 = vmul.f32 %v2087_v10, %v1829_v50  ;;  %v1541_v1 = vmul.f32 %v1477_v9, %v6440_v20 }
 0x2df   : > { %v1542_v34 = vmul.f32 %v1478_v35, %v6445_v3  ;;  %v1000_v44 = vmul.f32 -0.0012624911, %v6459_v26  ;;  %v2470_v5 = vmul.f32 %v2094_v54, %v1830_v12  ;;  %vm2309_vm4 = vcmp.eq.f32.partialorder %v4885_v11, 0.0 }
 0x2e0   : > { %v1063_v23 = vadd.f32 0.00667009, %v999_v22  ;;  %v1895_v43 = vsub.f32 1.0, %v6458_v18  ;;  %v1896_v42 = vsub.f32 1.0, %v6459_v26  ;;  %v2597_v37 = vsub.f32 3.1415927, %v2469_v8 }
 0x2e1   : > { %v1605_v33 = vadd.f32 0.08897899, %v1541_v1  ;;  %v1606_v46 = vadd.f32 0.08897899, %v1542_v34  ;;  %v2598_v29 = vsub.f32 3.1415927, %v2470_v5 }
 0x2e2   : > { %v1064_v32 = vadd.f32 0.00667009, %v1000_v44  ;;  %v1127_v24 = vmul.f32 %v1063_v23, %v6458_v18  ;;  %v4936_v51 = vmax.f32 %v1895_v43, 0.0  ;;  %v2661_v63 = vsel %vm4903_vm0, %v2597_v37, %v2469_v8  ;;  %v6460_v34 = vld [vmem:[#allocation14_spill] sm:$0xff]  ;;  %v6464_v37 = vld [vmem:[#allocation16_spill] sm:$0xff] }
 0x2e3   : > { %v1669_v15 = vmul.f32 %v1605_v33, %v6440_v20  ;;  %v1670_v61 = vmul.f32 %v1606_v46, %v6445_v3  ;;  %vm2314_vm5 = vcmp.eq.f32.partialorder %v4893_v62, inf  ;;  %v3424_v10 = vpop.eup %3423  ;;  %v2662_v50 = vsel %vm4914_vm1, %v2598_v29, %v2470_v5 }
 0x2e4   : > { %v2757_v54 = vmul.f32 %v2661_v63, %v2661_v63  ;;  %v1128_v9 = vmul.f32 %v1064_v32, %v6459_v26  ;;  %v1191_v35 = vadd.f32 -0.017088126, %v1127_v24  ;;  %v2758_v12 = vmul.f32 %v2662_v50, %v2662_v50 }
 0x2e5   : > { %v1733_v22 = vadd.f32 -0.2145988, %v1669_v15  ;;  %v1734_v1 = vadd.f32 -0.2145988, %v1670_v61  ;;  %v2306_v14 = vmul.f32 %v3424_v10, %v4885_v11  ;;  %v6461_v44 = vclamps-f32 %v6460_v34, 1.0 }
 0x2e6   : > { %v3426_v8 = vpop.eup %3425  ;;  %v1192_v43 = vadd.f32 -0.017088126, %v1128_v9  ;;  %v1255_v19 = vmul.f32 %v1191_v35, %v6458_v18  ;;  %v4954_v5 = vmax.f32 %v1896_v42, 0.0  ;;  %3427 = vrsqrt.f32 %v4936_v51 }
 0x2e7   : > { %vm4949_vm6 = vcmp.lt.f32.partialorder %v6461_v44, 0.0  ;;  %v6465_v33 = vclamps-f32 %v6464_v37, 1.0  ;;  %v2826_v29 = vadd.f32 %v2758_v12, %v2757_v54  ;;  %v1797_v32 = vmul.f32 %v1733_v22, %v6440_v20  ;;  %v6471_v37 = vld [vmem:[#allocation40_spill] sm:$0xff] }
 0x2e8   : > { %v1798_v24 = vmul.f32 %v1734_v1, %v6445_v3  ;;  %v2308_v63 = vsel %vm2307_vm3, %v4885_v11, %v2306_v14  ;;  %v2313_v42 = vmul.f32 %v3426_v8, %v4893_v62  ;;  %vm2316_vm8 = vcmp.eq.f32.partialorder %v4893_v62, 0.0 }
 0x2e9   : > { %vm4959_vm7 = vcmp.lt.f32.partialorder %v6465_v33, 0.0  ;;  %v1256_v15 = vmul.f32 %v1192_v43, %v6459_v26  ;;  %v1319_v61 = vadd.f32 0.03089188, %v1255_v19  ;;  %2827 = vadd.xlane.f32.xlu1 %v2826_v29  ;;  %v1861_v10 = vadd.f32 1.5707963, %v1797_v32  ;;  %v6472_v29 = vld [vmem:[#allocation42_spill] sm:$0xff] }
 0x2ea   : > { %v1862_v50 = vadd.f32 1.5707963, %v1798_v24  ;;  %v2311_v54 = vsel %vm2309_vm4, %v2310_v53, %v2308_v63  ;;  %v2317_v20 = vand.u32 2147483648, %v4893_v62  ;;  %v2315_v3 = vsel %vm2314_vm5, %v4893_v62, %v2313_v42 }
 0x2eb   : > { %v1320_v9 = vadd.f32 0.03089188, %v1256_v15  ;;  %v1383_v35 = vmul.f32 %v1319_v61, %v6458_v18  ;;  %3429 = vrsqrt.f32 %v4954_v5  ;;  %v6468_v12 = vclamps-f32 %v4247_v30, 1.0 }
 0x2ec   : > { %v6469_v1 = vclamps-f32 %v4257_v58, 1.0  ;;  %v2318_v11 = vsel %vm2316_vm8, %v2317_v20, %v2315_v3  ;;  %v2501_v53 = vmul.f32 %v2311_v54, %v1861_v10  ;;  %v6470_v8 = vclamps-f32 %v6439_v38, 1.0 }
 0x2ed   : > { %v4981_v22 = vand.u32 2147483647, %v6468_v12  ;;  %v2502_v62 = vmul.f32 %v2318_v11, %v1862_v50  ;;  %v1384_v44 = vmul.f32 %v1320_v9, %v6459_v26  ;;  %v1447_v43 = vadd.f32 -0.050174303, %v1383_v35 }
 0x2ee   : > { %v4985_v14 = vand.u32 2147483647, %v6469_v1  ;;  %v4989_v34 = vand.u32 2147483647, %v6470_v8  ;;  %v2629_v19 = vsub.f32 3.1415927, %v2501_v53 }
 0x2ef   : > { %v1031_v33 = vmul.f32 -0.0012624911, %v6471_v37  ;;  %v1032_v32 = vmul.f32 -0.0012624911, %v6472_v29  ;;  %v2630_v24 = vsub.f32 3.1415927, %v2502_v62  ;;  %v1511_v42 = vmul.f32 %v1447_v43, %v6458_v18 }
 0x2f0   : > { %v1448_v63 = vadd.f32 -0.050174303, %v1384_v44  ;;  %v1927_v15 = vsub.f32 1.0, %v6471_v37  ;;  %v2693_v61 = vsel %vm4949_vm6, %v2629_v19, %v2501_v53  ;;  %v1928_v50 = vsub.f32 1.0, %v6472_v29  ;;  %v3428_v20 = vpop.eup %3427 }
 0x2f1   : > { %v1095_v10 = vadd.f32 0.00667009, %v1031_v33  ;;  %v1096_v54 = vadd.f32 0.00667009, %v1032_v32  ;;  %v2694_v3 = vsel %vm4959_vm7, %v2630_v24, %v2502_v62  ;;  %v2789_v9 = vmul.f32 %v2693_v61, %v2693_v61  ;;  %v6473_v61 = vld [vmem:[#allocation17_spill] sm:$0xff] }
 0x2f2   : > { %v1512_v35 = vmul.f32 %v1448_v63, %v6459_v26  ;;  %v1575_v12 = vadd.f32 0.08897899, %v1511_v42  ;;  %v2790_v11 = vmul.f32 %v2694_v3, %v2694_v3  ;;  %v2096_v43 = vmul.f32 %v3428_v20, %v4936_v51 }
 0x2f3   : > { %v1159_v8 = vmul.f32 %v1095_v10, %v6471_v37  ;;  %v1160_v23 = vmul.f32 %v1096_v54, %v6472_v29  ;;  %v5007_v19 = vmax.f32 %v1927_v15, 0.0  ;;  %v5009_v32 = vmax.f32 %v1928_v50, 0.0 }
 0x2f4   : > { %v1576_v53 = vadd.f32 0.08897899, %v1512_v35  ;;  %v1639_v44 = vmul.f32 %v1575_v12, %v6458_v18  ;;  %v2874_v46 = vadd.f32 %v2790_v11, %v2789_v9  ;;  %vm2097_vm9 = vcmp.eq.f32.partialorder %v4936_v51, inf  ;;  %v6477_v11 = vld [vmem:[#allocation19_spill] sm:$0xff] }
 0x2f5   : > { %v1223_v62 = vadd.f32 -0.017088126, %v1159_v8  ;;  %v1224_v33 = vadd.f32 -0.017088126, %v1160_v23  ;;  %v3430_v24 = vpop.eup %3429  ;;  %3431 = vrsqrt.f32 %v5007_v19  ;;  %v6474_v10 = vclamps-f32 %v6473_v61, 1.0 }
 0x2f6   : > { %v1640_v63 = vmul.f32 %v1576_v53, %v6459_v26  ;;  %v1703_v42 = vadd.f32 -0.2145988, %v1639_v44  ;;  %2875 = vadd.xlane.f32.xlu1 %v2874_v46  ;;  %vm2099_vm11 = vcmp.eq.f32.partialorder %v4936_v51, 0.0  ;;  %v2103_v15 = vmul.f32 %v3430_v24, %v4954_v5 }
 0x2f7   : > { %vm5016_vm10 = vcmp.lt.f32.partialorder %v6474_v10, 0.0  ;;  %v1287_v50 = vmul.f32 %v1223_v62, %v6471_v37  ;;  %v1288_v20 = vmul.f32 %v1224_v33, %v6472_v29  ;;  %v2098_v35 = vsel %vm2097_vm9, %v4936_v51, %v2096_v43  ;;  %v6481_v10 = vld [vmem:[#allocation46_spill] sm:$0xff] }
 0x2f8   : > { %v1704_v3 = vadd.f32 -0.2145988, %v1640_v63  ;;  %v1767_v9 = vmul.f32 %v1703_v42, %v6458_v18  ;;  %v2100_v12 = vand.u32 2147483648, %v4936_v51  ;;  %v6478_v8 = vclamps-f32 %v6477_v11, 1.0 }
 0x2f9   : > { %vm2104_vm13 = vcmp.eq.f32.partialorder %v4954_v5, inf  ;;  %v1351_v53 = vadd.f32 0.03089188, %v1287_v50  ;;  %v1352_v44 = vadd.f32 0.03089188, %v1288_v20  ;;  %3433 = vrsqrt.f32 %v5009_v32  ;;  %v6482_v20 = vld [vmem:[#allocation49_spill] sm:$0xff] }
 0x2fa   : > { %vm5029_vm12 = vcmp.lt.f32.partialorder %v6478_v8, 0.0  ;;  %v1768_v46 = vmul.f32 %v1704_v3, %v6459_v26  ;;  %v1831_v62 = vadd.f32 1.5707963, %v1767_v9  ;;  %v2105_v18 = vsel %vm2104_vm13, %v4954_v5, %v2103_v15 }
 0x2fb   : > { %vm2106_vm14 = vcmp.eq.f32.partialorder %v4954_v5, 0.0  ;;  %v2101_v43 = vsel %vm2099_vm11, %v2100_v12, %v2098_v35  ;;  %v2107_v33 = vand.u32 2147483648, %v4954_v5  ;;  %v1415_v24 = vmul.f32 %v1351_v53, %v6471_v37 }
 0x2fc   : > { %v1416_v63 = vmul.f32 %v1352_v44, %v6472_v29  ;;  %v1832_v42 = vadd.f32 1.5707963, %v1768_v46  ;;  %v2471_v61 = vmul.f32 %v2101_v43, %v1831_v62  ;;  %v1001_v50 = vmul.f32 -0.0012624911, %v6481_v10 }
 0x2fd   : > { %v1002_v26 = vmul.f32 -0.0012624911, %v6482_v20  ;;  %v2108_v3 = vsel %vm2106_vm14, %v2107_v33, %v2105_v18  ;;  %v1479_v9 = vadd.f32 -0.050174303, %v1415_v24  ;;  %v1897_v11 = vsub.f32 1.0, %v6481_v10 }
 0x2fe   : > { %v1480_v15 = vadd.f32 -0.050174303, %v1416_v63  ;;  %v2472_v8 = vmul.f32 %v2108_v3, %v1832_v42  ;;  %v2599_v51 = vsub.f32 3.1415927, %v2471_v61  ;;  %v1065_v35 = vadd.f32 0.00667009, %v1001_v50 }
 0x2ff   : > { %v1066_v12 = vadd.f32 0.00667009, %v1002_v26  ;;  %v1543_v5 = vmul.f32 %v1479_v9, %v6471_v37  ;;  %v1898_v44 = vsub.f32 1.0, %v6482_v20  ;;  %v5049_v46 = vmax.f32 %v1897_v11, 0.0  ;;  %v3432_v62 = vpop.eup %3431 }
 0x300   : > { %v1544_v53 = vmul.f32 %v1480_v15, %v6472_v29  ;;  %v2600_v43 = vsub.f32 3.1415927, %v2472_v8  ;;  %v2663_v18 = vsel %vm5016_vm10, %v2599_v51, %v2471_v61  ;;  %v1129_v33 = vmul.f32 %v1065_v35, %v6481_v10 }
 0x301   : > { %v1130_v24 = vmul.f32 %v1066_v12, %v6482_v20  ;;  %v2759_v63 = vmul.f32 %v2663_v18, %v2663_v18  ;;  %v1607_v42 = vadd.f32 0.08897899, %v1543_v5  ;;  %v2320_v26 = vmul.f32 %v3432_v62, %v5007_v19  ;;  %v6483_v62 = vld [vmem:[#allocation18_spill] sm:$0xff] }
 0x302   : > { %v1608_v50 = vadd.f32 0.08897899, %v1544_v53  ;;  %v2664_v3 = vsel %vm5029_vm12, %v2600_v43, %v2472_v8  ;;  %v1193_v9 = vadd.f32 -0.017088126, %v1129_v33  ;;  %3435 = vrsqrt.f32 %v5049_v46  ;;  %v6487_v33 = vld [vmem:[#allocation20_spill] sm:$0xff] }
 0x303   : > { %v1194_v15 = vadd.f32 -0.017088126, %v1130_v24  ;;  %v3434_v11 = vpop.eup %3433  ;;  %v2760_v1 = vmul.f32 %v2664_v3, %v2664_v3  ;;  %v1671_v54 = vmul.f32 %v1607_v42, %v6471_v37  ;;  %vm2321_vm15 = vcmp.eq.f32.partialorder %v5007_v19, inf }
 0x304   : > { %v1672_v61 = vmul.f32 %v1608_v50, %v6472_v29  ;;  %v2327_v51 = vmul.f32 %v3434_v11, %v5009_v32  ;;  %v1257_v35 = vmul.f32 %v1193_v9, %v6481_v10  ;;  %v5065_v23 = vmax.f32 %v1898_v44, 0.0 }
 0x305   : > { %v1258_v12 = vmul.f32 %v1194_v15, %v6482_v20  ;;  %v2829_v8 = vadd.f32 %v2760_v1, %v2759_v63  ;;  %v1735_v5 = vadd.f32 -0.2145988, %v1671_v54  ;;  %vm2323_vm0 = vcmp.eq.f32.partialorder %v5007_v19, 0.0 }
 0x306   : > { %v1736_v53 = vadd.f32 -0.2145988, %v1672_v61  ;;  %v6484_v43 = vclamps-f32 %v6483_v62, 1.0  ;;  %v6488_v24 = vclamps-f32 %v6487_v33, 1.0  ;;  %v2322_v44 = vsel %vm2321_vm15, %v5007_v19, %v2320_v26 }
 0x307   : > { %vm2328_vm3 = vcmp.eq.f32.partialorder %v5009_v32, inf  ;;  %v1321_v1 = vadd.f32 0.03089188, %v1257_v35  ;;  %v1322_v63 = vadd.f32 0.03089188, %v1258_v12  ;;  %2830 = vadd.xlane.f32.xlu0 %v2829_v8  ;;  %v1799_v50 = vmul.f32 %v1735_v5, %v6471_v37  ;;  %v6491_v5 = vld [vmem:[#allocation48_spill] sm:$0xff] }
 0x308   : > { %vm5070_vm1 = vcmp.lt.f32.partialorder %v6484_v43, 0.0  ;;  %vm5076_vm2 = vcmp.lt.f32.partialorder %v6488_v24, 0.0  ;;  %v1800_v3 = vmul.f32 %v1736_v53, %v6472_v29  ;;  %v2324_v9 = vand.u32 2147483648, %v5007_v19  ;;  %v6492_v43 = vld [vmem:[#allocation56_spill] sm:$0xff] }
 0x309   : > { %v2329_v15 = vsel %vm2328_vm3, %v5009_v32, %v2327_v51  ;;  %v2331_v11 = vand.u32 2147483648, %v5009_v32  ;;  %v1385_v54 = vmul.f32 %v1321_v1, %v6481_v10  ;;  %v1386_v61 = vmul.f32 %v1322_v63, %v6482_v20 }
 0x30a   : > { %3437 = vrsqrt.f32 %v5065_v23  ;;  %v1863_v26 = vadd.f32 1.5707963, %v1799_v50  ;;  %v1864_v35 = vadd.f32 1.5707963, %v1800_v3  ;;  %v2325_v12 = vsel %vm2323_vm0, %v2324_v9, %v2322_v44 }
 0x30b   : > { %vm2330_vm4 = vcmp.eq.f32.partialorder %v5009_v32, 0.0  ;;  %v1449_v29 = vadd.f32 -0.050174303, %v1385_v54  ;;  %v1450_v8 = vadd.f32 -0.050174303, %v1386_v61  ;;  %vm2111_vm5 = vcmp.eq.f32.partialorder %v5049_v46, inf }
 0x30c   : > { %v2332_v37 = vsel %vm2330_vm4, %v2331_v11, %v2329_v15  ;;  %v1033_v51 = vmul.f32 -0.0012624911, %v6491_v5  ;;  %v2503_v53 = vmul.f32 %v2325_v12, %v1863_v26  ;;  %v1034_v33 = vmul.f32 -0.0012624911, %v6492_v43  ;;  %v3436_v1 = vpop.eup %3435 }
 0x30d   : > { %v2504_v62 = vmul.f32 %v2332_v37, %v1864_v35  ;;  %v1929_v24 = vsub.f32 1.0, %v6491_v5  ;;  %v1513_v63 = vmul.f32 %v1449_v29, %v6481_v10  ;;  %v1514_v19 = vmul.f32 %v1450_v8, %v6482_v20 }
 0x30e   : > { %v1097_v44 = vadd.f32 0.00667009, %v1033_v51  ;;  %v1930_v32 = vsub.f32 1.0, %v6492_v43  ;;  %v2631_v50 = vsub.f32 3.1415927, %v2503_v53  ;;  %v2110_v12 = vmul.f32 %v3436_v1, %v5049_v46  ;;  %v6493_v1 = vld [vmem:[#allocation21_spill] sm:$0xff] }
 0x30f   : > { %v2632_v3 = vsub.f32 3.1415927, %v2504_v62  ;;  %v1098_v9 = vadd.f32 0.00667009, %v1034_v33  ;;  %v1577_v15 = vadd.f32 0.08897899, %v1513_v63 }
 0x310   : > { %v1578_v11 = vadd.f32 0.08897899, %v1514_v19  ;;  %v1161_v54 = vmul.f32 %v1097_v44, %v6491_v5  ;;  %v5101_v61 = vmax.f32 %v1929_v24, 0.0  ;;  %v2695_v26 = vsel %vm5070_vm1, %v2631_v50, %v2503_v53 }
 0x311   : > { %v2696_v35 = vsel %vm5076_vm2, %v2632_v3, %v2504_v62  ;;  %v1162_v37 = vmul.f32 %v1098_v9, %v6492_v43  ;;  %v2791_v29 = vmul.f32 %v2695_v26, %v2695_v26  ;;  %v1641_v51 = vmul.f32 %v1577_v15, %v6481_v10  ;;  %v6497_v9 = vld [vmem:[#allocation23_spill] sm:$0xff] }
 0x312   : > { %v2792_v8 = vmul.f32 %v2696_v35, %v2696_v35  ;;  %v1642_v33 = vmul.f32 %v1578_v11, %v6482_v20  ;;  %v2114_v63 = vand.u32 2147483648, %v5049_v46  ;;  %v1225_v24 = vadd.f32 -0.017088126, %v1161_v54 }
 0x313   : > { %v1226_v19 = vadd.f32 -0.017088126, %v1162_v37  ;;  %v5112_v44 = vmax.f32 %v1930_v32, 0.0  ;;  %v1705_v42 = vadd.f32 -0.2145988, %v1641_v51  ;;  %3439 = vrsqrt.f32 %v5101_v61 }
 0x314   : > { %v3438_v18 = vpop.eup %3437  ;;  %v2877_v53 = vadd.f32 %v2792_v8, %v2791_v29  ;;  %v1706_v62 = vadd.f32 -0.2145988, %v1642_v33  ;;  %v6494_v50 = vclamps-f32 %v6493_v1, 1.0  ;;  %v6498_v15 = vclamps-f32 %v6497_v9, 1.0 }
 0x315   : > { %v2117_v32 = vmul.f32 %v3438_v18, %v5065_v23  ;;  %vm2118_vm8 = vcmp.eq.f32.partialorder %v5065_v23, inf  ;;  %v1289_v54 = vmul.f32 %v1225_v24, %v6491_v5  ;;  %v1290_v26 = vmul.f32 %v1226_v19, %v6492_v43 }
 0x316   : > { %vm5117_vm6 = vcmp.lt.f32.partialorder %v6494_v50, 0.0  ;;  %vm5123_vm7 = vcmp.lt.f32.partialorder %v6498_v15, 0.0  ;;  %2878 = vadd.xlane.f32.xlu0 %v2877_v53  ;;  %v1769_v35 = vmul.f32 %v1705_v42, %v6481_v10  ;;  %v1770_v37 = vmul.f32 %v1706_v62, %v6482_v20  ;;  %v6501_v50 = vld [vmem:[#allocation62_spill] sm:$0xff] }
 0x317   : > { %v2112_v29 = vsel %vm2111_vm5, %v5049_v46, %v2110_v12  ;;  %v2121_v8 = vand.u32 2147483648, %v5065_v23  ;;  %v2119_v51 = vsel %vm2118_vm8, %v5065_v23, %v2117_v32  ;;  %v1353_v33 = vadd.f32 0.03089188, %v1289_v54 }
 0x318   : > { %v1354_v18 = vadd.f32 0.03089188, %v1290_v26  ;;  %3441 = vrsqrt.f32 %v5112_v44  ;;  %v1833_v24 = vadd.f32 1.5707963, %v1769_v35  ;;  %v1834_v1 = vadd.f32 1.5707963, %v1770_v37 }
 0x319   : > { %vm2113_vm9 = vcmp.eq.f32.partialorder %v5049_v46, 0.0  ;;  %vm2120_vm10 = vcmp.eq.f32.partialorder %v5065_v23, 0.0  ;;  %v1417_v19 = vmul.f32 %v1353_v33, %v6491_v5  ;;  %v1003_v62 = vmul.f32 -0.0012624911, %v4265_v2 }
 0x31a   : > { %v2115_v10 = vsel %vm2113_vm9, %v2114_v63, %v2112_v29  ;;  %v2122_v20 = vsel %vm2120_vm10, %v2121_v8, %v2119_v51  ;;  %v1418_v12 = vmul.f32 %v1354_v18, %v6492_v43  ;;  %v1004_v9 = vmul.f32 -0.0012624911, %v6501_v50 }
 0x31b   : > { %v2473_v53 = vmul.f32 %v2115_v10, %v1833_v24  ;;  %v2474_v42 = vmul.f32 %v2122_v20, %v1834_v1  ;;  %v1481_v15 = vadd.f32 -0.050174303, %v1417_v19  ;;  %v1899_v54 = vsub.f32 1.0, %v4265_v2 }
 0x31c   : > { %v1482_v32 = vadd.f32 -0.050174303, %v1418_v12  ;;  %v1900_v46 = vsub.f32 1.0, %v6501_v50  ;;  %v1067_v63 = vadd.f32 0.00667009, %v1003_v62  ;;  %vm2335_vm11 = vcmp.eq.f32.partialorder %v5101_v61, inf }
 0x31d   : > { %v2601_v26 = vsub.f32 3.1415927, %v2473_v53  ;;  %v2602_v23 = vsub.f32 3.1415927, %v2474_v42  ;;  %v1545_v35 = vmul.f32 %v1481_v15, %v6491_v5  ;;  %v1068_v29 = vadd.f32 0.00667009, %v1004_v9  ;;  %v3440_v51 = vpop.eup %3439 }
 0x31e   : > { %v1546_v37 = vmul.f32 %v1482_v32, %v6492_v43  ;;  %v5149_v8 = vmax.f32 %v1899_v54, 0.0  ;;  %v1131_v24 = vmul.f32 %v1067_v63, %v4265_v2  ;;  %v2334_v12 = vmul.f32 %v3440_v51, %v5101_v61  ;;  %v6506_v51 = vld [vmem:[#allocation24_spill] sm:$0xff] }
 0x31f   : > { %v2665_v33 = vsel %vm5117_vm6, %v2601_v26, %v2473_v53  ;;  %v2666_v18 = vsel %vm5123_vm7, %v2602_v23, %v2474_v42  ;;  %v1609_v20 = vadd.f32 0.08897899, %v1545_v35  ;;  %v1132_v62 = vmul.f32 %v1068_v29, %v6501_v50 }
 0x320   : > { %v2761_v1 = vmul.f32 %v2665_v33, %v2665_v33  ;;  %v2762_v10 = vmul.f32 %v2666_v18, %v2666_v18  ;;  %v1610_v19 = vadd.f32 0.08897899, %v1546_v37  ;;  %v1195_v9 = vadd.f32 -0.017088126, %v1131_v24  ;;  %v6502_v37 = vld [vmem:[#allocation22_spill] sm:$0xff] }
 0x321   : > { %3443 = vrsqrt.f32 %v5149_v8  ;;  %v1673_v11 = vmul.f32 %v1609_v20, %v6491_v5  ;;  %v5162_v15 = vmax.f32 %v1900_v46, 0.0  ;;  %vm2337_vm12 = vcmp.eq.f32.partialorder %v5101_v61, 0.0 }
 0x322   : > { %v3442_v3 = vpop.eup %3441  ;;  %v2832_v53 = vadd.f32 %v2762_v10, %v2761_v1  ;;  %v1674_v42 = vmul.f32 %v1610_v19, %v6492_v43  ;;  %v1196_v54 = vadd.f32 -0.017088126, %v1132_v62  ;;  %v1259_v26 = vmul.f32 %v1195_v9, %v4265_v2 }
 0x323   : > { %v2341_v32 = vmul.f32 %v3442_v3, %v5112_v44  ;;  %v1737_v23 = vadd.f32 -0.2145988, %v1673_v11  ;;  %v2336_v35 = vsel %vm2335_vm11, %v5101_v61, %v2334_v12  ;;  %vm2342_vm13 = vcmp.eq.f32.partialorder %v5112_v44, inf }
 0x324   : > { %2833 = vadd.xlane.f32.xlu1 %v2832_v53  ;;  %v1738_v63 = vadd.f32 -0.2145988, %v1674_v42  ;;  %v6503_v29 = vclamps-f32 %v6502_v37, 1.0  ;;  %v6507_v33 = vclamps-f32 %v6506_v51, 1.0  ;;  %v2338_v24 = vand.u32 2147483648, %v5101_v61 }
 0x325   : > { %v2343_v1 = vsel %vm2342_vm13, %v5112_v44, %v2341_v32  ;;  %v1260_v10 = vmul.f32 %v1196_v54, %v6501_v50  ;;  %v1323_v20 = vadd.f32 0.03089188, %v1259_v26  ;;  %v1801_v19 = vmul.f32 %v1737_v23, %v6491_v5  ;;  %v6510_v54 = vld [vmem:[#allocation58_spill] sm:$0xff] }
 0x326   : > { %vm5173_vm14 = vcmp.lt.f32.partialorder %v6503_v29, 0.0  ;;  %vm5179_vm15 = vcmp.lt.f32.partialorder %v6507_v33, 0.0  ;;  %v1802_v12 = vmul.f32 %v1738_v63, %v6492_v43  ;;  %v2345_v62 = vand.u32 2147483648, %v5112_v44  ;;  %v6511_v63 = vld [vmem:[#allocation63_spill] sm:$0xff] }
 0x327   : > { %3445 = vrsqrt.f32 %v5162_v15  ;;  %v2339_v9 = vsel %vm2337_vm12, %v2338_v24, %v2336_v35  ;;  %vm2344_vm0 = vcmp.eq.f32.partialorder %v5112_v44, 0.0  ;;  %v1324_v3 = vadd.f32 0.03089188, %v1260_v10 }
 0x328   : > { %v1387_v53 = vmul.f32 %v1323_v20, %v4265_v2  ;;  %v1865_v11 = vadd.f32 1.5707963, %v1801_v19  ;;  %v1866_v42 = vadd.f32 1.5707963, %v1802_v12  ;;  %v2346_v32 = vsel %vm2344_vm0, %v2345_v62, %v2343_v1 }
 0x329   : > { %v1931_v26 = vsub.f32 1.0, %v6510_v54  ;;  %v1388_v5 = vmul.f32 %v1324_v3, %v6501_v50  ;;  %v1035_v23 = vmul.f32 -0.0012624911, %v6510_v54  ;;  %v1036_v37 = vmul.f32 -0.0012624911, %v6511_v63 }
 0x32a   : > { %v1451_v43 = vadd.f32 -0.050174303, %v1387_v53  ;;  %v2505_v29 = vmul.f32 %v2339_v9, %v1865_v11  ;;  %v2506_v61 = vmul.f32 %v2346_v32, %v1866_v42  ;;  %v1932_v35 = vsub.f32 1.0, %v6511_v63 }
 0x32b   : > { %v5199_v44 = vmax.f32 %v1931_v26, 0.0  ;;  %v3444_v51 = vpop.eup %3443  ;;  %v1452_v33 = vadd.f32 -0.050174303, %v1388_v5  ;;  %v1099_v1 = vadd.f32 0.00667009, %v1035_v23  ;;  %v6512_v20 = vclamps-f32 %v4275_v40, 1.0 }
 0x32c   : > { %v1515_v24 = vmul.f32 %v1451_v43, %v4265_v2  ;;  %v1100_v10 = vadd.f32 0.00667009, %v1036_v37  ;;  %v2633_v12 = vsub.f32 3.1415927, %v2505_v29  ;;  %v2634_v62 = vsub.f32 3.1415927, %v2506_v61 }
 0x32d   : > { %v5204_v19 = vand.u32 2147483647, %v6512_v20  ;;  %v2124_v3 = vmul.f32 %v3444_v51, %v5149_v8  ;;  %v1516_v9 = vmul.f32 %v1452_v33, %v6501_v50  ;;  %v1163_v11 = vmul.f32 %v1099_v1, %v6510_v54 }
 0x32e   : > { %v1579_v53 = vadd.f32 0.08897899, %v1515_v24  ;;  %v1164_v42 = vmul.f32 %v1100_v10, %v6511_v63  ;;  %v2697_v32 = vsel %vm5173_vm14, %v2633_v12, %v2505_v29  ;;  %v2698_v26 = vsel %vm5179_vm15, %v2634_v62, %v2506_v61  ;;  %v6513_v61 = vld [vmem:[#allocation25_spill] sm:$0xff] }
 0x32f   : > { %v5214_v5 = vmax.f32 %v1932_v35, 0.0  ;;  %3447 = vrsqrt.f32 %v5199_v44  ;;  %v2793_v43 = vmul.f32 %v2697_v32, %v2697_v32  ;;  %v2794_v23 = vmul.f32 %v2698_v26, %v2698_v26  ;;  %v6517_v32 = vld [vmem:[#allocation27_spill] sm:$0xff] }
 0x330   : > { %v1580_v37 = vadd.f32 0.08897899, %v1516_v9  ;;  %v1643_v51 = vmul.f32 %v1579_v53, %v4265_v2  ;;  %vm2125_vm1 = vcmp.eq.f32.partialorder %v5149_v8, inf  ;;  %v1227_v24 = vadd.f32 -0.017088126, %v1163_v11 }
 0x331   : > { %v3446_v33 = vpop.eup %3445  ;;  %v1228_v1 = vadd.f32 -0.017088126, %v1164_v42  ;;  %v2880_v10 = vadd.f32 %v2794_v23, %v2793_v43  ;;  %v6514_v35 = vclamps-f32 %v6513_v61, 1.0  ;;  %v2126_v12 = vsel %vm2125_vm1, %v5149_v8, %v2124_v3 }
 0x332   : > { %v1644_v46 = vmul.f32 %v1580_v37, %v6501_v50  ;;  %v1707_v29 = vadd.f32 -0.2145988, %v1643_v51  ;;  %v2131_v18 = vmul.f32 %v3446_v33, %v5162_v15  ;;  %vm2127_vm3 = vcmp.eq.f32.partialorder %v5149_v8, 0.0 }
 0x333   : > { %vm5223_vm2 = vcmp.lt.f32.partialorder %v6514_v35, 0.0  ;;  %v1291_v62 = vmul.f32 %v1227_v24, %v6510_v54  ;;  %v1292_v9 = vmul.f32 %v1228_v1, %v6511_v63  ;;  %2881 = vadd.xlane.f32.xlu1 %v2880_v10  ;;  %v2128_v42 = vand.u32 2147483648, %v5149_v8 }
 0x334   : > { %v1708_v53 = vadd.f32 -0.2145988, %v1644_v46  ;;  %v1771_v11 = vmul.f32 %v1707_v29, %v4265_v2  ;;  %3449 = vrsqrt.f32 %v5214_v5  ;;  %v6518_v26 = vclamps-f32 %v6517_v32, 1.0 }
 0x335   : > { %vm2132_vm5 = vcmp.eq.f32.partialorder %v5162_v15, inf  ;;  %v2135_v3 = vand.u32 2147483648, %v5162_v15  ;;  %v1355_v23 = vadd.f32 0.03089188, %v1291_v62  ;;  %v1356_v37 = vadd.f32 0.03089188, %v1292_v9 }
 0x336   : > { %vm5236_vm4 = vcmp.lt.f32.partialorder %v6518_v26, 0.0  ;;  %v1772_v51 = vmul.f32 %v1708_v53, %v6501_v50  ;;  %v1835_v33 = vadd.f32 1.5707963, %v1771_v11  ;;  %v2129_v2 = vsel %vm2127_vm3, %v2128_v42, %v2126_v12 }
 0x337   : > { %v2133_v8 = vsel %vm2132_vm5, %v5162_v15, %v2131_v18  ;;  %v1419_v24 = vmul.f32 %v1355_v23, %v6510_v54  ;;  %v1420_v1 = vmul.f32 %v1356_v37, %v6511_v63  ;;  %v1005_v10 = vmul.f32 -0.0012624911, %v4395_v6 }
 0x338   : > { %v1006_v46 = vmul.f32 -0.0012624911, %v4409_v56  ;;  %v1836_v29 = vadd.f32 1.5707963, %v1772_v51  ;;  %vm2134_vm6 = vcmp.eq.f32.partialorder %v5162_v15, 0.0  ;;  %v2475_v61 = vmul.f32 %v2129_v2, %v1835_v33 }
 0x339   : > { %v1901_v35 = vsub.f32 1.0, %v4395_v6  ;;  %v3448_v62 = vpop.eup %3447  ;;  %v2136_v50 = vsel %vm2134_vm6, %v2135_v3, %v2133_v8  ;;  %v1483_v9 = vadd.f32 -0.050174303, %v1419_v24  ;;  %v1484_v12 = vadd.f32 -0.050174303, %v1420_v1 }
 0x33a   : > { %v1069_v53 = vadd.f32 0.00667009, %v1005_v10  ;;  %v2476_v18 = vmul.f32 %v2136_v50, %v1836_v29  ;;  %v2603_v11 = vsub.f32 3.1415927, %v2475_v61  ;;  %v1070_v42 = vadd.f32 0.00667009, %v1006_v46 }
 0x33b   : > { %v1902_v32 = vsub.f32 1.0, %v4409_v56  ;;  %v1547_v26 = vmul.f32 %v1483_v9, %v6510_v54  ;;  %v1548_v23 = vmul.f32 %v1484_v12, %v6511_v63  ;;  %vm2349_vm7 = vcmp.eq.f32.partialorder %v5199_v44, inf }
 0x33c   : > { %v1133_v15 = vmul.f32 %v1069_v53, %v4395_v6  ;;  %v2604_v37 = vsub.f32 3.1415927, %v2476_v18  ;;  %v2667_v3 = vsel %vm5223_vm2, %v2603_v11, %v2475_v61  ;;  %v1134_v51 = vmul.f32 %v1070_v42, %v4409_v56 }
 0x33d   : > { %v5258_v33 = vmax.f32 %v1901_v35, 0.0  ;;  %v2763_v2 = vmul.f32 %v2667_v3, %v2667_v3  ;;  %v1611_v8 = vadd.f32 0.08897899, %v1547_v26  ;;  %v1612_v24 = vadd.f32 0.08897899, %v1548_v23 }
 0x33e   : > { %v2348_v1 = vmul.f32 %v3448_v62, %v5199_v44  ;;  %v3450_v10 = vpop.eup %3449  ;;  %v2668_v46 = vsel %vm5236_vm4, %v2604_v37, %v2476_v18  ;;  %v1197_v29 = vadd.f32 -0.017088126, %v1133_v15  ;;  %v1198_v50 = vadd.f32 -0.017088126, %v1134_v51  ;;  %v6525_v15 = vld [vmem:[#allocation28_spill] sm:$0xff] }
 0x33f   : > { %v5263_v9 = vmax.f32 %v1902_v32, 0.0  ;;  %v2764_v12 = vmul.f32 %v2668_v46, %v2668_v46  ;;  %v1675_v20 = vmul.f32 %v1611_v8, %v6510_v54  ;;  %v1676_v61 = vmul.f32 %v1612_v24, %v6511_v63  ;;  %v6521_v32 = vld [vmem:[#allocation26_spill] sm:$0xff] }
 0x340   : > { %v2355_v35 = vmul.f32 %v3450_v10, %v5214_v5  ;;  %vm2351_vm8 = vcmp.eq.f32.partialorder %v5199_v44, 0.0  ;;  %v1261_v53 = vmul.f32 %v1197_v29, %v4395_v6  ;;  %v1262_v62 = vmul.f32 %v1198_v50, %v4409_v56 }
 0x341   : > { %3451 = vrsqrt.f32 %v5258_v33  ;;  %v2835_v43 = vadd.f32 %v2764_v12, %v2763_v2  ;;  %v1739_v18 = vadd.f32 -0.2145988, %v1675_v20  ;;  %v1740_v11 = vadd.f32 -0.2145988, %v1676_v61 }
 0x342   : > { %v2352_v42 = vand.u32 2147483648, %v5199_v44  ;;  %v6522_v26 = vclamps-f32 %v6521_v32, 1.0  ;;  %v6526_v37 = vclamps-f32 %v6525_v15, 1.0  ;;  %v2350_v51 = vsel %vm2349_vm7, %v5199_v44, %v2348_v1 }
 0x343   : > { %vm2356_vm11 = vcmp.eq.f32.partialorder %v5214_v5, inf  ;;  %v1325_v2 = vadd.f32 0.03089188, %v1261_v53  ;;  %v1326_v8 = vadd.f32 0.03089188, %v1262_v62  ;;  %2836 = vadd.xlane.f32.xlu0 %v2835_v43  ;;  %v1803_v24 = vmul.f32 %v1739_v18, %v6510_v54 }
 0x344   : > { %vm5275_vm9 = vcmp.lt.f32.partialorder %v6522_v26, 0.0  ;;  %vm5281_vm10 = vcmp.lt.f32.partialorder %v6526_v37, 0.0  ;;  %v1804_v10 = vmul.f32 %v1740_v11, %v6511_v63  ;;  %v2357_v46 = vsel %vm2356_vm11, %v5214_v5, %v2355_v35 }
 0x345   : > { %3453 = vrsqrt.f32 %v5263_v9  ;;  %vm2358_vm12 = vcmp.eq.f32.partialorder %v5214_v5, 0.0  ;;  %v2359_v29 = vand.u32 2147483648, %v5214_v5  ;;  %v1389_v50 = vmul.f32 %v1325_v2, %v4395_v6 }
 0x346   : > { %v1390_v1 = vmul.f32 %v1326_v8, %v4409_v56  ;;  %v1867_v12 = vadd.f32 1.5707963, %v1803_v24  ;;  %v1868_v20 = vadd.f32 1.5707963, %v1804_v10  ;;  %v2353_v61 = vsel %vm2351_vm8, %v2352_v42, %v2350_v51 }
 0x347   : > { %v1933_v54 = vsub.f32 1.0, %v4402_v28  ;;  %v2360_v63 = vsel %vm2358_vm12, %v2359_v29, %v2357_v46  ;;  %v1453_v53 = vadd.f32 -0.050174303, %v1389_v50  ;;  %v1037_v62 = vmul.f32 -0.0012624911, %v4402_v28 }
 0x348   : > { %v1454_v35 = vadd.f32 -0.050174303, %v1390_v1  ;;  %v2507_v43 = vmul.f32 %v2353_v61, %v1867_v12  ;;  %v2508_v18 = vmul.f32 %v2360_v63, %v1868_v20  ;;  %v1038_v5 = vmul.f32 -0.0012624911, %v4428_v25 }
 0x349   : > { %v1934_v11 = vsub.f32 1.0, %v4428_v25  ;;  %v1517_v32 = vmul.f32 %v1453_v53, %v4395_v6  ;;  %v1101_v15 = vadd.f32 0.00667009, %v1037_v62  ;;  %v5305_v44 = vmax.f32 %v1933_v54, 0.0 }
 0x34a   : > { %v1518_v26 = vmul.f32 %v1454_v35, %v4409_v56  ;;  %v2635_v42 = vsub.f32 3.1415927, %v2507_v43  ;;  %v2636_v37 = vsub.f32 3.1415927, %v2508_v18  ;;  %v1102_v51 = vadd.f32 0.00667009, %v1038_v5 }
 0x34b   : > { %v3452_v2 = vpop.eup %3451  ;;  %v1581_v8 = vadd.f32 0.08897899, %v1517_v32  ;;  %vm2139_vm13 = vcmp.eq.f32.partialorder %v5258_v33, inf  ;;  %v1165_v10 = vmul.f32 %v1101_v15, %v4402_v28  ;;  %v5317_v62 = vmax.f32 %v1934_v11, 0.0 }
 0x34c   : > { %v1582_v24 = vadd.f32 0.08897899, %v1518_v26  ;;  %v2699_v46 = vsel %vm5275_vm9, %v2635_v42, %v2507_v43  ;;  %v2700_v29 = vsel %vm5281_vm10, %v2636_v37, %v2508_v18  ;;  %v2138_v50 = vmul.f32 %v3452_v2, %v5258_v33 }
 0x34d   : > { %v1166_v1 = vmul.f32 %v1102_v51, %v4428_v25  ;;  %v2795_v12 = vmul.f32 %v2699_v46, %v2699_v46  ;;  %v2796_v20 = vmul.f32 %v2700_v29, %v2700_v29  ;;  %v1645_v61 = vmul.f32 %v1581_v8, %v4395_v6 }
 0x34e   : > { %v1646_v54 = vmul.f32 %v1582_v24, %v4409_v56  ;;  %v1229_v53 = vadd.f32 -0.017088126, %v1165_v10  ;;  %3455 = vrsqrt.f32 %v5305_v44  ;;  %v2142_v18 = vand.u32 2147483648, %v5258_v33 }
 0x34f   : > { %v3454_v63 = vpop.eup %3453  ;;  %v1230_v35 = vadd.f32 -0.017088126, %v1166_v1  ;;  %v2883_v23 = vadd.f32 %v2796_v20, %v2795_v12  ;;  %v1709_v3 = vadd.f32 -0.2145988, %v1645_v61  ;;  %v6529_v5 = vclamps-f32 %v4071_v52, 1.0 }
 0x350   : > { %v1710_v43 = vadd.f32 -0.2145988, %v1646_v54  ;;  %v6532_v26 = vclamps-f32 %v4096_v27, 1.0  ;;  %v2145_v11 = vmul.f32 %v3454_v63, %v5263_v9  ;;  %vm2146_vm0 = vcmp.eq.f32.partialorder %v5263_v9, inf }
 0x351   : > { %vm5323_vm14 = vcmp.lt.f32.partialorder %v6529_v5, 0.0  ;;  %v1293_v42 = vmul.f32 %v1229_v53, %v4402_v28  ;;  %v1294_v37 = vmul.f32 %v1230_v35, %v4428_v25  ;;  %2884 = vadd.xlane.f32.xlu0 %v2883_v23  ;;  %v1773_v52 = vmul.f32 %v1709_v3, %v4395_v6 }
 0x352   : > { %vm5329_vm15 = vcmp.lt.f32.partialorder %v6532_v26, 0.0  ;;  %v1774_v51 = vmul.f32 %v1710_v43, %v4409_v56  ;;  %v2140_v27 = vsel %vm2139_vm13, %v5258_v33, %v2138_v50  ;;  %v2149_v2 = vand.u32 2147483648, %v5263_v9 }
 0x353   : > { %v2147_v8 = vsel %vm2146_vm0, %v5263_v9, %v2145_v11  ;;  %v1357_v24 = vadd.f32 0.03089188, %v1293_v42  ;;  %v1358_v10 = vadd.f32 0.03089188, %v1294_v37  ;;  %3457 = vrsqrt.f32 %v5317_v62 }
 0x354   : > { %v1837_v46 = vadd.f32 1.5707963, %v1773_v52  ;;  %v1838_v29 = vadd.f32 1.5707963, %v1774_v51  ;;  %vm2141_vm1 = vcmp.eq.f32.partialorder %v5258_v33, 0.0  ;;  %vm2148_vm2 = vcmp.eq.f32.partialorder %v5263_v9, 0.0 }
 0x355   : > { %v2143_v6 = vsel %vm2141_vm1, %v2142_v18, %v2140_v27  ;;  %v2150_v56 = vsel %vm2148_vm2, %v2149_v2, %v2147_v8  ;;  %v1421_v1 = vmul.f32 %v1357_v24, %v4402_v28  ;;  %v1422_v50 = vmul.f32 %v1358_v10, %v4428_v25 }
 0x356   : > { %v2477_v12 = vmul.f32 %v2143_v6, %v1837_v46  ;;  %v2478_v20 = vmul.f32 %v2150_v56, %v1838_v29  ;;  %v1007_v61 = vmul.f32 -0.0012624911, %v4433_v48  ;;  %v1008_v54 = vmul.f32 -0.0012624911, %v4445_v57 }
 0x357   : > { %v1485_v63 = vadd.f32 -0.050174303, %v1421_v1  ;;  %v1486_v53 = vadd.f32 -0.050174303, %v1422_v50  ;;  %v1903_v35 = vsub.f32 1.0, %v4433_v48  ;;  %v1904_v33 = vsub.f32 1.0, %v4445_v57 }
 0x358   : > { %v2605_v23 = vsub.f32 3.1415927, %v2477_v12  ;;  %v2606_v9 = vsub.f32 3.1415927, %v2478_v20  ;;  %v1071_v3 = vadd.f32 0.00667009, %v1007_v61  ;;  %v3456_v43 = vpop.eup %3455 }
 0x359   : > { %v1549_v18 = vmul.f32 %v1485_v63, %v4402_v28  ;;  %v1550_v5 = vmul.f32 %v1486_v53, %v4428_v25  ;;  %v1072_v26 = vadd.f32 0.00667009, %v1008_v54  ;;  %v5355_v11 = vmax.f32 %v1903_v35, 0.0 }
 0x35a   : > { %v2669_v42 = vsel %vm5323_vm14, %v2605_v23, %v2477_v12  ;;  %v2670_v37 = vsel %vm5329_vm15, %v2606_v9, %v2478_v20  ;;  %v2362_v52 = vmul.f32 %v3456_v43, %v5305_v44  ;;  %v1135_v51 = vmul.f32 %v1071_v3, %v4433_v48 }
 0x35b   : > { %v2765_v27 = vmul.f32 %v2669_v42, %v2669_v42  ;;  %v2766_v2 = vmul.f32 %v2670_v37, %v2670_v37  ;;  %v1613_v8 = vadd.f32 0.08897899, %v1549_v18  ;;  %v1614_v24 = vadd.f32 0.08897899, %v1550_v5 }
 0x35c   : > { %vm2363_vm3 = vcmp.eq.f32.partialorder %v5305_v44, inf  ;;  %vm2365_vm4 = vcmp.eq.f32.partialorder %v5305_v44, 0.0  ;;  %v1136_v10 = vmul.f32 %v1072_v26, %v4445_v57  ;;  %v1199_v46 = vadd.f32 -0.017088126, %v1135_v51 }
 0x35d   : > { %v3458_v32 = vpop.eup %3457  ;;  %v2838_v29 = vadd.f32 %v2766_v2, %v2765_v27  ;;  %v1677_v15 = vmul.f32 %v1613_v8, %v4402_v28  ;;  %v1678_v6 = vmul.f32 %v1614_v24, %v4428_v25  ;;  %v5368_v56 = vmax.f32 %v1904_v33, 0.0 }
 0x35e   : > { %v2369_v1 = vmul.f32 %v3458_v32, %v5317_v62  ;;  %v1200_v50 = vadd.f32 -0.017088126, %v1136_v10  ;;  %v1263_v12 = vmul.f32 %v1199_v46, %v4433_v48  ;;  %3459 = vrsqrt.f32 %v5355_v11 }
 0x35f   : > { %2839 = vadd.xlane.f32.xlu1 %v2838_v29  ;;  %v1741_v20 = vadd.f32 -0.2145988, %v1677_v15  ;;  %v1742_v61 = vadd.f32 -0.2145988, %v1678_v6  ;;  %v2364_v54 = vsel %vm2363_vm3, %v5305_v44, %v2362_v52  ;;  %vm2370_vm5 = vcmp.eq.f32.partialorder %v5317_v62, inf  ;;  %v6541_v6 = vld [vmem:[#allocation59_spill] sm:$0xff] }
 0x360   : > { %v6535_v63 = vclamps-f32 %v4073_v45, 1.0  ;;  %v6538_v35 = vclamps-f32 %v4098_v13, 1.0  ;;  %v2366_v23 = vand.u32 2147483648, %v5305_v44  ;;  %v2371_v9 = vsel %vm2370_vm5, %v5317_v62, %v2369_v1 }
 0x361   : > { %v1264_v3 = vmul.f32 %v1200_v50, %v4445_v57  ;;  %v1327_v43 = vadd.f32 0.03089188, %v1263_v12  ;;  %v1805_v18 = vmul.f32 %v1741_v20, %v4402_v28  ;;  %v1806_v45 = vmul.f32 %v1742_v61, %v4428_v25 }
 0x362   : > { %vm5379_vm6 = vcmp.lt.f32.partialorder %v6535_v63, 0.0  ;;  %vm5385_vm7 = vcmp.lt.f32.partialorder %v6538_v35, 0.0  ;;  %v2373_v5 = vand.u32 2147483648, %v5317_v62  ;;  %3461 = vrsqrt.f32 %v5368_v56 }
 0x363   : > { %v2367_v13 = vsel %vm2365_vm4, %v2366_v23, %v2364_v54  ;;  %vm2372_vm8 = vcmp.eq.f32.partialorder %v5317_v62, 0.0  ;;  %v1328_v26 = vadd.f32 0.03089188, %v1264_v3  ;;  %v1391_v42 = vmul.f32 %v1327_v43, %v4433_v48 }
 0x364   : > { %v1869_v37 = vadd.f32 1.5707963, %v1805_v18  ;;  %v1870_v52 = vadd.f32 1.5707963, %v1806_v45  ;;  %v2374_v51 = vsel %vm2372_vm8, %v2373_v5, %v2371_v9  ;;  %v1935_v27 = vsub.f32 1.0, %v4438_v60 }
 0x365   : > { %v1392_v28 = vmul.f32 %v1328_v26, %v4445_v57  ;;  %v1455_v25 = vadd.f32 -0.050174303, %v1391_v42  ;;  %v1039_v2 = vmul.f32 -0.0012624911, %v4438_v60  ;;  %v1040_v8 = vmul.f32 -0.0012624911, %v4449_v4 }
 0x366   : > { %v2509_v24 = vmul.f32 %v2367_v13, %v1869_v37  ;;  %v2510_v44 = vmul.f32 %v2374_v51, %v1870_v52  ;;  %v1936_v10 = vsub.f32 1.0, %v4449_v4  ;;  %v5405_v62 = vmax.f32 %v1935_v27, 0.0  ;;  %v6542_v42 = vld [vmem:[#allocation60_spill] sm:$0xff] }
 0x367   : > { %v1456_v46 = vadd.f32 -0.050174303, %v1392_v28  ;;  %v1519_v32 = vmul.f32 %v1455_v25, %v4433_v48  ;;  %v1103_v29 = vadd.f32 0.00667009, %v1039_v2  ;;  %v1104_v15 = vadd.f32 0.00667009, %v1040_v8 }
 0x368   : > { %v3126_v1 = vclamps-f32 %v6541_v6, 1.0  ;;  %v2637_v50 = vsub.f32 3.1415927, %v2509_v24  ;;  %v2638_v12 = vsub.f32 3.1415927, %v2510_v44  ;;  %3463 = vrsqrt.f32 %v5405_v62  ;;  %v3460_v20 = vpop.eup %3459  ;;  %v2726_v6 = vld [vmem:[%s3606_s28 + $0x58] sm:$0xff] }
 0x369   : > { %v1520_v61 = vmul.f32 %v1456_v46, %v4445_v57  ;;  %v1583_v54 = vadd.f32 0.08897899, %v1519_v32  ;;  %v1167_v63 = vmul.f32 %v1103_v29, %v4438_v60  ;;  %v1168_v35 = vmul.f32 %v1104_v15, %v4449_v4 }
 0x36a   : > { %v2701_v23 = vsel %vm5379_vm6, %v2637_v50, %v2509_v24  ;;  %v2702_v9 = vsel %vm5385_vm7, %v2638_v12, %v2510_v44  ;;  %v2152_v3 = vmul.f32 %v3460_v20, %v5355_v11  ;;  %v5418_v43 = vmax.f32 %v1936_v10, 0.0 }
 0x36b   : > { %v2797_v18 = vmul.f32 %v2701_v23, %v2701_v23  ;;  %v2798_v45 = vmul.f32 %v2702_v9, %v2702_v9  ;;  %v1584_v5 = vadd.f32 0.08897899, %v1520_v61  ;;  %v1647_v13 = vmul.f32 %v1583_v54, %v4433_v48 }
 0x36c   : > { %v3462_v26 = vpop.eup %3461  ;;  %v3095_v37 = vclamps-f32 %v6542_v42, 1.0  ;;  %vm2153_vm9 = vcmp.eq.f32.partialorder %v5355_v11, inf  ;;  %v1231_v52 = vadd.f32 -0.017088126, %v1167_v63  ;;  %v1232_v53 = vadd.f32 -0.017088126, %v1168_v35 }
 0x36d   : > { %v2886_v51 = vadd.f32 %v2798_v45, %v2797_v18  ;;  %v1648_v33 = vmul.f32 %v1584_v5, %v4445_v57  ;;  %v1711_v27 = vadd.f32 -0.2145988, %v1647_v13  ;;  %vm2155_vm10 = vcmp.eq.f32.partialorder %v5355_v11, 0.0 }
 0x36e   : > { %v6543_v28 = vclamps-f32 %v4109_v31, 1.0  ;;  %v2154_v2 = vsel %vm2153_vm9, %v5355_v11, %v2152_v3  ;;  %v2159_v8 = vmul.f32 %v3462_v26, %v5368_v56  ;;  %v1295_v24 = vmul.f32 %v1231_v52, %v4438_v60 }
 0x36f   : > { %v1296_v44 = vmul.f32 %v1232_v53, %v4449_v4  ;;  %2887 = vadd.xlane.f32.xlu1 %v2886_v51  ;;  %v1712_v10 = vadd.f32 -0.2145988, %v1648_v33  ;;  %v1775_v46 = vmul.f32 %v1711_v27, %v4433_v48  ;;  %v2156_v32 = vand.u32 2147483648, %v5355_v11 }
 0x370   : > { %vm5427_vm11 = vcmp.lt.f32.partialorder %v6543_v28, 0.0  ;;  %3465 = vrsqrt.f32 %v5418_v43  ;;  %v6546_v31 = vclamps-f32 %v4132_v36, 1.0  ;;  %vm2160_vm13 = vcmp.eq.f32.partialorder %v5368_v56, inf }
 0x371   : > { %v2163_v15 = vand.u32 2147483648, %v5368_v56  ;;  %v1359_v50 = vadd.f32 0.03089188, %v1295_v24  ;;  %v1360_v12 = vadd.f32 0.03089188, %v1296_v44  ;;  %v1776_v20 = vmul.f32 %v1712_v10, %v4445_v57 }
 0x372   : > { %vm5440_vm12 = vcmp.lt.f32.partialorder %v6546_v31, 0.0  ;;  %v1839_v61 = vadd.f32 1.5707963, %v1775_v46  ;;  %v2157_v48 = vsel %vm2155_vm10, %v2156_v32, %v2154_v2  ;;  %v2161_v54 = vsel %vm2160_vm13, %v5368_v56, %v2159_v8  ;;  %v3464_v63 = vpop.eup %3463 }
 0x373   : > { %v1423_v36 = vmul.f32 %v1359_v50, %v4438_v60  ;;  %v1424_v35 = vmul.f32 %v1360_v12, %v4449_v4  ;;  %v1009_v23 = vmul.f32 -0.0012624911, %v4539_v41  ;;  %v1010_v9 = vmul.f32 -0.0012624911, %v4566_v49 }
 0x374   : > { %v5456_v3 = vand.u32 2147483647, %v3126_v1  ;;  %v1840_v57 = vadd.f32 1.5707963, %v1776_v20  ;;  %vm2162_vm14 = vcmp.eq.f32.partialorder %v5368_v56, 0.0  ;;  %v2479_v11 = vmul.f32 %v2157_v48, %v1839_v61 }
 0x375   : > { %v2164_v18 = vsel %vm2162_vm14, %v2163_v15, %v2161_v54  ;;  %v1487_v45 = vadd.f32 -0.050174303, %v1423_v36  ;;  %v1488_v5 = vadd.f32 -0.050174303, %v1424_v35  ;;  %vm2377_vm15 = vcmp.eq.f32.partialorder %v5405_v62, inf }
 0x376   : > { %v1073_v13 = vadd.f32 0.00667009, %v1009_v23  ;;  %v2480_v26 = vmul.f32 %v2164_v18, %v1840_v57  ;;  %v2607_v52 = vsub.f32 3.1415927, %v2479_v11  ;;  %v1074_v53 = vadd.f32 0.00667009, %v1010_v9 }
 0x377   : > { %v1905_v51 = vsub.f32 1.0, %v4539_v41  ;;  %v1551_v33 = vmul.f32 %v1487_v45, %v4438_v60  ;;  %v1552_v27 = vmul.f32 %v1488_v5, %v4449_v4  ;;  %v2376_v28 = vmul.f32 %v3464_v63, %v5405_v62 }
 0x378   : > { %v1137_v56 = vmul.f32 %v1073_v13, %v4539_v41  ;;  %v2608_v2 = vsub.f32 3.1415927, %v2480_v26  ;;  %v2671_v8 = vsel %vm5427_vm11, %v2607_v52, %v2479_v11  ;;  %v1138_v24 = vmul.f32 %v1074_v53, %v4566_v49 }
 0x379   : > { %v1906_v44 = vsub.f32 1.0, %v4566_v49  ;;  %v2767_v10 = vmul.f32 %v2671_v8, %v2671_v8  ;;  %v1615_v46 = vadd.f32 0.08897899, %v1551_v33  ;;  %v1616_v32 = vadd.f32 0.08897899, %v1552_v27 }
 0x37a   : > { %v1201_v31 = vadd.f32 -0.017088126, %v1137_v56  ;;  %v3466_v15 = vpop.eup %3465  ;;  %v2672_v50 = vsel %vm5440_vm12, %v2608_v2, %v2480_v26  ;;  %v1202_v12 = vadd.f32 -0.017088126, %v1138_v24  ;;  %v5471_v20 = vmax.f32 %v1905_v51, 0.0 }
 0x37b   : > { %v5473_v61 = vmax.f32 %v1906_v44, 0.0  ;;  %v2768_v48 = vmul.f32 %v2672_v50, %v2672_v50  ;;  %v1679_v25 = vmul.f32 %v1615_v46, %v4438_v60  ;;  %v1680_v54 = vmul.f32 %v1616_v32, %v4449_v4 }
 0x37c   : > { %v2383_v63 = vmul.f32 %v3466_v15, %v5418_v43  ;;  %vm2379_vm0 = vcmp.eq.f32.partialorder %v5405_v62, 0.0  ;;  %v1265_v36 = vmul.f32 %v1201_v31, %v4539_v41  ;;  %v1266_v35 = vmul.f32 %v1202_v12, %v4566_v49 }
 0x37d   : > { %3467 = vrsqrt.f32 %v5471_v20  ;;  %v2841_v29 = vadd.f32 %v2768_v48, %v2767_v10  ;;  %v1743_v23 = vadd.f32 -0.2145988, %v1679_v25  ;;  %v1744_v9 = vadd.f32 -0.2145988, %v1680_v54 }
 0x37e   : > { %v2380_v57 = vand.u32 2147483648, %v5405_v62  ;;  %v6549_v11 = vclamps-f32 %v4111_v59, 1.0  ;;  %v6552_v45 = vclamps-f32 %v4134_v17, 1.0  ;;  %v2378_v13 = vsel %vm2377_vm15, %v5405_v62, %v2376_v28 }
 0x37f   : > { %vm2384_vm3 = vcmp.eq.f32.partialorder %v5418_v43, inf  ;;  %v1329_v26 = vadd.f32 0.03089188, %v1265_v36  ;;  %v1330_v52 = vadd.f32 0.03089188, %v1266_v35  ;;  %2842 = vadd.xlane.f32.xlu0 %v2841_v29  ;;  %v1807_v59 = vmul.f32 %v1743_v23, %v4438_v60 }
 0x380   : > { %vm5485_vm1 = vcmp.lt.f32.partialorder %v6549_v11, 0.0  ;;  %vm5491_vm2 = vcmp.lt.f32.partialorder %v6552_v45, 0.0  ;;  %v1808_v53 = vmul.f32 %v1744_v9, %v4449_v4  ;;  %v2385_v51 = vsel %vm2384_vm3, %v5418_v43, %v2383_v63 }
 0x381   : > { %3469 = vrsqrt.f32 %v5473_v61  ;;  %vm2386_vm4 = vcmp.eq.f32.partialorder %v5418_v43, 0.0  ;;  %v2387_v17 = vand.u32 2147483648, %v5418_v43  ;;  %v1393_v33 = vmul.f32 %v1329_v26, %v4539_v41 }
 0x382   : > { %v1394_v27 = vmul.f32 %v1330_v52, %v4566_v49  ;;  %v1871_v28 = vadd.f32 1.5707963, %v1807_v59  ;;  %v1872_v56 = vadd.f32 1.5707963, %v1808_v53  ;;  %v2381_v2 = vsel %vm2379_vm0, %v2380_v57, %v2378_v13 }
 0x383   : > { %v1937_v60 = vsub.f32 1.0, %v4556_v21  ;;  %v2388_v4 = vsel %vm2386_vm4, %v2387_v17, %v2385_v51  ;;  %v1457_v8 = vadd.f32 -0.050174303, %v1393_v33  ;;  %v1041_v44 = vmul.f32 -0.0012624911, %v4556_v21 }
 0x384   : > { %v1458_v24 = vadd.f32 -0.050174303, %v1394_v27  ;;  %v2511_v10 = vmul.f32 %v2381_v2, %v1871_v28  ;;  %v2512_v46 = vmul.f32 %v2388_v4, %v1872_v56  ;;  %v1042_v43 = vmul.f32 -0.0012624911, %v4572_v7 }
 0x385   : > { %v1938_v32 = vsub.f32 1.0, %v4572_v7  ;;  %v1521_v31 = vmul.f32 %v1457_v8, %v4539_v41  ;;  %v1105_v50 = vadd.f32 0.00667009, %v1041_v44  ;;  %v5515_v62 = vmax.f32 %v1937_v60, 0.0 }
 0x386   : > { %v1522_v15 = vmul.f32 %v1458_v24, %v4566_v49  ;;  %v2639_v12 = vsub.f32 3.1415927, %v2511_v10  ;;  %v2640_v48 = vsub.f32 3.1415927, %v2512_v46  ;;  %v1106_v25 = vadd.f32 0.00667009, %v1042_v43 }
 0x387   : > { %v3468_v54 = vpop.eup %3467  ;;  %v1585_v63 = vadd.f32 0.08897899, %v1521_v31  ;;  %vm2167_vm5 = vcmp.eq.f32.partialorder %v5471_v20, inf  ;;  %v1169_v35 = vmul.f32 %v1105_v50, %v4556_v21  ;;  %v5527_v51 = vmax.f32 %v1938_v32, 0.0 }
 0x388   : > { %v1586_v36 = vadd.f32 0.08897899, %v1522_v15  ;;  %v2703_v29 = vsel %vm5485_vm1, %v2639_v12, %v2511_v10  ;;  %v2704_v23 = vsel %vm5491_vm2, %v2640_v48, %v2512_v46  ;;  %v2166_v9 = vmul.f32 %v3468_v54, %v5471_v20 }
 0x389   : > { %v1170_v57 = vmul.f32 %v1106_v25, %v4572_v7  ;;  %v2799_v11 = vmul.f32 %v2703_v29, %v2703_v29  ;;  %v2800_v45 = vmul.f32 %v2704_v23, %v2704_v23  ;;  %v1649_v13 = vmul.f32 %v1585_v63, %v4539_v41 }
 0x38a   : > { %v1650_v26 = vmul.f32 %v1586_v36, %v4566_v49  ;;  %v1233_v59 = vadd.f32 -0.017088126, %v1169_v35  ;;  %3471 = vrsqrt.f32 %v5515_v62  ;;  %v2170_v33 = vand.u32 2147483648, %v5471_v20 }
 0x38b   : > { %v3470_v52 = vpop.eup %3469  ;;  %v1234_v53 = vadd.f32 -0.017088126, %v1170_v57  ;;  %v2889_v18 = vadd.f32 %v2800_v45, %v2799_v11  ;;  %v1713_v5 = vadd.f32 -0.2145988, %v1649_v13  ;;  %v6555_v27 = vclamps-f32 %v4139_v47, 1.0 }
 0x38c   : > { %v1714_v17 = vadd.f32 -0.2145988, %v1650_v26  ;;  %v6558_v56 = vclamps-f32 %v4178_v55, 1.0  ;;  %v2173_v60 = vmul.f32 %v3470_v52, %v5473_v61  ;;  %vm2174_vm8 = vcmp.eq.f32.partialorder %v5473_v61, inf }
 0x38d   : > { %vm5533_vm6 = vcmp.lt.f32.partialorder %v6555_v27, 0.0  ;;  %v1297_v4 = vmul.f32 %v1233_v59, %v4556_v21  ;;  %v1298_v8 = vmul.f32 %v1234_v53, %v4572_v7  ;;  %2890 = vadd.xlane.f32.xlu0 %v2889_v18  ;;  %v1777_v47 = vmul.f32 %v1713_v5, %v4539_v41 }
 0x38e   : > { %vm5539_vm7 = vcmp.lt.f32.partialorder %v6558_v56, 0.0  ;;  %v1778_v24 = vmul.f32 %v1714_v17, %v4566_v49  ;;  %v2168_v55 = vsel %vm2167_vm5, %v5471_v20, %v2166_v9  ;;  %v2177_v44 = vand.u32 2147483648, %v5473_v61 }
 0x38f   : > { %v2175_v10 = vsel %vm2174_vm8, %v5473_v61, %v2173_v60  ;;  %v1361_v46 = vadd.f32 0.03089188, %v1297_v4  ;;  %v1362_v43 = vadd.f32 0.03089188, %v1298_v8  ;;  %3473 = vrsqrt.f32 %v5527_v51 }
 0x390   : > { %v1841_v32 = vadd.f32 1.5707963, %v1777_v47  ;;  %v1842_v31 = vadd.f32 1.5707963, %v1778_v24  ;;  %vm2169_vm9 = vcmp.eq.f32.partialorder %v5471_v20, 0.0  ;;  %vm2176_vm10 = vcmp.eq.f32.partialorder %v5473_v61, 0.0 }
 0x391   : > { %v2171_v41 = vsel %vm2169_vm9, %v2170_v33, %v2168_v55  ;;  %v2178_v49 = vsel %vm2176_vm10, %v2177_v44, %v2175_v10  ;;  %v1425_v15 = vmul.f32 %v1361_v46, %v4556_v21  ;;  %v1426_v50 = vmul.f32 %v1362_v43, %v4572_v7 }
 0x392   : > { %v2481_v12 = vmul.f32 %v2171_v41, %v1841_v32  ;;  %v2482_v48 = vmul.f32 %v2178_v49, %v1842_v31  ;;  %v1011_v25 = vmul.f32 -0.0012624911, %v4583_v0  ;;  %v1012_v54 = vmul.f32 -0.0012624911, %v4669_v16  ;;  %v6564_v31 = vld [vmem:[#allocation43_spill] sm:$0xff] }
 0x393   : > { %v1489_v63 = vadd.f32 -0.050174303, %v1425_v15  ;;  %v1490_v36 = vadd.f32 -0.050174303, %v1426_v50  ;;  %v1907_v35 = vsub.f32 1.0, %v4583_v0  ;;  %v1908_v20 = vsub.f32 1.0, %v4669_v16 }
 0x394   : > { %v2609_v29 = vsub.f32 3.1415927, %v2481_v12  ;;  %v2610_v61 = vsub.f32 3.1415927, %v2482_v48  ;;  %v1075_v23 = vadd.f32 0.00667009, %v1011_v25  ;;  %v3472_v9 = vpop.eup %3471 }
 0x395   : > { %v1553_v57 = vmul.f32 %v1489_v63, %v4556_v21  ;;  %v1554_v11 = vmul.f32 %v1490_v36, %v4572_v7  ;;  %v1076_v45 = vadd.f32 0.00667009, %v1012_v54  ;;  %v5565_v13 = vmax.f32 %v1907_v35, 0.0 }
 0x396   : > { %v2673_v26 = vsel %vm5533_vm6, %v2609_v29, %v2481_v12  ;;  %v2674_v52 = vsel %vm5539_vm7, %v2610_v61, %v2482_v48  ;;  %v2390_v59 = vmul.f32 %v3472_v9, %v5515_v62  ;;  %v1139_v53 = vmul.f32 %v1075_v23, %v4583_v0  ;;  %v6568_v23 = vld [vmem:[#allocation3_spill] sm:$0xff] }
 0x397   : > { %v2769_v18 = vmul.f32 %v2673_v26, %v2673_v26  ;;  %v2770_v5 = vmul.f32 %v2674_v52, %v2674_v52  ;;  %v1617_v17 = vadd.f32 0.08897899, %v1553_v57  ;;  %v1618_v33 = vadd.f32 0.08897899, %v1554_v11  ;;  %v6569_v11 = vld [vmem:[#allocation4_spill] sm:$0xff] }
 0x398   : > { %vm2391_vm11 = vcmp.eq.f32.partialorder %v5515_v62, inf  ;;  %vm2393_vm12 = vcmp.eq.f32.partialorder %v5515_v62, 0.0  ;;  %v1140_v27 = vmul.f32 %v1076_v45, %v4669_v16  ;;  %v1203_v56 = vadd.f32 -0.017088126, %v1139_v53 }
 0x399   : > { %v3474_v28 = vpop.eup %3473  ;;  %v2844_v60 = vadd.f32 %v2770_v5, %v2769_v18  ;;  %v1681_v2 = vmul.f32 %v1617_v17, %v4556_v21  ;;  %v1682_v4 = vmul.f32 %v1618_v33, %v4572_v7  ;;  %v5578_v8 = vmax.f32 %v1908_v20, 0.0 }
 0x39a   : > { %v2397_v47 = vmul.f32 %v3474_v28, %v5527_v51  ;;  %v1204_v24 = vadd.f32 -0.017088126, %v1140_v27  ;;  %v1267_v55 = vmul.f32 %v1203_v56, %v4583_v0  ;;  %3475 = vrsqrt.f32 %v5565_v13 }
 0x39b   : > { %2845 = vadd.xlane.f32.xlu1 %v2844_v60  ;;  %v1745_v44 = vadd.f32 -0.2145988, %v1681_v2  ;;  %v1746_v10 = vadd.f32 -0.2145988, %v1682_v4  ;;  %v2392_v46 = vsel %vm2391_vm11, %v5515_v62, %v2390_v59  ;;  %vm2398_vm13 = vcmp.eq.f32.partialorder %v5527_v51, inf }
 0x39c   : > { %v6561_v43 = vclamps-f32 %v4141_v39, 1.0  ;;  %v6565_v41 = vclamps-f32 %v6564_v31, 1.0  ;;  %v2394_v15 = vand.u32 2147483648, %v5515_v62  ;;  %v2399_v50 = vsel %vm2398_vm13, %v5527_v51, %v2397_v47 }
 0x39d   : > { %v1268_v12 = vmul.f32 %v1204_v24, %v4669_v16  ;;  %v1331_v48 = vadd.f32 0.03089188, %v1267_v55  ;;  %v1809_v25 = vmul.f32 %v1745_v44, %v4556_v21  ;;  %v1810_v39 = vmul.f32 %v1746_v10, %v4572_v7 }
 0x39e   : > { %vm5589_vm14 = vcmp.lt.f32.partialorder %v6561_v43, 0.0  ;;  %vm5595_vm15 = vcmp.lt.f32.partialorder %v6565_v41, 0.0  ;;  %v2401_v54 = vand.u32 2147483648, %v5527_v51  ;;  %3477 = vrsqrt.f32 %v5578_v8 }
 0x39f   : > { %v2395_v63 = vsel %vm2393_vm12, %v2394_v15, %v2392_v46  ;;  %vm2400_vm0 = vcmp.eq.f32.partialorder %v5527_v51, 0.0  ;;  %v1332_v36 = vadd.f32 0.03089188, %v1268_v12  ;;  %v1395_v35 = vmul.f32 %v1331_v48, %v4583_v0  ;;  %v6570_v15 = vld [vmem:[#allocation61_spill] sm:$0xff] }
 0x3a0   : > { %v1873_v20 = vadd.f32 1.5707963, %v1809_v25  ;;  %v1874_v29 = vadd.f32 1.5707963, %v1810_v39  ;;  %v2402_v61 = vsel %vm2400_vm0, %v2401_v54, %v2399_v50  ;;  %v1939_v9 = vsub.f32 1.0, %v6568_v23  ;;  %v6571_v39 = vld [vmem:[#allocation44_spill] sm:$0xff] }
 0x3a1   : > { %v1396_v21 = vmul.f32 %v1332_v36, %v4669_v16  ;;  %v1459_v7 = vadd.f32 -0.050174303, %v1395_v35  ;;  %v1043_v57 = vmul.f32 -0.0012624911, %v6568_v23  ;;  %v1044_v45 = vmul.f32 -0.0012624911, %v6569_v11 }
 0x3a2   : > { %v2513_v26 = vmul.f32 %v2395_v63, %v1873_v20  ;;  %v2514_v62 = vmul.f32 %v2402_v61, %v1874_v29  ;;  %v1940_v52 = vsub.f32 1.0, %v6569_v11  ;;  %v5615_v51 = vmax.f32 %v1939_v9, 0.0 }
 0x3a3   : > { %v1460_v59 = vadd.f32 -0.050174303, %v1396_v21  ;;  %v1523_v53 = vmul.f32 %v1459_v7, %v4583_v0  ;;  %v1107_v18 = vadd.f32 0.00667009, %v1043_v57  ;;  %v1108_v5 = vadd.f32 0.00667009, %v1044_v45 }
 0x3a4   : > { %v5620_v17 = vand.u32 2147483647, %v3095_v37  ;;  %v2641_v33 = vsub.f32 3.1415927, %v2513_v26  ;;  %v2642_v27 = vsub.f32 3.1415927, %v2514_v62  ;;  %3479 = vrsqrt.f32 %v5615_v51  ;;  %v3476_v56 = vpop.eup %3475 }
 0x3a5   : > { %v1524_v28 = vmul.f32 %v1460_v59, %v4669_v16  ;;  %v1587_v60 = vadd.f32 0.08897899, %v1523_v53  ;;  %v1171_v2 = vmul.f32 %v1107_v18, %v6568_v23  ;;  %v1172_v4 = vmul.f32 %v1108_v5, %v6569_v11  ;;  %v6575_v7 = vld [vmem:[#allocation47_spill] sm:$0xff] }
 0x3a6   : > { %v2705_v47 = vsel %vm5589_vm14, %v2641_v33, %v2513_v26  ;;  %v2706_v24 = vsel %vm5595_vm15, %v2642_v27, %v2514_v62  ;;  %v2180_v55 = vmul.f32 %v3476_v56, %v5565_v13  ;;  %v5631_v44 = vmax.f32 %v1940_v52, 0.0  ;;  %v6579_v56 = vld [vmem:[#allocation5_spill] sm:$0xff] }
 0x3a7   : > { %v2801_v10 = vmul.f32 %v2705_v47, %v2705_v47  ;;  %v2802_v46 = vmul.f32 %v2706_v24, %v2706_v24  ;;  %v1588_v43 = vadd.f32 0.08897899, %v1524_v28  ;;  %v1651_v31 = vmul.f32 %v1587_v60, %v4583_v0  ;;  %v6580_v60 = vld [vmem:[#allocation7_spill] sm:$0xff] }
 0x3a8   : > { %v3478_v41 = vpop.eup %3477  ;;  %v3127_v50 = vclamps-f32 %v6570_v15, 1.0  ;;  %vm2181_vm1 = vcmp.eq.f32.partialorder %v5565_v13, inf  ;;  %v1235_v12 = vadd.f32 -0.017088126, %v1171_v2  ;;  %v1236_v32 = vadd.f32 -0.017088126, %v1172_v4 }
 0x3a9   : > { %v2892_v48 = vadd.f32 %v2802_v46, %v2801_v10  ;;  %v1652_v49 = vmul.f32 %v1588_v43, %v4669_v16  ;;  %v1715_v25 = vadd.f32 -0.2145988, %v1651_v31  ;;  %vm2183_vm2 = vcmp.eq.f32.partialorder %v5565_v13, 0.0 }
 0x3aa   : > { %v6572_v54 = vclamps-f32 %v6571_v39, 1.0  ;;  %v2182_v36 = vsel %vm2181_vm1, %v5565_v13, %v2180_v55  ;;  %v2187_v35 = vmul.f32 %v3478_v41, %v5578_v8  ;;  %v1299_v20 = vmul.f32 %v1235_v12, %v6568_v23 }
 0x3ab   : > { %v1300_v29 = vmul.f32 %v1236_v32, %v6569_v11  ;;  %2893 = vadd.xlane.f32.xlu1 %v2892_v48  ;;  %v1716_v61 = vadd.f32 -0.2145988, %v1652_v49  ;;  %v1779_v9 = vmul.f32 %v1715_v25, %v4583_v0  ;;  %v2184_v21 = vand.u32 2147483648, %v5565_v13 }
 0x3ac   : > { %vm5640_vm3 = vcmp.lt.f32.partialorder %v6572_v54, 0.0  ;;  %3481 = vrsqrt.f32 %v5631_v44  ;;  %v6576_v57 = vclamps-f32 %v6575_v7, 1.0  ;;  %vm2188_vm5 = vcmp.eq.f32.partialorder %v5578_v8, inf }
 0x3ad   : > { %v2191_v26 = vand.u32 2147483648, %v5578_v8  ;;  %v1363_v62 = vadd.f32 0.03089188, %v1299_v20  ;;  %v1364_v52 = vadd.f32 0.03089188, %v1300_v29  ;;  %v1780_v59 = vmul.f32 %v1716_v61, %v4669_v16 }
 0x3ae   : > { %vm5653_vm4 = vcmp.lt.f32.partialorder %v6576_v57, 0.0  ;;  %v1843_v53 = vadd.f32 1.5707963, %v1779_v9  ;;  %v2185_v0 = vsel %vm2183_vm2, %v2184_v21, %v2182_v36  ;;  %v2189_v18 = vsel %vm2188_vm5, %v5578_v8, %v2187_v35  ;;  %v3480_v5 = vpop.eup %3479 }
 0x3af   : > { %v1427_v33 = vmul.f32 %v1363_v62, %v6568_v23  ;;  %v1428_v27 = vmul.f32 %v1364_v52, %v6569_v11  ;;  %v1013_v28 = vmul.f32 -0.0012624911, %v6579_v56  ;;  %v1014_v2 = vmul.f32 -0.0012624911, %v6580_v60 }
 0x3b0   : > { %v5669_v4 = vand.u32 2147483647, %v3127_v50  ;;  %v1844_v16 = vadd.f32 1.5707963, %v1780_v59  ;;  %vm2190_vm6 = vcmp.eq.f32.partialorder %v5578_v8, 0.0  ;;  %v2483_v13 = vmul.f32 %v2185_v0, %v1843_v53 }
 0x3b1   : > { %v2192_v47 = vsel %vm2190_vm6, %v2191_v26, %v2189_v18  ;;  %v1491_v24 = vadd.f32 -0.050174303, %v1427_v33  ;;  %v1492_v55 = vadd.f32 -0.050174303, %v1428_v27  ;;  %vm2405_vm7 = vcmp.eq.f32.partialorder %v5615_v51, inf  ;;  %v6581_v33 = vld [vmem:[#allocation45_spill] sm:$0xff] }
 0x3b2   : > { %v1077_v10 = vadd.f32 0.00667009, %v1013_v28  ;;  %v2484_v46 = vmul.f32 %v2192_v47, %v1844_v16  ;;  %v2611_v43 = vsub.f32 3.1415927, %v2483_v13  ;;  %v1078_v31 = vadd.f32 0.00667009, %v1014_v2 }
 0x3b3   : > { %v1909_v41 = vsub.f32 1.0, %v6579_v56  ;;  %v1555_v12 = vmul.f32 %v1491_v24, %v6568_v23  ;;  %v1556_v32 = vmul.f32 %v1492_v55, %v6569_v11  ;;  %v2404_v48 = vmul.f32 %v3480_v5, %v5615_v51  ;;  %v6585_v2 = vld [vmem:[#allocation50_spill] sm:$0xff] }
 0x3b4   : > { %v1141_v8 = vmul.f32 %v1077_v10, %v6579_v56  ;;  %v2612_v49 = vsub.f32 3.1415927, %v2484_v46  ;;  %v2675_v25 = vsel %vm5640_vm3, %v2611_v43, %v2483_v13  ;;  %v1142_v39 = vmul.f32 %v1078_v31, %v6580_v60 }
 0x3b5   : > { %v1910_v54 = vsub.f32 1.0, %v6580_v60  ;;  %v2771_v36 = vmul.f32 %v2675_v25, %v2675_v25  ;;  %v1619_v35 = vadd.f32 0.08897899, %v1555_v12  ;;  %v1620_v20 = vadd.f32 0.08897899, %v1556_v32 }
 0x3b6   : > { %v1205_v29 = vadd.f32 -0.017088126, %v1141_v8  ;;  %v3482_v61 = vpop.eup %3481  ;;  %v2676_v9 = vsel %vm5653_vm4, %v2612_v49, %v2484_v46  ;;  %v1206_v21 = vadd.f32 -0.017088126, %v1142_v39  ;;  %v5684_v7 = vmax.f32 %v1909_v41, 0.0 }
 0x3b7   : > { %v5686_v57 = vmax.f32 %v1910_v54, 0.0  ;;  %v2772_v26 = vmul.f32 %v2676_v9, %v2676_v9  ;;  %v1683_v63 = vmul.f32 %v1619_v35, %v6568_v23  ;;  %v1684_v62 = vmul.f32 %v1620_v20, %v6569_v11  ;;  %v6590_v20 = vld [vmem:[#allocation30_spill] sm:$0xff] }
 0x3b8   : > { %v2411_v52 = vmul.f32 %v3482_v61, %v5631_v44  ;;  %vm2407_vm8 = vcmp.eq.f32.partialorder %v5615_v51, 0.0  ;;  %v1269_v59 = vmul.f32 %v1205_v29, %v6579_v56  ;;  %v1270_v53 = vmul.f32 %v1206_v21, %v6580_v60 }
 0x3b9   : > { %3483 = vrsqrt.f32 %v5684_v7  ;;  %v2847_v45 = vadd.f32 %v2772_v26, %v2771_v36  ;;  %v1747_v0 = vadd.f32 -0.2145988, %v1683_v63  ;;  %v1748_v18 = vadd.f32 -0.2145988, %v1684_v62 }
 0x3ba   : > { %v2408_v5 = vand.u32 2147483648, %v5615_v51  ;;  %v6582_v27 = vclamps-f32 %v6581_v33, 1.0  ;;  %v6586_v16 = vclamps-f32 %v6585_v2, 1.0  ;;  %v2406_v47 = vsel %vm2405_vm7, %v5615_v51, %v2404_v48 }
 0x3bb   : > { %vm2412_vm11 = vcmp.eq.f32.partialorder %v5631_v44, inf  ;;  %v1333_v24 = vadd.f32 0.03089188, %v1269_v59  ;;  %v1334_v55 = vadd.f32 0.03089188, %v1270_v53  ;;  %2848 = vadd.xlane.f32.xlu0 %v2847_v45  ;;  %v1811_v10 = vmul.f32 %v1747_v0, %v6568_v23  ;;  %v6589_v23 = vld [vmem:[#allocation29_spill] sm:$0xff] }
 0x3bc   : > { %vm5698_vm9 = vcmp.lt.f32.partialorder %v6582_v27, 0.0  ;;  %vm5704_vm10 = vcmp.lt.f32.partialorder %v6586_v16, 0.0  ;;  %v1812_v46 = vmul.f32 %v1748_v18, %v6569_v11  ;;  %v2413_v43 = vsel %vm2412_vm11, %v5631_v44, %v2411_v52 }
 0x3bd   : > { %3485 = vrsqrt.f32 %v5686_v57  ;;  %vm2414_vm12 = vcmp.eq.f32.partialorder %v5631_v44, 0.0  ;;  %v2415_v31 = vand.u32 2147483648, %v5631_v44  ;;  %v1397_v41 = vmul.f32 %v1333_v24, %v6579_v56 }
 0x3be   : > { %v1398_v12 = vmul.f32 %v1334_v55, %v6580_v60  ;;  %v1875_v32 = vadd.f32 1.5707963, %v1811_v10  ;;  %v1876_v48 = vadd.f32 1.5707963, %v1812_v46  ;;  %v2409_v8 = vsel %vm2407_vm8, %v2408_v5, %v2406_v47 }
 0x3bf   : > { %v1941_v49 = vsub.f32 1.0, %v6589_v23  ;;  %v2416_v11 = vsel %vm2414_vm12, %v2415_v31, %v2413_v43  ;;  %v1461_v25 = vadd.f32 -0.050174303, %v1397_v41  ;;  %v1045_v54 = vmul.f32 -0.0012624911, %v6589_v23  ;;  %v6591_v41 = vld [vmem:[#allocation51_spill] sm:$0xff] }
 0x3c0   : > { %v1462_v39 = vadd.f32 -0.050174303, %v1398_v12  ;;  %v2515_v36 = vmul.f32 %v2409_v8, %v1875_v32  ;;  %v2516_v35 = vmul.f32 %v2416_v11, %v1876_v48  ;;  %v1046_v44 = vmul.f32 -0.0012624911, %v6590_v20  ;;  %v6595_v48 = vld [vmem:[#allocation53_spill] sm:$0xff] }
 0x3c1   : > { %v1942_v29 = vsub.f32 1.0, %v6590_v20  ;;  %v1525_v61 = vmul.f32 %v1461_v25, %v6579_v56  ;;  %v1109_v21 = vadd.f32 0.00667009, %v1045_v54  ;;  %v5728_v51 = vmax.f32 %v1941_v49, 0.0 }
 0x3c2   : > { %v1526_v9 = vmul.f32 %v1462_v39, %v6580_v60  ;;  %v2643_v26 = vsub.f32 3.1415927, %v2515_v36  ;;  %v2644_v63 = vsub.f32 3.1415927, %v2516_v35  ;;  %v1110_v62 = vadd.f32 0.00667009, %v1046_v44 }
 0x3c3   : > { %v3484_v52 = vpop.eup %3483  ;;  %v1589_v59 = vadd.f32 0.08897899, %v1525_v61  ;;  %vm2195_vm13 = vcmp.eq.f32.partialorder %v5684_v7, inf  ;;  %v1173_v45 = vmul.f32 %v1109_v21, %v6589_v23  ;;  %v5740_v46 = vmax.f32 %v1942_v29, 0.0 }
 0x3c4   : > { %v1590_v53 = vadd.f32 0.08897899, %v1526_v9  ;;  %v2707_v0 = vsel %vm5698_vm9, %v2643_v26, %v2515_v36  ;;  %v2708_v18 = vsel %vm5704_vm10, %v2644_v63, %v2516_v35  ;;  %v2194_v5 = vmul.f32 %v3484_v52, %v5684_v7  ;;  %v2715_v52 = vld [vmem:[%s3606_s28] sm:$0xff] }
 0x3c5   : > { %v1174_v33 = vmul.f32 %v1110_v62, %v6590_v20  ;;  %v2803_v27 = vmul.f32 %v2707_v0, %v2707_v0  ;;  %v2804_v2 = vmul.f32 %v2708_v18, %v2708_v18  ;;  %v1653_v16 = vmul.f32 %v1589_v59, %v6579_v56  ;;  %v2813_v59 = vpop.xlane.xlu0 %2812  ;;  %v6599_v0 = vld [vmem:[#allocation31_spill] sm:$0xff] }
 0x3c6   : > { %v1654_v47 = vmul.f32 %v1590_v53, %v6580_v60  ;;  %v1237_v55 = vadd.f32 -0.017088126, %v1173_v45  ;;  %3487 = vrsqrt.f32 %v5728_v51  ;;  %v2198_v31 = vand.u32 2147483648, %v5684_v7 }
 0x3c7   : > { %v3486_v24 = vpop.eup %3485  ;;  %v1238_v10 = vadd.f32 -0.017088126, %v1174_v33  ;;  %v2895_v28 = vadd.f32 %v2804_v2, %v2803_v27  ;;  %v1717_v13 = vadd.f32 -0.2145988, %v1653_v16  ;;  %v6592_v12 = vclamps-f32 %v6591_v41, 1.0 }
 0x3c8   : > { %v1718_v43 = vadd.f32 -0.2145988, %v1654_v47  ;;  %v6596_v8 = vclamps-f32 %v6595_v48, 1.0  ;;  %v2201_v11 = vmul.f32 %v3486_v24, %v5686_v57  ;;  %vm2202_vm0 = vcmp.eq.f32.partialorder %v5686_v57, inf }
 0x3c9   : > { %vm5746_vm14 = vcmp.lt.f32.partialorder %v6592_v12, 0.0  ;;  %v1301_v25 = vmul.f32 %v1237_v55, %v6589_v23  ;;  %v1302_v39 = vmul.f32 %v1238_v10, %v6590_v20  ;;  %2896 = vadd.xlane.f32.xlu0 %v2895_v28  ;;  %v1781_v54 = vmul.f32 %v1717_v13, %v6579_v56 }
 0x3ca   : > { %vm5752_vm15 = vcmp.lt.f32.partialorder %v6596_v8, 0.0  ;;  %v1782_v36 = vmul.f32 %v1718_v43, %v6580_v60  ;;  %v2196_v35 = vsel %vm2195_vm13, %v5684_v7, %v2194_v5  ;;  %v2205_v44 = vand.u32 2147483648, %v5686_v57 }
 0x3cb   : > { %v2203_v29 = vsel %vm2202_vm0, %v5686_v57, %v2201_v11  ;;  %v1365_v61 = vadd.f32 0.03089188, %v1301_v25  ;;  %v1366_v9 = vadd.f32 0.03089188, %v1302_v39  ;;  %3489 = vrsqrt.f32 %v5740_v46 }
 0x3cc   : > { %v1845_v21 = vadd.f32 1.5707963, %v1781_v54  ;;  %v1846_v26 = vadd.f32 1.5707963, %v1782_v36  ;;  %vm2197_vm1 = vcmp.eq.f32.partialorder %v5684_v7, 0.0  ;;  %vm2204_vm2 = vcmp.eq.f32.partialorder %v5686_v57, 0.0 }
 0x3cd   : > { %v2199_v56 = vsel %vm2197_vm1, %v2198_v31, %v2196_v35  ;;  %v2206_v60 = vsel %vm2204_vm2, %v2205_v44, %v2203_v29  ;;  %v1429_v63 = vmul.f32 %v1365_v61, %v6589_v23  ;;  %v1430_v62 = vmul.f32 %v1366_v9, %v6590_v20  ;;  %v2864_v61 = vpop.xlane.xlu1 %2863 }
 0x3ce   : > { %v2485_v53 = vmul.f32 %v2199_v56, %v1845_v21  ;;  %v2486_v45 = vmul.f32 %v2206_v60, %v1846_v26  ;;  %v1015_v18 = vmul.f32 -0.0012624911, %v6599_v0  ;;  %v1016_v5 = vmul.f32 -0.0012624911, %v4985_v14 }
 0x3cf   : > { %v1493_v33 = vadd.f32 -0.050174303, %v1429_v63  ;;  %v1494_v27 = vadd.f32 -0.050174303, %v1430_v62  ;;  %v1911_v7 = vsub.f32 1.0, %v6599_v0  ;;  %v1912_v57 = vsub.f32 1.0, %v4985_v14 }
 0x3d0   : > { %v2613_v2 = vsub.f32 3.1415927, %v2485_v53  ;;  %v2614_v16 = vsub.f32 3.1415927, %v2486_v45  ;;  %v1079_v47 = vadd.f32 0.00667009, %v1015_v18  ;;  %v5777_v24 = vadd.f32 %v2813_v59, %v2715_v52  ;;  %v3488_v55 = vpop.eup %3487 }
 0x3d1   : > { %v1557_v10 = vmul.f32 %v1493_v33, %v6589_v23  ;;  %v1558_v28 = vmul.f32 %v1494_v27, %v6590_v20  ;;  %v1080_v13 = vadd.f32 0.00667009, %v1016_v5  ;;  %v5781_v43 = vmax.f32 %v1911_v7, 0.0  ;;  %v6600_v62 = vld [vmem:[#allocation52_spill] sm:$0xff] }
 0x3d2   : > { %v2677_v31 = vsel %vm5746_vm14, %v2613_v2, %v2485_v53  ;;  %v2678_v41 = vsel %vm5752_vm15, %v2614_v16, %v2486_v45  ;;  %v2418_v12 = vmul.f32 %v3488_v55, %v5728_v51  ;;  %v1143_v48 = vmul.f32 %v1079_v47, %v6599_v0  ;;  %v6604_v53 = vld [vmem:[#allocation54_spill] sm:$0xff]  ;;  %v2861_v47 = vpop.xlane.xlu0 %2860 }
 0x3d3   : > { %v2773_v8 = vmul.f32 %v2677_v31, %v2677_v31  ;;  %v2774_v11 = vmul.f32 %v2678_v41, %v2678_v41  ;;  %v1621_v25 = vadd.f32 0.08897899, %v1557_v10  ;;  %v1622_v39 = vadd.f32 0.08897899, %v1558_v28 }
 0x3d4   : > { %vm2419_vm3 = vcmp.eq.f32.partialorder %v5728_v51, inf  ;;  %vm2421_vm4 = vcmp.eq.f32.partialorder %v5728_v51, 0.0  ;;  %v1144_v54 = vmul.f32 %v1080_v13, %v4985_v14  ;;  %v1207_v36 = vadd.f32 -0.017088126, %v1143_v48 }
 0x3d5   : > { %v3490_v32 = vpop.eup %3489  ;;  %v2850_v35 = vadd.f32 %v2774_v11, %v2773_v8  ;;  %v1685_v49 = vmul.f32 %v1621_v25, %v6589_v23  ;;  %v1686_v44 = vmul.f32 %v1622_v39, %v6590_v20  ;;  %v5794_v29 = vmax.f32 %v1912_v57, 0.0 }
 0x3d6   : > { %v2425_v9 = vmul.f32 %v3490_v32, %v5740_v46  ;;  %v1208_v21 = vadd.f32 -0.017088126, %v1144_v54  ;;  %v1271_v26 = vmul.f32 %v1207_v36, %v6599_v0  ;;  %3491 = vrsqrt.f32 %v5781_v43 }
 0x3d7   : > { %2851 = vadd.xlane.f32.xlu1 %v2850_v35  ;;  %v1749_v56 = vadd.f32 -0.2145988, %v1685_v49  ;;  %v1750_v60 = vadd.f32 -0.2145988, %v1686_v44  ;;  %v2420_v63 = vsel %vm2419_vm3, %v5728_v51, %v2418_v12  ;;  %vm2426_vm5 = vcmp.eq.f32.partialorder %v5740_v46, inf  ;;  %v2732_v12 = vld [vmem:[%s3606_s28 + $0x88] sm:$0xff] }
 0x3d8   : > { %v6601_v52 = vclamps-f32 %v6600_v62, 1.0  ;;  %v6605_v45 = vclamps-f32 %v6604_v53, 1.0  ;;  %v2422_v5 = vand.u32 2147483648, %v5728_v51  ;;  %v2427_v33 = vsel %vm2426_vm5, %v5740_v46, %v2425_v9  ;;  %v2731_v53 = vld [vmem:[%s3606_s28 + $0x80] sm:$0xff] }
 0x3d9   : > { %v1272_v27 = vmul.f32 %v1208_v21, %v4985_v14  ;;  %v1335_v7 = vadd.f32 0.03089188, %v1271_v26  ;;  %v1813_v57 = vmul.f32 %v1749_v56, %v6589_v23  ;;  %v1814_v2 = vmul.f32 %v1750_v60, %v6590_v20  ;;  %v5828_v20 = vpop.xlane.xlu1 %2818  ;;  %v2816_v26 = vpop.xlane.xlu0 %2815 }
 0x3da   : > { %vm5805_vm6 = vcmp.lt.f32.partialorder %v6601_v52, 0.0  ;;  %vm5811_vm7 = vcmp.lt.f32.partialorder %v6605_v45, 0.0  ;;  %v2429_v16 = vand.u32 2147483648, %v5740_v46  ;;  %3493 = vrsqrt.f32 %v5794_v29 }
 0x3db   : > { %v2423_v55 = vsel %vm2421_vm4, %v2422_v5, %v2420_v63  ;;  %vm2428_vm8 = vcmp.eq.f32.partialorder %v5740_v46, 0.0  ;;  %v1336_v10 = vadd.f32 0.03089188, %v1272_v27  ;;  %v1399_v28 = vmul.f32 %v1335_v7, %v6599_v0 }
 0x3dc   : > { %v1877_v13 = vadd.f32 1.5707963, %v1813_v57  ;;  %v1878_v31 = vadd.f32 1.5707963, %v1814_v2  ;;  %v2430_v41 = vsel %vm2428_vm8, %v2429_v16, %v2427_v33  ;;  %v1943_v23 = vsub.f32 1.0, %v4981_v22 }
 0x3dd   : > { %v1400_v48 = vmul.f32 %v1336_v10, %v4985_v14  ;;  %v1463_v8 = vadd.f32 -0.050174303, %v1399_v28  ;;  %v1047_v11 = vmul.f32 -0.0012624911, %v4981_v22  ;;  %v1048_v51 = vmul.f32 -0.0012624911, %v4989_v34  ;;  %v5851_v27 = vpop.xlane.xlu1 %2821 }
 0x3de   : > { %v2517_v25 = vmul.f32 %v2423_v55, %v1877_v13  ;;  %v2518_v46 = vmul.f32 %v2430_v41, %v1878_v31  ;;  %v1944_v39 = vsub.f32 1.0, %v4989_v34  ;;  %v5834_v54 = vmax.f32 %v1943_v23, 0.0  ;;  %v6608_v41 = vld [vmem:[#allocation55_spill] sm:$0xff] }
 0x3df   : > { %v1464_v36 = vadd.f32 -0.050174303, %v1400_v48  ;;  %v1527_v32 = vmul.f32 %v1463_v8, %v6599_v0  ;;  %v1111_v35 = vadd.f32 0.00667009, %v1047_v11  ;;  %v1112_v49 = vadd.f32 0.00667009, %v1048_v51  ;;  %v5869_v51 = vpop.xlane.xlu0 %2866 }
 0x3e0   : > { %v2645_v44 = vsub.f32 3.1415927, %v2517_v25  ;;  %v2646_v9 = vsub.f32 3.1415927, %v2518_v46  ;;  %3495 = vrsqrt.f32 %v5834_v54  ;;  %v5838_v21 = vadd.f32 %v2864_v61, %v2732_v12  ;;  %v3492_v56 = vpop.eup %3491 }
 0x3e1   : > { %v1528_v60 = vmul.f32 %v1464_v36, %v4985_v14  ;;  %v1591_v63 = vadd.f32 0.08897899, %v1527_v32  ;;  %v1175_v62 = vmul.f32 %v1111_v35, %v4981_v22  ;;  %v1176_v52 = vmul.f32 %v1112_v49, %v4989_v34  ;;  %v2716_v36 = vld [vmem:[%s3606_s28 + $0x8] sm:$0xff] }
 0x3e2   : > { %v2709_v45 = vsel %vm5805_vm6, %v2645_v44, %v2517_v25  ;;  %v2710_v5 = vsel %vm5811_vm7, %v2646_v9, %v2518_v46  ;;  %v2208_v33 = vmul.f32 %v3492_v56, %v5781_v43  ;;  %v5849_v61 = vmax.f32 %v1944_v39, 0.0  ;;  %v5883_v56 = vpop.xlane.xlu1 %2869 }
 0x3e3   : > { %v2805_v7 = vmul.f32 %v2709_v45, %v2709_v45  ;;  %v2806_v57 = vmul.f32 %v2710_v5, %v2710_v5  ;;  %v1592_v2 = vadd.f32 0.08897899, %v1528_v60  ;;  %v1655_v16 = vmul.f32 %v1591_v63, %v6599_v0 }
 0x3e4   : > { %v3494_v55 = vpop.eup %3493  ;;  %vm2209_vm9 = vcmp.eq.f32.partialorder %v5781_v43, inf  ;;  %v1239_v10 = vadd.f32 -0.017088126, %v1175_v62  ;;  %v1240_v59 = vadd.f32 -0.017088126, %v1176_v52  ;;  %v5855_v28 = vadd.f32 %v2861_v47, %v2731_v53 }
 0x3e5   : > { %v2898_v18 = vadd.f32 %v2806_v57, %v2805_v7  ;;  %v1656_v13 = vmul.f32 %v1592_v2, %v4985_v14  ;;  %v1719_v31 = vadd.f32 -0.2145988, %v1655_v16  ;;  %vm2211_vm10 = vcmp.eq.f32.partialorder %v5781_v43, 0.0 }
 0x3e6   : > { %v6609_v23 = vclamps-f32 %v6608_v41, 1.0  ;;  %v2210_v48 = vsel %vm2209_vm9, %v5781_v43, %v2208_v33  ;;  %v2215_v8 = vmul.f32 %v3494_v55, %v5794_v29  ;;  %v1303_v47 = vmul.f32 %v1239_v10, %v4981_v22  ;;  %v5897_v55 = vpop.xlane.xlu0 %2824 }
 0x3e7   : > { %v1304_v11 = vmul.f32 %v1240_v59, %v4989_v34  ;;  %2899 = vadd.xlane.f32.xlu1 %v2898_v18  ;;  %v1720_v25 = vadd.f32 -0.2145988, %v1656_v13  ;;  %v1783_v46 = vmul.f32 %v1719_v31, %v6599_v0  ;;  %v2212_v39 = vand.u32 2147483648, %v5781_v43 }
 0x3e8   : > { %vm5861_vm11 = vcmp.lt.f32.partialorder %v6609_v23, 0.0  ;;  %3497 = vrsqrt.f32 %v5849_v61  ;;  %v6612_v32 = vclamps-f32 %v4257_v58, 1.0  ;;  %vm2216_vm13 = vcmp.eq.f32.partialorder %v5794_v29, inf  ;;  %v5904_v23 = vpop.xlane.xlu1 %2827 }
 0x3e9   : > { %v2219_v49 = vand.u32 2147483648, %v5794_v29  ;;  %v1367_v44 = vadd.f32 0.03089188, %v1303_v47  ;;  %v1368_v9 = vadd.f32 0.03089188, %v1304_v11  ;;  %v1784_v0 = vmul.f32 %v1720_v25, %v4985_v14 }
 0x3ea   : > { %vm5877_vm12 = vcmp.lt.f32.partialorder %v6612_v32, 0.0  ;;  %v1847_v60 = vadd.f32 1.5707963, %v1783_v46  ;;  %v2213_v63 = vsel %vm2211_vm10, %v2212_v39, %v2210_v48  ;;  %v2217_v58 = vsel %vm2216_vm13, %v5794_v29, %v2215_v8  ;;  %v3496_v62 = vpop.eup %3495 }
 0x3eb   : > { %v1431_v52 = vmul.f32 %v1367_v44, %v4981_v22  ;;  %v1432_v53 = vmul.f32 %v1368_v9, %v4989_v34  ;;  %v1017_v45 = vmul.f32 -0.0012624911, %v5204_v19  ;;  %v1018_v5 = vmul.f32 -0.0012624911, %v5620_v17 }
 0x3ec   : > { %v1848_v33 = vadd.f32 1.5707963, %v1784_v0  ;;  %vm2218_vm14 = vcmp.eq.f32.partialorder %v5794_v29, 0.0  ;;  %v2487_v7 = vmul.f32 %v2213_v63, %v1847_v60  ;;  %v5894_v14 = vadd.f32 %v2816_v26, %v2716_v36 }
 0x3ed   : > { %v2220_v57 = vsel %vm2218_vm14, %v2219_v49, %v2217_v58  ;;  %v1495_v43 = vadd.f32 -0.050174303, %v1431_v52  ;;  %v1496_v2 = vadd.f32 -0.050174303, %v1432_v53  ;;  %vm2433_vm15 = vcmp.eq.f32.partialorder %v5834_v54, inf }
 0x3ee   : > { %v1081_v16 = vadd.f32 0.00667009, %v1017_v45  ;;  %v2488_v10 = vmul.f32 %v2220_v57, %v1848_v33  ;;  %v2615_v59 = vsub.f32 3.1415927, %v2487_v7  ;;  %v1082_v18 = vadd.f32 0.00667009, %v1018_v5 }
 0x3ef   : > { %v1913_v13 = vsub.f32 1.0, %v5204_v19  ;;  %v1559_v31 = vmul.f32 %v1495_v43, %v4981_v22  ;;  %v1560_v29 = vmul.f32 %v1496_v2, %v4989_v34  ;;  %v2432_v26 = vmul.f32 %v3496_v62, %v5834_v54  ;;  %v5919_v62 = vpop.xlane.xlu0 %2872 }
 0x3f0   : > { %v1145_v41 = vmul.f32 %v1081_v16, %v5204_v19  ;;  %v2616_v48 = vsub.f32 3.1415927, %v2488_v10  ;;  %v2679_v8 = vsel %vm5861_vm11, %v2615_v59, %v2487_v7  ;;  %v1146_v47 = vmul.f32 %v1082_v18, %v5620_v17  ;;  %v5926_v7 = vpop.xlane.xlu1 %2875 }
 0x3f1   : > { %v1914_v11 = vsub.f32 1.0, %v5620_v17  ;;  %v2775_v25 = vmul.f32 %v2679_v8, %v2679_v8  ;;  %v1623_v46 = vadd.f32 0.08897899, %v1559_v31  ;;  %v1624_v39 = vadd.f32 0.08897899, %v1560_v29 }
 0x3f2   : > { %v1209_v36 = vadd.f32 -0.017088126, %v1145_v41  ;;  %v3498_v32 = vpop.eup %3497  ;;  %v2680_v49 = vsel %vm5877_vm12, %v2616_v48, %v2488_v10  ;;  %v1210_v44 = vadd.f32 -0.017088126, %v1146_v47  ;;  %v5912_v9 = vmax.f32 %v1913_v13, 0.0 }
 0x3f3   : > { %v5914_v0 = vmax.f32 %v1914_v11, 0.0  ;;  %v2776_v60 = vmul.f32 %v2680_v49, %v2680_v49  ;;  %v1687_v12 = vmul.f32 %v1623_v46, %v4981_v22  ;;  %v1688_v63 = vmul.f32 %v1624_v39, %v4989_v34  ;;  %v5956_v47 = vpop.xlane.xlu0 %2830 }
 0x3f4   : > { %v2439_v58 = vmul.f32 %v3498_v32, %v5849_v61  ;;  %vm2435_vm0 = vcmp.eq.f32.partialorder %v5834_v54, 0.0  ;;  %v1273_v52 = vmul.f32 %v1209_v36, %v5204_v19  ;;  %v1274_v35 = vmul.f32 %v1210_v44, %v5620_v17 }
 0x3f5   : > { %3499 = vrsqrt.f32 %v5912_v9  ;;  %v2853_v53 = vadd.f32 %v2776_v60, %v2775_v25  ;;  %v1751_v45 = vadd.f32 -0.2145988, %v1687_v12  ;;  %v1752_v5 = vadd.f32 -0.2145988, %v1688_v63 }
 0x3f6   : > { %v2436_v33 = vand.u32 2147483648, %v5834_v54  ;;  %v6615_v57 = vclamps-f32 %v4247_v30, 1.0  ;;  %v6618_v2 = vclamps-f32 %v6439_v38, 1.0  ;;  %v2434_v10 = vsel %vm2433_vm15, %v5834_v54, %v2432_v26  ;;  %v5962_v54 = vpop.xlane.xlu1 %2833 }
 0x3f7   : > { %vm2440_vm3 = vcmp.eq.f32.partialorder %v5849_v61, inf  ;;  %v1337_v59 = vadd.f32 0.03089188, %v1273_v52  ;;  %v1338_v18 = vadd.f32 0.03089188, %v1274_v35  ;;  %2854 = vadd.xlane.f32.xlu0 %v2853_v53  ;;  %v1815_v30 = vmul.f32 %v1751_v45, %v4981_v22 }
 0x3f8   : > { %vm5930_vm1 = vcmp.lt.f32.partialorder %v6615_v57, 0.0  ;;  %vm5936_vm2 = vcmp.lt.f32.partialorder %v6618_v2, 0.0  ;;  %v1816_v13 = vmul.f32 %v1752_v5, %v4989_v34  ;;  %v2441_v38 = vsel %vm2440_vm3, %v5849_v61, %v2439_v58  ;;  %v2717_v34 = vld [vmem:[%s3606_s28 + $0x10] sm:$0xff] }
 0x3f9   : > { %3501 = vrsqrt.f32 %v5914_v0  ;;  %vm2442_vm4 = vcmp.eq.f32.partialorder %v5849_v61, 0.0  ;;  %v2443_v31 = vand.u32 2147483648, %v5849_v61  ;;  %v1401_v29 = vmul.f32 %v1337_v59, %v5204_v19 }
 0x3fa   : > { %v1402_v26 = vmul.f32 %v1338_v18, %v5620_v17  ;;  %v1879_v41 = vadd.f32 1.5707963, %v1815_v30  ;;  %v1880_v48 = vadd.f32 1.5707963, %v1816_v13  ;;  %v2437_v8 = vsel %vm2435_vm0, %v2436_v33, %v2434_v10 }
 0x3fb   : > { %v1945_v22 = vsub.f32 1.0, %v5456_v3  ;;  %v2444_v11 = vsel %vm2442_vm4, %v2443_v31, %v2441_v38  ;;  %v1465_v25 = vadd.f32 -0.050174303, %v1401_v29  ;;  %v1049_v39 = vmul.f32 -0.0012624911, %v5456_v3 }
 0x3fc   : > { %v1466_v46 = vadd.f32 -0.050174303, %v1402_v26  ;;  %v2519_v61 = vmul.f32 %v2437_v8, %v1879_v41  ;;  %v2520_v36 = vmul.f32 %v2444_v11, %v1880_v48  ;;  %vm2223_vm5 = vcmp.eq.f32.partialorder %v5912_v9, inf  ;;  %v2733_v26 = vld [vmem:[%s3606_s28 + $0x90] sm:$0xff]  ;;  %v2718_v41 = vld [vmem:[%s3606_s28 + $0x18] sm:$0xff] }
 0x3fd   : > { %v2226_v32 = vand.u32 2147483648, %v5912_v9  ;;  %v1050_v49 = vmul.f32 -0.0012624911, %v5669_v4  ;;  %v1529_v44 = vmul.f32 %v1465_v25, %v5204_v19  ;;  %vm2230_vm6 = vcmp.eq.f32.partialorder %v5914_v0, inf }
 0x3fe   : > { %v1530_v60 = vmul.f32 %v1466_v46, %v5620_v17  ;;  %v1113_v12 = vadd.f32 0.00667009, %v1049_v39  ;;  %v1946_v63 = vsub.f32 1.0, %v5669_v4  ;;  %v2647_v58 = vsub.f32 3.1415927, %v2519_v61 }
 0x3ff   : > { %v2648_v52 = vsub.f32 3.1415927, %v2520_v36  ;;  %v1114_v35 = vadd.f32 0.00667009, %v1050_v49  ;;  %v5969_v53 = vadd.f32 %v5828_v20, %v2717_v34  ;;  %v3500_v45 = vpop.eup %3499  ;;  %v1593_v5 = vadd.f32 0.08897899, %v1529_v44  ;;  %v5980_v20 = vpop.xlane.xlu0 %2878 }
 0x400   : > { %v1594_v33 = vadd.f32 0.08897899, %v1530_v60  ;;  %v1177_v57 = vmul.f32 %v1113_v12, %v5456_v3  ;;  %v5972_v2 = vmax.f32 %v1945_v22, 0.0  ;;  %v2711_v10 = vsel %vm5930_vm1, %v2647_v58, %v2519_v61  ;;  %v5989_v34 = vpop.xlane.xlu1 %2881  ;;  %v2734_v58 = vld [vmem:[%s3606_s28 + $0x98] sm:$0xff]  ;;  %v2724_v61 = vld [vmem:[%s3606_s28 + $0x48] sm:$0xff] }
 0x401   : > { %v2712_v59 = vsel %vm5936_vm2, %v2648_v52, %v2520_v36  ;;  %v2222_v18 = vmul.f32 %v3500_v45, %v5912_v9  ;;  %v1178_v30 = vmul.f32 %v1114_v35, %v5669_v4  ;;  %v2807_v13 = vmul.f32 %v2711_v10, %v2711_v10  ;;  %v2735_v45 = vld [vmem:[%s3606_s28 + $0xa0] sm:$0xff]  ;;  %v2740_v36 = vld [vmem:[%s3606_s28 + $0xc8] sm:$0xff] }
 0x402   : > { %v2808_v38 = vmul.f32 %v2712_v59, %v2712_v59  ;;  %v1657_v31 = vmul.f32 %v1593_v5, %v5204_v19  ;;  %v1658_v29 = vmul.f32 %v1594_v33, %v5620_v17  ;;  %v2233_v43 = vand.u32 2147483648, %v5914_v0 }
 0x403   : > { %v3502_v48 = vpop.eup %3501  ;;  %v1241_v8 = vadd.f32 -0.017088126, %v1177_v57  ;;  %v1242_v16 = vadd.f32 -0.017088126, %v1178_v30  ;;  %v5987_v22 = vmax.f32 %v1946_v63, 0.0  ;;  %3503 = vrsqrt.f32 %v5972_v2  ;;  %v2736_v30 = vld [vmem:[%s3606_s28 + $0xa8] sm:$0xff] }
 0x404   : > { %v2901_v11 = vadd.f32 %v2808_v38, %v2807_v13  ;;  %v1721_v25 = vadd.f32 -0.2145988, %v1657_v31  ;;  %v1722_v46 = vadd.f32 -0.2145988, %v1658_v29  ;;  %v6621_v39 = vclamps-f32 %v4275_v40, 1.0  ;;  %v2840_v13 = vpop.xlane.xlu1 %2839  ;;  %v2737_v31 = vld [vmem:[%s3606_s28 + $0xb0] sm:$0xff] }
 0x405   : > { %vm6000_vm8 = vcmp.lt.f32.partialorder %v3095_v37, 0.0  ;;  %v2229_v49 = vmul.f32 %v3502_v48, %v5914_v0  ;;  %v1305_v44 = vmul.f32 %v1241_v8, %v5456_v3  ;;  %v1306_v60 = vmul.f32 %v1242_v16, %v5669_v4  ;;  %v2738_v8 = vld [vmem:[%s3606_s28 + $0xb8] sm:$0xff]  ;;  %v2739_v16 = vld [vmem:[%s3606_s28 + $0xc0] sm:$0xff] }
 0x406   : > { %vm5994_vm7 = vcmp.lt.f32.partialorder %v6621_v39, 0.0  ;;  %v2925_v40 = vadd.f32 %v5869_v51, %v2733_v26  ;;  %2902 = vadd.xlane.f32.xlu0 %v2901_v11  ;;  %v1785_v12 = vmul.f32 %v1721_v25, %v5204_v19  ;;  %v1786_v63 = vmul.f32 %v1722_v46, %v5620_v17  ;;  %v2719_v19 = vld [vmem:[%s3606_s28 + $0x20] sm:$0xff]  ;;  %v2837_v17 = vpop.xlane.xlu0 %2836 }
 0x407   : > { %v2224_v42 = vsel %vm2223_vm5, %v5912_v9, %v2222_v18  ;;  %v2910_v37 = vadd.f32 %v5851_v27, %v2718_v41  ;;  %v2231_v52 = vsel %vm2230_vm6, %v5914_v0, %v2229_v49  ;;  %v1369_v35 = vadd.f32 0.03089188, %v1305_v44  ;;  %v2720_v18 = vld [vmem:[%s3606_s28 + $0x28] sm:$0xff] }
 0x408   : > { %v1370_v51 = vadd.f32 0.03089188, %v1306_v60  ;;  %3505 = vrsqrt.f32 %v5987_v22  ;;  %v1849_v5 = vadd.f32 1.5707963, %v1785_v12  ;;  %v1850_v33 = vadd.f32 1.5707963, %v1786_v63  ;;  %v2888_v60 = vpop.xlane.xlu1 %2887 }
 0x409   : > { %vm2225_vm9 = vcmp.eq.f32.partialorder %v5912_v9, 0.0  ;;  %vm2232_vm10 = vcmp.eq.f32.partialorder %v5914_v0, 0.0  ;;  %v1433_v10 = vmul.f32 %v1369_v35, %v5456_v3  ;;  %vm2939_vm11 = vcmask 7168  }
 0x40a   : > { %v2227_v27 = vsel %vm2225_vm9, %v2226_v32, %v2224_v42  ;;  %v2234_v57 = vsel %vm2232_vm10, %v2233_v43, %v2231_v52  ;;  %v1434_v59 = vmul.f32 %v1370_v51, %v5669_v4  ;;  %v2926_v0 = vadd.f32 %v5883_v56, %v2734_v58  ;;  %v2721_v32 = vld [vmem:[%s3606_s28 + $0x30] sm:$0xff]  ;;  %2940 = vst.msk [vmem:[%s3606_s28] sm:$0xff] %vm2939_vm11, %v5777_v24  ;;  %v2722_v56 = vld [vmem:[%s3606_s28 + $0x38] sm:$0xff] }
 0x40b   : > { %v2489_v38 = vmul.f32 %v2227_v27, %v1849_v5  ;;  %v2490_v9 = vmul.f32 %v2234_v57, %v1850_v33  ;;  %v1497_v29 = vadd.f32 -0.050174303, %v1433_v10  ;;  %2957 = vst.msk [vmem:[%s3606_s28 + $0x88] sm:$0xff] %vm2939_vm11, %v5838_v21  ;;  %2956 = vst.msk [vmem:[%s3606_s28 + $0x80] sm:$0xff] %vm2939_vm11, %v5855_v28  ;;  %v2911_v24 = vadd.f32 %v5897_v55, %v2719_v19 }
 0x40c   : > { %v1498_v26 = vadd.f32 -0.050174303, %v1434_v59  ;;  %2941 = vst.msk [vmem:[%s3606_s28 + $0x8] sm:$0xff] %vm2939_vm11, %v5894_v14  ;;  %2942 = vst.msk [vmem:[%s3606_s28 + $0x10] sm:$0xff] %vm2939_vm11, %v5969_v53  ;;  %v2927_v21 = vadd.f32 %v5919_v62, %v2735_v45  ;;  %v2912_v14 = vadd.f32 %v5904_v23, %v2720_v18  ;;  %v2928_v53 = vadd.f32 %v5926_v7, %v2736_v30  ;;  %v2723_v23 = vld [vmem:[%s3606_s28 + $0x40] sm:$0xff]  ;;  %v2885_v7 = vpop.xlane.xlu0 %2884 }
 0x40d   : > { %2958 = vst.msk [vmem:[%s3606_s28 + $0x90] sm:$0xff] %vm2939_vm11, %v2925_v40  ;;  %2943 = vst.msk [vmem:[%s3606_s28 + $0x18] sm:$0xff] %vm2939_vm11, %v2910_v37  ;;  %v2617_v28 = vsub.f32 3.1415927, %v2489_v38  ;;  %v2618_v41 = vsub.f32 3.1415927, %v2490_v9  ;;  %v1561_v48 = vmul.f32 %v1497_v29, %v5456_v3  ;;  %v2913_v55 = vadd.f32 %v5956_v47, %v2721_v32  ;;  %v3504_v11 = vpop.eup %3503 }
 0x40e   : > { %2959 = vst.msk [vmem:[%s3606_s28 + $0x98] sm:$0xff] %vm2939_vm11, %v2926_v0  ;;  %v1562_v43 = vmul.f32 %v1498_v26, %v5669_v4  ;;  %2944 = vst.msk [vmem:[%s3606_s28 + $0x20] sm:$0xff] %vm2939_vm11, %v2911_v24  ;;  %v2929_v62 = vadd.f32 %v5980_v20, %v2737_v31  ;;  %v2914_v47 = vadd.f32 %v5962_v54, %v2722_v56  ;;  %vm2447_vm12 = vcmp.eq.f32.partialorder %v5972_v2, inf }
 0x40f   : > { %2960 = vst.msk [vmem:[%s3606_s28 + $0xa0] sm:$0xff] %vm2939_vm11, %v2927_v21  ;;  %v2681_v25 = vsel %vm5994_vm7, %v2617_v28, %v2489_v38  ;;  %v2682_v46 = vsel %vm6000_vm8, %v2618_v41, %v2490_v9  ;;  %2945 = vst.msk [vmem:[%s3606_s28 + $0x28] sm:$0xff] %vm2939_vm11, %v2912_v14  ;;  %v1625_v49 = vadd.f32 0.08897899, %v1561_v48  ;;  %v2930_v40 = vadd.f32 %v5989_v34, %v2738_v8  ;;  %v2741_v21 = vld [vmem:[%s3606_s28 + $0xd0] sm:$0xff] }
 0x410   : > { %2961 = vst.msk [vmem:[%s3606_s28 + $0xa8] sm:$0xff] %vm2939_vm11, %v2928_v53  ;;  %v2777_v20 = vmul.f32 %v2681_v25, %v2681_v25  ;;  %v2778_v39 = vmul.f32 %v2682_v46, %v2682_v46  ;;  %v1626_v44 = vadd.f32 0.08897899, %v1562_v43  ;;  %2946 = vst.msk [vmem:[%s3606_s28 + $0x30] sm:$0xff] %vm2939_vm11, %v2913_v55  ;;  %v2915_v12 = vadd.f32 %v2837_v17, %v2723_v23  ;;  %v2725_v17 = vld [vmem:[%s3606_s28 + $0x50] sm:$0xff]  ;;  %v2843_v18 = vpop.xlane.xlu0 %2842  ;;  %v2727_v53 = vld [vmem:[%s3606_s28 + $0x60] sm:$0xff] }
 0x411   : > { %2962 = vst.msk [vmem:[%s3606_s28 + $0xb0] sm:$0xff] %vm2939_vm11, %v2929_v62  ;;  %2947 = vst.msk [vmem:[%s3606_s28 + $0x38] sm:$0xff] %vm2939_vm11, %v2914_v47  ;;  %v2931_v54 = vadd.f32 %v2885_v7, %v2739_v16  ;;  %v1689_v37 = vmul.f32 %v1625_v49, %v5456_v3  ;;  %v2446_v52 = vmul.f32 %v3504_v11, %v5972_v2  ;;  %vm2454_vm13 = vcmp.eq.f32.partialorder %v5987_v22, inf  ;;  %v2743_v55 = vld [vmem:[%s3606_s28 + $0xe0] sm:$0xff]  ;;  %v2728_v23 = vld [vmem:[%s3606_s28 + $0x68] sm:$0xff] }
 0x412   : > { %v3506_v63 = vpop.eup %3505  ;;  %v2856_v42 = vadd.f32 %v2778_v39, %v2777_v20  ;;  %v1690_v58 = vmul.f32 %v1626_v44, %v5669_v4  ;;  %2963 = vst.msk [vmem:[%s3606_s28 + $0xb8] sm:$0xff] %vm2939_vm11, %v2930_v40  ;;  %2948 = vst.msk [vmem:[%s3606_s28 + $0x40] sm:$0xff] %vm2939_vm11, %v2915_v12  ;;  %v2916_v34 = vadd.f32 %v2840_v13, %v2724_v61  ;;  %vm2449_vm14 = vcmp.eq.f32.partialorder %v5972_v2, 0.0  ;;  %v2744_v11 = vld [vmem:[%s3606_s28 + $0xe8] sm:$0xff]  ;;  %v2729_v47 = vld [vmem:[%s3606_s28 + $0x70] sm:$0xff] }
 0x413   : > { %v2453_v35 = vmul.f32 %v3506_v63, %v5987_v22  ;;  %2964 = vst.msk [vmem:[%s3606_s28 + $0xc0] sm:$0xff] %vm2939_vm11, %v2931_v54  ;;  %v2932_v51 = vadd.f32 %v2888_v60, %v2740_v36  ;;  %v1753_v19 = vadd.f32 -0.2145988, %v1689_v37  ;;  %v2448_v27 = vsel %vm2447_vm12, %v5972_v2, %v2446_v52  ;;  %v2745_v49 = vld [vmem:[%s3606_s28 + $0xf0] sm:$0xff]  ;;  %v2730_v36 = vld [vmem:[%s3606_s28 + $0x78] sm:$0xff] }
 0x414   : > { %2857 = vadd.xlane.f32.xlu1 %v2856_v42  ;;  %v1754_v45 = vadd.f32 -0.2145988, %v1690_v58  ;;  %2949 = vst.msk [vmem:[%s3606_s28 + $0x48] sm:$0xff] %vm2939_vm11, %v2916_v34  ;;  %v2450_v10 = vand.u32 2147483648, %v5972_v2  ;;  %v2457_v59 = vand.u32 2147483648, %v5987_v22  ;;  %vm2456_vm15 = vcmp.eq.f32.partialorder %v5987_v22, 0.0 }
 0x415   : > { %2965 = vst.msk [vmem:[%s3606_s28 + $0xc8] sm:$0xff] %vm2939_vm11, %v2932_v51  ;;  %v1817_v5 = vmul.f32 %v1753_v19, %v5456_v3  ;;  %v2455_v57 = vsel %vm2454_vm13, %v5987_v22, %v2453_v35  ;;  %v2917_v3 = vadd.f32 %v2843_v18, %v2725_v17  ;;  %vm2585_vm0 = vcmp.lt.f32.partialorder %v3126_v1, 0.0  ;;  %v2746_v12 = vld [vmem:[%s3606_s28 + $0xf8] sm:$0xff] }
 0x416   : > { %v1818_v33 = vmul.f32 %v1754_v45, %v5669_v4  ;;  %v2451_v38 = vsel %vm2449_vm14, %v2450_v10, %v2448_v27  ;;  %v2458_v9 = vsel %vm2456_vm15, %v2457_v59, %v2455_v57  ;;  %vm2586_vm1 = vcmp.lt.f32.partialorder %v3127_v50, 0.0  ;;  %v2742_v50 = vld [vmem:[%s3606_s28 + $0xd8] sm:$0xff] }
 0x417   : > { %v1881_v30 = vadd.f32 1.5707963, %v1817_v5  ;;  %2950 = vst.msk [vmem:[%s3606_s28 + $0x50] sm:$0xff] %vm2939_vm11, %v2917_v3 }
 0x418   : > { %v1882_v13 = vadd.f32 1.5707963, %v1818_v33 }
 0x419   : > { %v2521_v4 = vmul.f32 %v2451_v38, %v1881_v30 }
 0x41a   : > { %v2522_v0 = vmul.f32 %v2458_v9, %v1882_v13  ;;  %v2891_v56 = vpop.xlane.xlu0 %2890 }
 0x41b   : > { %v2649_v32 = vsub.f32 3.1415927, %v2521_v4  ;;  %v2933_v28 = vadd.f32 %v2891_v56, %v2741_v21 }
 0x41c   : > { %v2650_v31 = vsub.f32 3.1415927, %v2522_v0 }
 0x41d   : > { %v2713_v2 = vsel %vm2585_vm0, %v2649_v32, %v2521_v4  ;;  %2966 = vst.msk [vmem:[%s3606_s28 + $0xd0] sm:$0xff] %vm2939_vm11, %v2933_v28 }
 0x41e   : > { %v2714_v22 = vsel %vm2586_vm1, %v2650_v31, %v2522_v0  ;;  %v2809_v29 = vmul.f32 %v2713_v2, %v2713_v2 }
 0x41f   : > { %v2810_v26 = vmul.f32 %v2714_v22, %v2714_v22 }
 0x421   : > { %v2904_v24 = vadd.f32 %v2810_v26, %v2809_v29 }
 0x423   : > { %2905 = vadd.xlane.f32.xlu1 %v2904_v24 }
 0x428   : > { %v2846_v1 = vpop.xlane.xlu1 %2845 }
 0x429   : > { %v2918_v15 = vadd.f32 %v2846_v1, %v2726_v6 }
 0x42b   : > { %2951 = vst.msk [vmem:[%s3606_s28 + $0x58] sm:$0xff] %vm2939_vm11, %v2918_v15 }
 0x438   : > { %v2894_v41 = vpop.xlane.xlu1 %2893 }
 0x439   : > { %v2934_v14 = vadd.f32 %v2894_v41, %v2742_v50 }
 0x43b   : > { %2967 = vst.msk [vmem:[%s3606_s28 + $0xd8] sm:$0xff] %vm2939_vm11, %v2934_v14 }
 0x448   : > { %v2849_v48 = vpop.xlane.xlu0 %2848 }
 0x449   : > { %v2919_v43 = vadd.f32 %v2849_v48, %v2727_v53 }
 0x44b   : > { %2952 = vst.msk [vmem:[%s3606_s28 + $0x60] sm:$0xff] %vm2939_vm11, %v2919_v43 }
 0x456   : > { %v2897_v62 = vpop.xlane.xlu0 %2896 }
 0x457   : > { %v2935_v8 = vadd.f32 %v2897_v62, %v2743_v55 }
 0x459   : > { %2968 = vst.msk [vmem:[%s3606_s28 + $0xe0] sm:$0xff] %vm2939_vm11, %v2935_v8 }
 0x464   : > { %v2852_v16 = vpop.xlane.xlu1 %2851 }
 0x465   : > { %v2920_v7 = vadd.f32 %v2852_v16, %v2728_v23 }
 0x467   : > { %2953 = vst.msk [vmem:[%s3606_s28 + $0x68] sm:$0xff] %vm2939_vm11, %v2920_v7 }
 0x474   : > { %v2900_v25 = vpop.xlane.xlu1 %2899 }
 0x475   : > { %v2936_v46 = vadd.f32 %v2900_v25, %v2744_v11 }
 0x477   : > { %2969 = vst.msk [vmem:[%s3606_s28 + $0xe8] sm:$0xff] %vm2939_vm11, %v2936_v46 }
 0x484   : > { %v2855_v20 = vpop.xlane.xlu0 %2854 }
 0x485   : > { %v2921_v39 = vadd.f32 %v2855_v20, %v2729_v47 }
 0x487   : > { %2954 = vst.msk [vmem:[%s3606_s28 + $0x70] sm:$0xff] %vm2939_vm11, %v2921_v39 }
 0x493   : > { %v2903_v44 = vpop.xlane.xlu0 %2902 }
 0x494   : > { %v2937_v61 = vadd.f32 %v2903_v44, %v2745_v49 }
 0x496   : > { %2970 = vst.msk [vmem:[%s3606_s28 + $0xf0] sm:$0xff] %vm2939_vm11, %v2937_v61 }
 0x4a1   : > { %v2858_v60 = vpop.xlane.xlu1 %2857 }
 0x4a2   : > { %v2922_v40 = vadd.f32 %v2858_v60, %v2730_v36 }
 0x4a4   : > { %2955 = vst.msk [vmem:[%s3606_s28 + $0x78] sm:$0xff] %vm2939_vm11, %v2922_v40 }
 0x4b0   : > { %v2906_v54 = vpop.xlane.xlu1 %2905 }
 0x4b1   : > { %v2938_v63 = vadd.f32 %v2906_v54, %v2746_v12 }
 0x4b3   : > { %2971 = vst.msk [vmem:[%s3606_s28 + $0xf8] sm:$0xff] %vm2939_vm11, %v2938_v63 }
 0x4b4 PF: > { %s12_s13 = sadd.s32 1, %s3545_s13   ;;  %s6626_s9 = smov %s3537_s11 }
 0x4b5   : > { %p9_p8 = scmp.ge.s32.totalorder %s12_s13, 6   ;;  %s6627_s10 = smov %s3541_s12 }
 0x4b6   : > { %s6628_s11 = smov %s6631_s14  ;;  %s6629_s12 = smov %s6635_s15 }
 0x4b7   :  { %11 = sbr.rel (!%p9_p8) target bundleno = 3 (0x3), region = 65 }

</bundles_post_ra>
